<compile_context>
chip_gen: v6e
topology: v6e:2x2x1
jax: 0.10.0
libtpu: 0.0.40
codegen_flags: <defaults>
</compile_context>

<pallas_src>
import functools

import numpy as np
import jax
import jax.numpy as jnp
from jax.experimental import pallas as pl
from jax.experimental.pallas import tpu as pltpu


def _fused_cnn_kernel(x_ref, w1_ref, w2_ref, pm_ref, mask_ref, fw1_ref, fw2_ref,
                      vec_ref, o_ref, *, n, hw, num_classes, eps=1e-5):
    img = hw * hw                       # flattened per-image stride (28*28 = 784)
    cols = n * img                      # columns of every flat activation
    c1 = w1_ref.shape[0]                # 16
    c2 = w2_ref.shape[0]                # 32
    hidden = fw1_ref.shape[0]           # 32
    p_out = pm_ref.shape[1]             # 16 (= 4*4 pooled positions)
    h2 = hw - 4                         # 24: spatial size after both valid convs
    nvalid = n * h2 * h2                # elements per channel entering BN stats
    pad = x_ref.shape[1] - cols         # zero lane-padding (>= 2*hw+2)

    # ---- packed per-channel params, already (C, 1) column vectors -------------------
    o1 = c1
    o2 = o1 + c2
    o3 = o2 + c2
    o4 = o3 + hidden
    b1 = vec_ref[0:o1, :]               # (16, 1) conv1 bias
    gamma = vec_ref[o1:o2, :]           # (32, 1) BN weight
    beta = vec_ref[o2:o3, :]            # (32, 1) BN bias
    fb1 = vec_ref[o3:o4, :]             # (32, 1) fc1 bias
    fb2 = vec_ref[o4:o4 + num_classes, :]  # (nc, 1) fc2 bias

    # ---- conv1 (1 -> 16): shift-built im2col + one channel-major MXU matmul ---------
    # x_ref is (1, N*784 + pad): tap (dy,dx) of the "full grid" conv is a lane shift
    # by dy*28+dx, so the patch matrix is just 9 overlapping lane slices.
    p1 = jnp.concatenate(
        [x_ref[:, dy * hw + dx: dy * hw + dx + cols]
         for dy in range(3) for dx in range(3)], axis=0)                    # (9, cols)
    y1 = jnp.maximum(
        jnp.dot(w1_ref[...], p1, preferred_element_type=jnp.float32) + b1,
        0.0)                                                                # (16, cols)

    # ---- conv2 (16 -> 32): shift-built im2col, single K=144 MXU contraction ---------
    y1p = jnp.concatenate([y1, jnp.zeros((c1, pad), jnp.float32)], axis=1)  # (16, cols+pad)
    p2 = jnp.concatenate(
        [y1p[:, dy * hw + dx: dy * hw + dx + cols]
         for dy in range(3) for dx in range(3)], axis=0)                    # (144, cols)
    y2 = jnp.dot(w2_ref[...], p2, preferred_element_type=jnp.float32)       # (32, cols)
    # conv2 bias intentionally omitted: it cancels under training-mode BatchNorm.

    # ---- BatchNorm2d (batch stats, biased var) + ReLU: single pass, lane reduces ----
    y2m = y2 * mask_ref[...]            # zero out invalid "full grid" columns
    cnt = jnp.float32(nvalid)
    s = jnp.sum(y2m, axis=1, keepdims=True)                                 # (32, 1)
    ss = jnp.sum(y2m * y2m, axis=1, keepdims=True)                          # (32, 1)
    mean = s / cnt
    var = ss / cnt - mean * mean
    scale = gamma * jax.lax.rsqrt(var + eps)
    shift = beta - mean * scale
    yb = jnp.maximum(y2m * scale + shift, 0.0)                              # (32, cols)

    # ---- adaptive_avg_pool2d -> (4,4) as a matmul with a constant pooling matrix ----
    pm = pm_ref[...]                                                        # (784, 16)
    pooled = jnp.stack(
        [jnp.dot(yb[:, b * img:(b + 1) * img], pm,
                 preferred_element_type=jnp.float32) for b in range(n)],
        axis=-1)                                                            # (32, 16, N)
    feat = pooled.reshape(c2 * p_out, n)         # (512, N), rows in torch CHW order

    # ---- fc1 + ReLU + fc2 (channel-major; weights in exact torch (out,in) layout) ---
    hid = jnp.maximum(
        jnp.dot(fw1_ref[...], feat, preferred_element_type=jnp.float32) + fb1,
        0.0)                                                                # (32, N)
    out = jnp.dot(fw2_ref[...], hid, preferred_element_type=jnp.float32) + fb2  # (nc, N)
    o_ref[...] = out.T                                                      # (N, nc)


def _pool_matrix(hw, out_hw=4):
    """(hw*hw, 16) matrix: mean over each 6x6 window of the valid 24x24 region."""
    conv_hw = hw - 4
    win = conv_hw // out_hw
    pm = np.zeros((hw * hw, out_hw * out_hw), np.float32)
    for y in range(conv_hw):
        for x in range(conv_hw):
            pm[y * hw + x, (y // win) * out_hw + (x // win)] = 1.0 / (win * win)
    return pm


def _valid_mask(n, hw):
    """(1, n*hw*hw) 0/1 mask selecting the valid (hw-4)x(hw-4) conv2 outputs."""
    conv_hw = hw - 4
    m = np.zeros((hw, hw), np.float32)
    m[:conv_hw, :conv_hw] = 1.0
    return np.tile(m.reshape(-1), n)[None, :]


@jax.jit
def model_forward(x_nchw, params):
    n, cin, hh, ww = x_nchw.shape
    assert cin == 1 and hh == ww, "kernel specialised to single-channel square inputs"
    hw = hh
    assert (hw - 4) % 4 == 0, "spatial size after convs must divide the 4x4 pool"
    num_classes = params["fw2"].shape[0]

    pad = -(-(2 * hw + 2) // 64) * 64                       # 64 for hw=28
    x_flat = x_nchw.astype(jnp.float32).reshape(1, n * hw * hw)
    x_flat = jnp.pad(x_flat, ((0, 0), (0, pad)))

    poolmat = jnp.asarray(_pool_matrix(hw))                 # (784, 16)
    mask = jnp.asarray(_valid_mask(n, hw))                  # (1, n*784)
    vec = jnp.concatenate([params["b1"], params["gamma"], params["beta"],
                           params["fb1"], params["fb2"]], axis=0)   # (112+nc, 1)

    kern = functools.partial(_fused_cnn_kernel, n=n, hw=hw, num_classes=num_classes)
    flops = 2 * n * hw * hw * (16 * 9 + 32 * 144 + 32 * 16) \
        + 2 * n * (512 * 32 + 32 * num_classes)
    bytes_accessed = 4 * (x_flat.size + params["w1"].size + params["w2"].size
                          + poolmat.size + mask.size + params["fw1"].size
                          + params["fw2"].size + vec.size + n * num_classes)

    return pl.pallas_call(
        kern,
        out_shape=jax.ShapeDtypeStruct((n, num_classes), jnp.float32),
        in_specs=[pl.BlockSpec(memory_space=pltpu.MemorySpace.VMEM)] * 8,
        out_specs=pl.BlockSpec(memory_space=pltpu.MemorySpace.VMEM),
        cost_estimate=pl.CostEstimate(flops=flops, transcendentals=32,
                                      bytes_accessed=bytes_accessed),
    )(x_flat, params["w1"], params["w2"], poolmat, mask,
      params["fw1"], params["fw2"], vec)


def init_params(key, num_classes=10):
    ks = jax.random.split(key, 9)
    return dict(
        # conv1 weight: torch conv1.weight (16,1,3,3).reshape(16, 9); col = dy*3+dx
        w1=jax.random.normal(ks[0], (16, 9), jnp.float32) * 0.1,
        b1=jax.random.normal(ks[1], (16, 1), jnp.float32) * 0.05,
        # conv2 weight: torch conv2.weight (32,16,3,3).transpose(0,2,3,1).reshape(32,144)
        # (col = (dy*3+dx)*16 + c_in).  conv2 bias omitted (cancelled by BN).
        w2=jax.random.normal(ks[2], (32, 144), jnp.float32) * 0.05,
        gamma=1.0 + jax.random.normal(ks[3], (32, 1), jnp.float32) * 0.05,
        beta=jax.random.normal(ks[4], (32, 1), jnp.float32) * 0.05,
        # fc weights in exact torch (out, in) storage layout
        fw1=jax.random.normal(ks[5], (32, 512), jnp.float32) * 0.05,
        fb1=jax.random.normal(ks[6], (32, 1), jnp.float32) * 0.05,
        fw2=jax.random.normal(ks[7], (num_classes, 32), jnp.float32) * 0.1,
        fb2=jax.random.normal(ks[8], (num_classes, 1), jnp.float32) * 0.05,
    )


if __name__ == "__main__":
    key = jax.random.PRNGKey(0)
    kx, kp = jax.random.split(key)
    # MNIST-like input, PyTorch NCHW convention: (batch=2, channels=1, 28, 28)
    x = jax.random.normal(kx, (2, 1, 28, 28), jnp.float32)
    params = init_params(kp, num_classes=10)

    logits = jax.block_until_ready(model_forward(x, params))

    assert logits.shape == (2, 10), logits.shape
    assert bool(jnp.all(jnp.isfinite(logits)))
    print("KERNEL_OK")
</pallas_src>

<mosaic_0001>
module attributes {stable_mosaic.version = 11 : i64} {
  func.func @_fused_cnn_kernel(%arg0: memref<1x1632xf32, #tpu.memory_space<vmem>>, %arg1: memref<16x9xf32, #tpu.memory_space<vmem>>, %arg2: memref<32x144xf32, #tpu.memory_space<vmem>>, %arg3: memref<784x16xf32, #tpu.memory_space<vmem>>, %arg4: memref<1x1568xf32, #tpu.memory_space<vmem>>, %arg5: memref<32x512xf32, #tpu.memory_space<vmem>>, %arg6: memref<10x32xf32, #tpu.memory_space<vmem>>, %arg7: memref<122x1xf32, #tpu.memory_space<vmem>>, %arg8: memref<2x10xf32, #tpu.memory_space<vmem>>) attributes {dimension_semantics = [], scalar_prefetch = 0 : i64, scratch_operands = 0 : i64, tpu.core_type = #tpu.core_type<tc>} {
    %c0 = arith.constant 0 : index
    %c0_0 = arith.constant 0 : index
    %0 = vector.load %arg7[%c0, %c0_0] : memref<122x1xf32, #tpu.memory_space<vmem>>, vector<16x1xf32>
    %c16 = arith.constant 16 : index
    %c0_1 = arith.constant 0 : index
    %1 = vector.load %arg7[%c16, %c0_1] : memref<122x1xf32, #tpu.memory_space<vmem>>, vector<32x1xf32>
    %c48 = arith.constant 48 : index
    %c0_2 = arith.constant 0 : index
    %2 = vector.load %arg7[%c48, %c0_2] : memref<122x1xf32, #tpu.memory_space<vmem>>, vector<32x1xf32>
    %c80 = arith.constant 80 : index
    %c0_3 = arith.constant 0 : index
    %3 = vector.load %arg7[%c80, %c0_3] : memref<122x1xf32, #tpu.memory_space<vmem>>, vector<32x1xf32>
    %c112 = arith.constant 112 : index
    %c0_4 = arith.constant 0 : index
    %4 = vector.load %arg7[%c112, %c0_4] : memref<122x1xf32, #tpu.memory_space<vmem>>, vector<10x1xf32>
    %c0_5 = arith.constant 0 : index
    %c0_6 = arith.constant 0 : index
    %5 = vector.load %arg0[%c0_5, %c0_6] : memref<1x1632xf32, #tpu.memory_space<vmem>>, vector<1x1568xf32>
    %c0_7 = arith.constant 0 : index
    %c1 = arith.constant 1 : index
    %6 = vector.load %arg0[%c0_7, %c1] : memref<1x1632xf32, #tpu.memory_space<vmem>>, vector<1x1568xf32>
    %c0_8 = arith.constant 0 : index
    %c2 = arith.constant 2 : index
    %7 = vector.load %arg0[%c0_8, %c2] : memref<1x1632xf32, #tpu.memory_space<vmem>>, vector<1x1568xf32>
    %c0_9 = arith.constant 0 : index
    %c28 = arith.constant 28 : index
    %8 = vector.load %arg0[%c0_9, %c28] : memref<1x1632xf32, #tpu.memory_space<vmem>>, vector<1x1568xf32>
    %c0_10 = arith.constant 0 : index
    %c29 = arith.constant 29 : index
    %9 = vector.load %arg0[%c0_10, %c29] : memref<1x1632xf32, #tpu.memory_space<vmem>>, vector<1x1568xf32>
    %c0_11 = arith.constant 0 : index
    %c30 = arith.constant 30 : index
    %10 = vector.load %arg0[%c0_11, %c30] : memref<1x1632xf32, #tpu.memory_space<vmem>>, vector<1x1568xf32>
    %c0_12 = arith.constant 0 : index
    %c56 = arith.constant 56 : index
    %11 = vector.load %arg0[%c0_12, %c56] : memref<1x1632xf32, #tpu.memory_space<vmem>>, vector<1x1568xf32>
    %c0_13 = arith.constant 0 : index
    %c57 = arith.constant 57 : index
    %12 = vector.load %arg0[%c0_13, %c57] : memref<1x1632xf32, #tpu.memory_space<vmem>>, vector<1x1568xf32>
    %c0_14 = arith.constant 0 : index
    %c58 = arith.constant 58 : index
    %13 = vector.load %arg0[%c0_14, %c58] : memref<1x1632xf32, #tpu.memory_space<vmem>>, vector<1x1568xf32>
    %14 = tpu.concatenate %5, %6, %7, %8, %9, %10, %11, %12, %13 in 0 : vector<1x1568xf32>, vector<1x1568xf32>, vector<1x1568xf32>, vector<1x1568xf32>, vector<1x1568xf32>, vector<1x1568xf32>, vector<1x1568xf32>, vector<1x1568xf32>, vector<1x1568xf32> -> vector<9x1568xf32>
    %c0_15 = arith.constant 0 : index
    %c0_16 = arith.constant 0 : index
    %15 = vector.load %arg1[%c0_15, %c0_16] : memref<16x9xf32, #tpu.memory_space<vmem>>, vector<16x9xf32>
    %cst = arith.constant dense<0.000000e+00> : vector<16x1568xf32>
    %16 = tpu.matmul %15, %14, %cst {dimension_numbers = #tpu.dot_dimension_numbers<[1], [0], [0], [1], [0, 0, 1, 1], [], []>} : vector<16x9xf32>, vector<9x1568xf32>, vector<16x1568xf32> -> vector<16x1568xf32>
    %17 = vector.broadcast %0 : vector<16x1xf32> to vector<16x1568xf32>
    %18 = arith.addf %16, %17 : vector<16x1568xf32>
    %cst_17 = arith.constant 0.000000e+00 : f32
    %19 = vector.broadcast %cst_17 : f32 to vector<16x1568xf32>
    %20 = arith.maximumf %18, %19 : vector<16x1568xf32>
    %cst_18 = arith.constant 0.000000e+00 : f32
    %21 = vector.broadcast %cst_18 : f32 to vector<16x64xf32>
    %22 = tpu.concatenate %20, %21 in 1 : vector<16x1568xf32>, vector<16x64xf32> -> vector<16x1632xf32>
    %23 = vector.extract_strided_slice %22 {offsets = [0, 0], sizes = [16, 1568], strides = [1, 1]} : vector<16x1632xf32> to vector<16x1568xf32>
    %24 = vector.extract_strided_slice %22 {offsets = [0, 1], sizes = [16, 1568], strides = [1, 1]} : vector<16x1632xf32> to vector<16x1568xf32>
    %25 = vector.extract_strided_slice %22 {offsets = [0, 2], sizes = [16, 1568], strides = [1, 1]} : vector<16x1632xf32> to vector<16x1568xf32>
    %26 = vector.extract_strided_slice %22 {offsets = [0, 28], sizes = [16, 1568], strides = [1, 1]} : vector<16x1632xf32> to vector<16x1568xf32>
    %27 = vector.extract_strided_slice %22 {offsets = [0, 29], sizes = [16, 1568], strides = [1, 1]} : vector<16x1632xf32> to vector<16x1568xf32>
    %28 = vector.extract_strided_slice %22 {offsets = [0, 30], sizes = [16, 1568], strides = [1, 1]} : vector<16x1632xf32> to vector<16x1568xf32>
    %29 = vector.extract_strided_slice %22 {offsets = [0, 56], sizes = [16, 1568], strides = [1, 1]} : vector<16x1632xf32> to vector<16x1568xf32>
    %30 = vector.extract_strided_slice %22 {offsets = [0, 57], sizes = [16, 1568], strides = [1, 1]} : vector<16x1632xf32> to vector<16x1568xf32>
    %31 = vector.extract_strided_slice %22 {offsets = [0, 58], sizes = [16, 1568], strides = [1, 1]} : vector<16x1632xf32> to vector<16x1568xf32>
    %32 = tpu.concatenate %23, %24, %25, %26, %27, %28, %29, %30, %31 in 0 : vector<16x1568xf32>, vector<16x1568xf32>, vector<16x1568xf32>, vector<16x1568xf32>, vector<16x1568xf32>, vector<16x1568xf32>, vector<16x1568xf32>, vector<16x1568xf32>, vector<16x1568xf32> -> vector<144x1568xf32>
    %c0_19 = arith.constant 0 : index
    %c0_20 = arith.constant 0 : index
    %33 = vector.load %arg2[%c0_19, %c0_20] : memref<32x144xf32, #tpu.memory_space<vmem>>, vector<32x144xf32>
    %cst_21 = arith.constant dense<0.000000e+00> : vector<32x1568xf32>
    %34 = tpu.matmul %33, %32, %cst_21 {dimension_numbers = #tpu.dot_dimension_numbers<[1], [0], [0], [1], [0, 0, 1, 1], [], []>} : vector<32x144xf32>, vector<144x1568xf32>, vector<32x1568xf32> -> vector<32x1568xf32>
    %c0_22 = arith.constant 0 : index
    %c0_23 = arith.constant 0 : index
    %35 = vector.load %arg4[%c0_22, %c0_23] : memref<1x1568xf32, #tpu.memory_space<vmem>>, vector<1x1568xf32>
    %36 = vector.broadcast %35 : vector<1x1568xf32> to vector<32x1568xf32>
    %37 = arith.mulf %34, %36 : vector<32x1568xf32>
    %cst_24 = arith.constant dense<0.000000e+00> : vector<32xf32>
    %38 = vector.multi_reduction <add>, %37, %cst_24 [1] : vector<32x1568xf32> to vector<32xf32>
    %39 = vector.shape_cast %38 : vector<32xf32> to vector<32x1xf32>
    %40 = arith.mulf %37, %37 : vector<32x1568xf32>
    %cst_25 = arith.constant dense<0.000000e+00> : vector<32xf32>
    %41 = vector.multi_reduction <add>, %40, %cst_25 [1] : vector<32x1568xf32> to vector<32xf32>
    %42 = vector.shape_cast %41 : vector<32xf32> to vector<32x1xf32>
    %cst_26 = arith.constant 1.152000e+03 : f32
    %43 = vector.broadcast %cst_26 : f32 to vector<32x1xf32>
    %44 = arith.divf %39, %43 : vector<32x1xf32>
    %cst_27 = arith.constant 1.152000e+03 : f32
    %45 = vector.broadcast %cst_27 : f32 to vector<32x1xf32>
    %46 = arith.divf %42, %45 : vector<32x1xf32>
    %47 = arith.mulf %44, %44 : vector<32x1xf32>
    %48 = arith.subf %46, %47 : vector<32x1xf32>
    %cst_28 = arith.constant 9.99999974E-6 : f32
    %49 = vector.broadcast %cst_28 : f32 to vector<32x1xf32>
    %50 = arith.addf %48, %49 : vector<32x1xf32>
    %51 = math.rsqrt %50 : vector<32x1xf32>
    %52 = arith.mulf %1, %51 : vector<32x1xf32>
    %53 = arith.mulf %44, %52 : vector<32x1xf32>
    %54 = arith.subf %2, %53 : vector<32x1xf32>
    %55 = vector.broadcast %52 : vector<32x1xf32> to vector<32x1568xf32>
    %56 = arith.mulf %37, %55 : vector<32x1568xf32>
    %57 = vector.broadcast %54 : vector<32x1xf32> to vector<32x1568xf32>
    %58 = arith.addf %56, %57 : vector<32x1568xf32>
    %cst_29 = arith.constant 0.000000e+00 : f32
    %59 = vector.broadcast %cst_29 : f32 to vector<32x1568xf32>
    %60 = arith.maximumf %58, %59 : vector<32x1568xf32>
    %c0_30 = arith.constant 0 : index
    %c0_31 = arith.constant 0 : index
    %61 = vector.load %arg3[%c0_30, %c0_31] : memref<784x16xf32, #tpu.memory_space<vmem>>, vector<784x16xf32>
    %62 = vector.extract_strided_slice %60 {offsets = [0, 0], sizes = [32, 784], strides = [1, 1]} : vector<32x1568xf32> to vector<32x784xf32>
    %cst_32 = arith.constant dense<0.000000e+00> : vector<32x16xf32>
    %63 = tpu.matmul %62, %61, %cst_32 {dimension_numbers = #tpu.dot_dimension_numbers<[1], [0], [0], [1], [0, 0, 1, 1], [], []>} : vector<32x784xf32>, vector<784x16xf32>, vector<32x16xf32> -> vector<32x16xf32>
    %64 = vector.extract_strided_slice %60 {offsets = [0, 784], sizes = [32, 784], strides = [1, 1]} : vector<32x1568xf32> to vector<32x784xf32>
    %cst_33 = arith.constant dense<0.000000e+00> : vector<32x16xf32>
    %65 = tpu.matmul %64, %61, %cst_33 {dimension_numbers = #tpu.dot_dimension_numbers<[1], [0], [0], [1], [0, 0, 1, 1], [], []>} : vector<32x784xf32>, vector<784x16xf32>, vector<32x16xf32> -> vector<32x16xf32>
    %66 = vector.shape_cast %63 : vector<32x16xf32> to vector<32x16x1xf32>
    %67 = vector.shape_cast %65 : vector<32x16xf32> to vector<32x16x1xf32>
    %68 = tpu.concatenate %66, %67 in 2 : vector<32x16x1xf32>, vector<32x16x1xf32> -> vector<32x16x2xf32>
    %69 = vector.shape_cast %68 : vector<32x16x2xf32> to vector<512x2xf32>
    %c0_34 = arith.constant 0 : index
    %c0_35 = arith.constant 0 : index
    %70 = vector.load %arg5[%c0_34, %c0_35] : memref<32x512xf32, #tpu.memory_space<vmem>>, vector<32x512xf32>
    %cst_36 = arith.constant dense<0.000000e+00> : vector<32x2xf32>
    %71 = tpu.matmul %70, %69, %cst_36 {dimension_numbers = #tpu.dot_dimension_numbers<[1], [0], [0], [1], [0, 0, 1, 1], [], []>} : vector<32x512xf32>, vector<512x2xf32>, vector<32x2xf32> -> vector<32x2xf32>
    %72 = vector.broadcast %3 : vector<32x1xf32> to vector<32x2xf32>
    %73 = arith.addf %71, %72 : vector<32x2xf32>
    %cst_37 = arith.constant 0.000000e+00 : f32
    %74 = vector.broadcast %cst_37 : f32 to vector<32x2xf32>
    %75 = arith.maximumf %73, %74 : vector<32x2xf32>
    %c0_38 = arith.constant 0 : index
    %c0_39 = arith.constant 0 : index
    %76 = vector.load %arg6[%c0_38, %c0_39] : memref<10x32xf32, #tpu.memory_space<vmem>>, vector<10x32xf32>
    %cst_40 = arith.constant dense<0.000000e+00> : vector<10x2xf32>
    %77 = tpu.matmul %76, %75, %cst_40 {dimension_numbers = #tpu.dot_dimension_numbers<[1], [0], [0], [1], [0, 0, 1, 1], [], []>} : vector<10x32xf32>, vector<32x2xf32>, vector<10x2xf32> -> vector<10x2xf32>
    %78 = vector.broadcast %4 : vector<10x1xf32> to vector<10x2xf32>
    %79 = arith.addf %77, %78 : vector<10x2xf32>
    %80 = tpu.transpose %79, [1, 0] : vector<10x2xf32> -> vector<2x10xf32>
    %c0_41 = arith.constant 0 : index
    %c0_42 = arith.constant 0 : index
    %81 = vector.load %arg8[%c0_41, %c0_42] : memref<2x10xf32, #tpu.memory_space<vmem>>, vector<2x10xf32>
    tpu.vector_store %arg8[%c0_41, %c0_42], %80 {strides = array<i32>} : memref<2x10xf32, #tpu.memory_space<vmem>>, vector<2x10xf32>,
    return
  }
}

</mosaic_0001>

<bundles_post_ra>
// kernel: model_forward.1
= control target key start
LH: loop header
LB: loop body
LE: loop exit
PB: predicated region body
PF: predicated region fallthrough
CT: control target
= control target key end

     0   :  { %13 = vsyncpa [#allocation3], 0  ;;  %s9609_s0 = inlined_call_operand.vmem [shape: f32[1,1632], index: 0, kind: input, shape index: {}]   ;;  %s9610_s1 = inlined_call_operand.vmem [shape: f32[16,9], index: 1, kind: input, shape index: {}]   ;;  %s9611_s2 = inlined_call_operand.vmem [shape: f32[32,144], index: 2, kind: input, shape index: {}]   ;;  %s9612_s3 = inlined_call_operand.hbm [shape: f32[784,16], index: 3, kind: input, shape index: {}]   ;;  %s9613_s4 = inlined_call_operand.vmem [shape: f32[1,1568], index: 4, kind: input, shape index: {}]   ;;  %s9614_s5 = inlined_call_operand.vmem [shape: f32[32,512], index: 5, kind: input, shape index: {}]   ;;  %s9615_s6 = inlined_call_operand.vmem [shape: f32[10,32], index: 6, kind: input, shape index: {}]   ;;  %s9616_s7 = inlined_call_operand.vmem [shape: f32[122,1], index: 7, kind: input, shape index: {}]   ;;  %s9617_s8 = inlined_call_operand.hbm [shape: f32[2,10], index: 8, kind: output, shape index: {}]  }
   0x1   :  { %14 = vsyncpa [#allocation4], 0  ;;  %s5913_s27 = smov [#allocation2]  }
   0x2   :  { %s26_s28 = sshll.u32 %s5913_s27, 4  ;;  %s27_s28 = int_to_ptr.vmem [resolvable:$true] %s26_s28 }
   0x3   :  { %s5877_s29 = scalar_lea.vmem %s27_s28, 12544  ;;  %p5882_p1 = scmp.lt.s32.totalorder %s27_s28, %s27_s28 }
   0x4   :  { %p5878_p0 = scmp.ne.s32.totalorder %s27_s28, %s5877_s29  ;;  %p5883_p2 = scmp.lt.s32.totalorder %s5877_s29, %s5877_s29 }
   0x6   :  { %p5884_p3 = por %p5883_p2, %p5882_p1 }
   0x8   :  { %p5885_p4 = pnand %p5884_p3, %p5878_p0 }
   0xa   :  { %5888 = shalt.err (!%p5885_p4)
}
   0xb   :  { %s5914_s30 = smov 128   ;;  %s5915_s9 = smov 8  }
   0xc   :  { %32 = dma.hbm_to_vmem [thread:$0]  %s9612_s3, 12544, %s27_s28, [#allocation3], %s5914_s30, %s5914_s30, %s5915_s9  }
   0xd   :  { %5909 = dma.done.wait [#allocation3], 12544  }
   0xe   :  { %5910 = vsyncadd [#allocation3], 4294954752  ;;  %v64_v0 = vlaneseq  ;;  %v5990_v5 = vld [vmem:[%s9609_s0] sm:$0xff]  ;;  %s5916_s3 = smov 127   ;;  %s5917_s14 = smov 126   ;;  %v9618_v13 = vmov 0.0  }
   0xf   :  { %s5918_s15 = smov 100   ;;  %s5919_s16 = smov 99   ;;  %739 = vmatprep.mubr.f32.mxu0 %v9618_v13  ;;  %816 = vmatprep.mubr.f32.mxu1 %v9618_v13  ;;  %v6128_v19 = vld [vmem:[%s9609_s0 + $0x8] sm:$0x1f]  ;;  %v5925_v28 = vmov 0   ;;  %vm519_vm0 = vcmask 572416  }
  0x10   :  { %v5976_v1 = vshrl.u32 %v64_v0, 7  ;;  %s5920_s17 = smov 98   ;;  %s5921_s18 = smov 72   ;;  %5792 = vset.pattern.permute.xlu1 %v5925_v28  ;;  %5791 = vset.pattern.permute.xlu0 %v5925_v28  ;;  %vm532_vm1 = vcmask 1040384   ;;  %vm207_vm2 = vcmask 1031168   ;;  %vm155_vm3 = vcmask 1039360  }
  0x11   :  { %s5922_s19 = smov 70   ;;  %s5924_s20 = smov 71   ;;  %vm259_vm4 = vcmask 818176   ;;  %vm311_vm5 = vcmask 809984   ;;  %vm546_vm6 = vcmask 1041408   ;;  %vm560_vm7 = vcmask 1042432  }
  0x12   :  { %v5979_v2 = vsub.s32 1, %v5976_v1  ;;  %v5982_v3 = vsub.s32 0, %v5976_v1  ;;  %v5985_v4 = vsub.s32 2, %v5976_v1  ;;  %v6009_v9 = vsub.s32 3, %v5976_v1  ;;  %s5927_s29 = smov [#allocation5]  }
  0x13   :  { %v6020_v11 = vsub.s32 4, %v5976_v1  ;;  %v6097_v14 = vsub.s32 5, %v5976_v1  ;;  %v6100_v15 = vsub.s32 6, %v5976_v1  ;;  %v6123_v18 = vsub.s32 7, %v5976_v1 }
  0x14   :  { %9713 = vst [vmem:[#allocation8_spill] sm:$0xff] %v5979_v2  ;;  %9714 = vst [vmem:[#allocation9_spill] sm:$0xff] %v5982_v3  ;;  %v5994_v6 = vrot.slane %v5990_v5, %v5979_v2  ;;  %v5998_v7 = vrot.slane %v5990_v5, %v5982_v3  ;;  %v6006_v8 = vrot.slane %v5990_v5, %v5985_v4  ;;  %vm363_vm8 = vcmask 801792  }
  0x15   :  { %9715 = vst [vmem:[#allocation10_spill] sm:$0xff] %v5985_v4  ;;  %9716 = vst [vmem:[#allocation11_spill] sm:$0xff] %v6009_v9  ;;  %v6017_v10 = vrot.slane %v5990_v5, %v6009_v9  ;;  %v6028_v12 = vrot.slane %v5990_v5, %v6020_v11  ;;  %v6108_v16 = vrot.slane %v5990_v5, %v6097_v14  ;;  %vm574_vm9 = vcmask 1043456  }
  0x16   :  { %131 = vrot.lane.b32.xlu0 %v5994_v6, %s5916_s3  ;;  %129 = vrot.lane.b32.xlu1 %v5998_v7, %s5916_s3  ;;  %9717 = vst [vmem:[#allocation12_spill] sm:$0xff] %v6020_v11  ;;  %9718 = vst [vmem:[#allocation13_spill] sm:$0xff] %v6097_v14  ;;  %v6112_v17 = vrot.slane %v5990_v5, %v6100_v15  ;;  %v6136_v20 = vrot.slane %v5990_v5, %v6123_v18  ;;  %vm588_vm10 = vcmask 1044480   ;;  %vm415_vm11 = vcmask 588800  }
  0x17   :  { %9719 = vst [vmem:[#allocation14_spill] sm:$0xff] %v6100_v15  ;;  %9720 = vst [vmem:[#allocation15_spill] sm:$0xff] %v6123_v18  ;;  %v6140_v21 = vrot.slane %v6128_v19, %v5982_v3  ;;  %v6224_v37 = vrot.slane %v6128_v19, %v5979_v2  ;;  %v6228_v38 = vrot.slane %v6128_v19, %v5985_v4  ;;  %vm467_vm12 = vcmask 580608  }
  0x18   :  { %v6256_v45 = vrot.slane %v6128_v19, %v6009_v9  ;;  %v6260_v46 = vrot.slane %v6128_v19, %v6020_v11  ;;  %vm602_vm13 = vcmask 1045504   ;;  %vm616_vm14 = vcmask 1046528  }
  0x19   :  { %vm642_vm15 = vcmask 72704  }
  0x1a   :  { %133 = vrot.lane.b32.xlu0 %v6006_v8, %s5916_s3  ;;  %183 = vrot.lane.b32.xlu1 %v5994_v6, %s5917_s14 }
  0x1e   :  { %185 = vrot.lane.b32.xlu0 %v6006_v8, %s5917_s14  ;;  %135 = vrot.lane.b32.xlu1 %v6017_v10, %s5916_s3 }
  0x22   :  { %137 = vrot.lane.b32.xlu0 %v6028_v12, %s5916_s3  ;;  %181 = vrot.lane.b32.xlu1 %v5998_v7, %s5917_s14 }
  0x26   :  { %235 = vrot.lane.b32.xlu0 %v5994_v6, %s5918_s15  ;;  %237 = vrot.lane.b32.xlu1 %v6006_v8, %s5918_s15 }
  0x2a   :  { %187 = vrot.lane.b32.xlu0 %v6017_v10, %s5917_s14  ;;  %189 = vrot.lane.b32.xlu1 %v6028_v12, %s5917_s14 }
  0x2e   :  { %233 = vrot.lane.b32.xlu0 %v5998_v7, %s5918_s15  ;;  %287 = vrot.lane.b32.xlu1 %v5994_v6, %s5919_s16 }
  0x32   :  { %289 = vrot.lane.b32.xlu0 %v6006_v8, %s5919_s16  ;;  %239 = vrot.lane.b32.xlu1 %v6017_v10, %s5918_s15 }
  0x36   :  { %241 = vrot.lane.b32.xlu0 %v6028_v12, %s5918_s15  ;;  %285 = vrot.lane.b32.xlu1 %v5998_v7, %s5919_s16 }
  0x3a   :  { %339 = vrot.lane.b32.xlu0 %v5994_v6, %s5920_s17  ;;  %341 = vrot.lane.b32.xlu1 %v6006_v8, %s5920_s17 }
  0x3e   :  { %291 = vrot.lane.b32.xlu0 %v6017_v10, %s5919_s16  ;;  %293 = vrot.lane.b32.xlu1 %v6028_v12, %s5919_s16 }
  0x42   :  { %337 = vrot.lane.b32.xlu0 %v5998_v7, %s5920_s17  ;;  %391 = vrot.lane.b32.xlu1 %v5994_v6, %s5921_s18 }
  0x46   :  { %393 = vrot.lane.b32.xlu0 %v6006_v8, %s5921_s18  ;;  %495 = vrot.lane.b32.xlu1 %v5994_v6, %s5922_s19 }
  0x4a   :  { %497 = vrot.lane.b32.xlu0 %v6006_v8, %s5922_s19  ;;  %343 = vrot.lane.b32.xlu1 %v6017_v10, %s5920_s17 }
  0x4e   :  { %345 = vrot.lane.b32.xlu0 %v6028_v12, %s5920_s17  ;;  %389 = vrot.lane.b32.xlu1 %v5998_v7, %s5921_s18 }
  0x52   :  { %443 = vrot.lane.b32.xlu0 %v5994_v6, %s5924_s20  ;;  %445 = vrot.lane.b32.xlu1 %v6006_v8, %s5924_s20 }
  0x56   :  { %493 = vrot.lane.b32.xlu0 %v5998_v7, %s5922_s19  ;;  %395 = vrot.lane.b32.xlu1 %v6017_v10, %s5921_s18 }
  0x5a   :  { %397 = vrot.lane.b32.xlu0 %v6028_v12, %s5921_s18  ;;  %441 = vrot.lane.b32.xlu1 %v5998_v7, %s5924_s20 }
  0x5e   :  { %499 = vrot.lane.b32.xlu0 %v6017_v10, %s5922_s19  ;;  %501 = vrot.lane.b32.xlu1 %v6028_v12, %s5922_s19 }
  0x62   :  { %447 = vrot.lane.b32.xlu0 %v6017_v10, %s5924_s20  ;;  %449 = vrot.lane.b32.xlu1 %v6028_v12, %s5924_s20 }
  0x66   :  { %139 = vrot.lane.b32.xlu0 %v6108_v16, %s5916_s3  ;;  %141 = vrot.lane.b32.xlu1 %v6112_v17, %s5916_s3 }
  0x6a   :  { %191 = vrot.lane.b32.xlu0 %v6108_v16, %s5917_s14  ;;  %193 = vrot.lane.b32.xlu1 %v6112_v17, %s5917_s14 }
  0x6e   :  { %243 = vrot.lane.b32.xlu0 %v6108_v16, %s5918_s15  ;;  %245 = vrot.lane.b32.xlu1 %v6112_v17, %s5918_s15 }
  0x72   :  { %143 = vrot.lane.b32.xlu0 %v6136_v20, %s5916_s3  ;;  %145 = vrot.lane.b32.xlu1 %v6140_v21, %s5916_s3 }
  0x76   :  { %295 = vrot.lane.b32.xlu0 %v6108_v16, %s5919_s16  ;;  %297 = vrot.lane.b32.xlu1 %v6112_v17, %s5919_s16 }
  0x7a   :  { %195 = vrot.lane.b32.xlu0 %v6136_v20, %s5917_s14  ;;  %197 = vrot.lane.b32.xlu1 %v6140_v21, %s5917_s14 }
  0x7e   :  { %347 = vrot.lane.b32.xlu0 %v6108_v16, %s5920_s17  ;;  %349 = vrot.lane.b32.xlu1 %v6112_v17, %s5920_s17 }
  0x82   :  { %247 = vrot.lane.b32.xlu0 %v6136_v20, %s5918_s15  ;;  %249 = vrot.lane.b32.xlu1 %v6140_v21, %s5918_s15 }
  0x86   :  { %399 = vrot.lane.b32.xlu0 %v6108_v16, %s5921_s18  ;;  %401 = vrot.lane.b32.xlu1 %v6112_v17, %s5921_s18 }
  0x88   :  { %v6166_v22 = vpop.permute.xlu0 %131  ;;  %v6168_v23 = vpop.permute.xlu1 %129 }
  0x89   :  { %v156_v63 = vsel %vm155_vm3, %v6168_v23, %v6166_v22 }
  0x8a   :  { %503 = vrot.lane.b32.xlu0 %v6108_v16, %s5922_s19  ;;  %505 = vrot.lane.b32.xlu1 %v6112_v17, %s5922_s19 }
  0x8c   :  { %v6174_v24 = vpop.permute.xlu0 %133  ;;  %v6176_v25 = vpop.permute.xlu1 %183 }
  0x8d   :  { %v157_v58 = vsel %vm155_vm3, %v6166_v22, %v6174_v24 }
  0x8e   :  { %299 = vrot.lane.b32.xlu0 %v6136_v20, %s5919_s16  ;;  %301 = vrot.lane.b32.xlu1 %v6140_v21, %s5919_s16  ;;  %v534_v0 = vsel %vm532_vm1, %v5994_v6, %v157_v58 }
  0x90   :  { %v6182_v26 = vpop.permute.xlu0 %185  ;;  %v6184_v27 = vpop.permute.xlu1 %135 }
  0x91   :  { %v209_v59 = vsel %vm207_vm2, %v6176_v25, %v6182_v26 }
  0x92   :  { %451 = vrot.lane.b32.xlu0 %v6108_v16, %s5924_s20  ;;  %453 = vrot.lane.b32.xlu1 %v6112_v17, %s5924_s20  ;;  %v548_v5 = vsel %vm546_vm6, %v534_v0, %v209_v59 }
  0x94   :  { %v6190_v29 = vpop.permute.xlu0 %137  ;;  %v6192_v30 = vpop.permute.xlu1 %181 }
  0x95   :  { %v208_v19 = vsel %vm207_vm2, %v6192_v30, %v6176_v25  ;;  %v533_v25 = vsel %vm532_vm1, %v5998_v7, %v156_v63 }
  0x96   :  { %351 = vrot.lane.b32.xlu0 %v6136_v20, %s5920_s17  ;;  %353 = vrot.lane.b32.xlu1 %v6140_v21, %s5920_s17 }
  0x98   :  { %v6198_v31 = vpop.permute.xlu0 %235  ;;  %v6200_v32 = vpop.permute.xlu1 %237 }
  0x99   :  { %v261_v60 = vsel %vm259_vm4, %v6198_v31, %v6200_v32 }
  0x9a   :  { %403 = vrot.lane.b32.xlu0 %v6136_v20, %s5921_s18  ;;  %405 = vrot.lane.b32.xlu1 %v6140_v21, %s5921_s18  ;;  %v562_v6 = vsel %vm560_vm7, %v548_v5, %v261_v60 }
  0x9c   :  { %v6206_v33 = vpop.permute.xlu0 %187  ;;  %v6208_v34 = vpop.permute.xlu1 %189 }
  0x9e   :  { %507 = vrot.lane.b32.xlu0 %v6136_v20, %s5922_s19  ;;  %509 = vrot.lane.b32.xlu1 %v6140_v21, %s5922_s19 }
  0xa0   :  { %v6214_v35 = vpop.permute.xlu0 %233  ;;  %v6216_v36 = vpop.permute.xlu1 %287 }
  0xa1   :  { %v260_v22 = vsel %vm259_vm4, %v6214_v35, %v6198_v31  ;;  %v547_v31 = vsel %vm546_vm6, %v533_v25, %v208_v19  ;;  %v211_v19 = vsel %vm207_vm2, %v6206_v33, %v6208_v34 }
  0xa2   :  { %455 = vrot.lane.b32.xlu0 %v6136_v20, %s5924_s20  ;;  %457 = vrot.lane.b32.xlu1 %v6140_v21, %s5924_s20  ;;  %v561_v63 = vsel %vm560_vm7, %v547_v31, %v260_v22  ;;  %v6420_v31 = vld [vmem:[%s9610_s1 + $0x8] sm:$0xff] }
  0xa4   :  { %v6230_v39 = vpop.permute.xlu0 %289  ;;  %v6232_v40 = vpop.permute.xlu1 %239 }
  0xa5   :  { %v313_v1 = vsel %vm311_vm5, %v6216_v36, %v6230_v39 }
  0xa6   :  { %147 = vrot.lane.b32.xlu0 %v6224_v37, %s5916_s3  ;;  %149 = vrot.lane.b32.xlu1 %v6228_v38, %s5916_s3  ;;  %v576_v30 = vsel %vm574_vm9, %v562_v6, %v313_v1 }
  0xa8   :  { %v6238_v41 = vpop.permute.xlu0 %241  ;;  %v6240_v42 = vpop.permute.xlu1 %285 }
  0xaa   :  { %199 = vrot.lane.b32.xlu0 %v6224_v37, %s5917_s14  ;;  %201 = vrot.lane.b32.xlu1 %v6228_v38, %s5917_s14 }
  0xac   :  { %v6246_v43 = vpop.permute.xlu0 %339  ;;  %v6248_v44 = vpop.permute.xlu1 %341 }
  0xad   :  { %v365_v28 = vsel %vm363_vm8, %v6246_v43, %v6248_v44 }
  0xae   :  { %251 = vrot.lane.b32.xlu0 %v6224_v37, %s5918_s15  ;;  %253 = vrot.lane.b32.xlu1 %v6228_v38, %s5918_s15  ;;  %v590_v35 = vsel %vm588_vm10, %v576_v30, %v365_v28  ;;  %v262_v28 = vsel %vm259_vm4, %v6200_v32, %v6232_v40 }
  0xb0   :  { %v6262_v47 = vpop.permute.xlu0 %291  ;;  %v6264_v48 = vpop.permute.xlu1 %293 }
  0xb1   :  { %v314_v30 = vsel %vm311_vm5, %v6230_v39, %v6262_v47 }
  0xb2   :  { %151 = vrot.lane.b32.xlu0 %v6256_v45, %s5916_s3  ;;  %153 = vrot.lane.b32.xlu1 %v6260_v46, %s5916_s3 }
  0xb4   :  { %v338_v49 = vpop.permute.xlu0 %337  ;;  %v392_v50 = vpop.permute.xlu1 %391 }
  0xb5   :  { %v364_v0 = vsel %vm363_vm8, %v338_v49, %v6246_v43 }
  0xb6   :  { %303 = vrot.lane.b32.xlu0 %v6224_v37, %s5919_s16  ;;  %305 = vrot.lane.b32.xlu1 %v6228_v38, %s5919_s16 }
  0xb8   :  { %v6274_v51 = vpop.permute.xlu0 %393  ;;  %v496_v52 = vpop.permute.xlu1 %495 }
  0xb9   :  { %v417_v23 = vsel %vm415_vm11, %v392_v50, %v6274_v51 }
  0xba   :  { %203 = vrot.lane.b32.xlu0 %v6256_v45, %s5917_s14  ;;  %205 = vrot.lane.b32.xlu1 %v6260_v46, %s5917_s14 }
  0xbc   :  { %v6280_v53 = vpop.permute.xlu0 %497  ;;  %v6282_v54 = vpop.permute.xlu1 %343 }
  0xbd   :  { %v521_v55 = vsel %vm519_vm0, %v496_v52, %v6280_v53 }
  0xbe   :  { %355 = vrot.lane.b32.xlu0 %v6224_v37, %s5920_s17  ;;  %357 = vrot.lane.b32.xlu1 %v6228_v38, %s5920_s17 }
  0xbf   :  { %5297 = vmatprep.subr.msk.mxu0 %vm532_vm1, %v521_v55  ;;  %v312_v55 = vsel %vm311_vm5, %v6240_v42, %v6216_v36  ;;  %v604_v36 = vsel %vm602_vm13, %v590_v35, %v417_v23  ;;  %v158_v42 = vsel %vm155_vm3, %v6174_v24, %v6184_v27  ;;  %v263_v23 = vsel %vm259_vm4, %v6232_v40, %v6238_v41 }
  0xc0   :  { %v6291_v56 = vpop.permute.xlu0 %345  ;;  %v390_v57 = vpop.permute.xlu1 %389  ;;  %v575_v43 = vsel %vm574_vm9, %v561_v63, %v312_v55  ;;  %v535_v22 = vsel %vm532_vm1, %v6006_v8, %v158_v42  ;;  %v315_v55 = vsel %vm311_vm5, %v6262_v47, %v6264_v48  ;;  %v366_v40 = vsel %vm363_vm8, %v6248_v44, %v6282_v54 }
  0xc1   :  { %v416_v1 = vsel %vm415_vm11, %v390_v57, %v392_v50  ;;  %v159_v50 = vsel %vm155_vm3, %v6184_v27, %v6190_v29  ;;  %v589_v57 = vsel %vm588_vm10, %v575_v43, %v364_v0 }
  0xc2   :  { %255 = vrot.lane.b32.xlu0 %v6256_v45, %s5918_s15  ;;  %257 = vrot.lane.b32.xlu1 %v6260_v46, %s5918_s15  ;;  %v603_v6 = vsel %vm602_vm13, %v589_v57, %v416_v1 }
  0xc4   :  { %v444_v61 = vpop.permute.xlu0 %443  ;;  %v6306_v62 = vpop.permute.xlu1 %445 }
  0xc5   :  { %v469_v58 = vsel %vm467_vm12, %v444_v61, %v6306_v62 }
  0xc6   :  { %407 = vrot.lane.b32.xlu0 %v6224_v37, %s5921_s18  ;;  %409 = vrot.lane.b32.xlu1 %v6228_v38, %s5921_s18  ;;  %v618_v49 = vsel %vm616_vm14, %v604_v36, %v469_v58 }
  0xc8   :  { %v494_v59 = vpop.permute.xlu0 %493  ;;  %v396_v60 = vpop.permute.xlu1 %395 }
  0xc9   :  { %v520_v7 = vsel %vm519_vm0, %v494_v59, %v496_v52  ;;  %v210_v52 = vsel %vm207_vm2, %v6182_v26, %v6206_v33  ;;  %v6379_v26 = vld [vmem:[%s9610_s1] sm:$0xff]  ;;  %v536_v33 = vsel %vm532_vm1, %v6017_v10, %v159_v50  ;;  %v367_v59 = vsel %vm363_vm8, %v6282_v54, %v6291_v56 }
  0xca   :  { %511 = vrot.lane.b32.xlu0 %v6224_v37, %s5922_s19  ;;  %513 = vrot.lane.b32.xlu1 %v6228_v38, %s5922_s19  ;;  %v550_v8 = vsel %vm546_vm6, %v536_v33, %v211_v19  ;;  %v418_v44 = vsel %vm415_vm11, %v6274_v51, %v396_v60 }
  0xcb   :  { %5298 = vmatpush1.msk.msra.mxu0 %vm532_vm1, %v520_v7  ;;  %v564_v35 = vsel %vm560_vm7, %v550_v8, %v263_v23 }
  0xcc   :  { %705 = vmatprep.subr.mxu0 %v618_v49  ;;  %v6366_v5 = vpop.permute.xlu0 %397  ;;  %v442_v24 = vpop.permute.xlu1 %441  ;;  %v578_v0 = vsel %vm574_vm9, %v564_v35, %v315_v55 }
  0xcd   :  { %v468_v27 = vsel %vm467_vm12, %v442_v24, %v444_v61  ;;  %v549_v61 = vsel %vm546_vm6, %v535_v22, %v210_v52  ;;  %v419_v54 = vsel %vm415_vm11, %v396_v60, %v6366_v5  ;;  %v592_v63 = vsel %vm588_vm10, %v578_v0, %v367_v59 }
  0xce   :  { %307 = vrot.lane.b32.xlu0 %v6256_v45, %s5919_s16  ;;  %309 = vrot.lane.b32.xlu1 %v6260_v46, %s5919_s16  ;;  %v617_v32 = vsel %vm616_vm14, %v603_v6, %v468_v27  ;;  %v563_v25 = vsel %vm560_vm7, %v549_v61, %v262_v28  ;;  %v606_v42 = vsel %vm602_vm13, %v592_v63, %v419_v54  ;;  %v44_v27 = vld [vmem:[%s9616_s7] sm:$0xff]  ;;  %v45_v6 = vld [vmem:[%s9616_s7 + $0x8] sm:$0xff] }
  0xcf   :  { %706 = vmatpush1.msra.mxu0 %v617_v32 }
  0xd0   :  { %v500_v10 = vpop.permute.xlu0 %499  ;;  %5299 = vmatmul.mubr.msk.f32.vlgmr.msra.gmra.mxu0 %vm642_vm15, %v6379_v26  ;;  %v6404_v58 = vpop.permute.xlu1 %501 }
  0xd1   :  { %v523_v39 = vsel %vm519_vm0, %v500_v10, %v6404_v58  ;;  %v522_v47 = vsel %vm519_vm0, %v6280_v53, %v500_v10  ;;  %745 = vmatprep.mubr.f32.mxu0 %v9618_v13  ;;  %v577_v53 = vsel %vm574_vm9, %v563_v25, %v314_v30 }
  0xd2   :  { %459 = vrot.lane.b32.xlu0 %v6224_v37, %s5924_s20  ;;  %461 = vrot.lane.b32.xlu1 %v6228_v38, %s5924_s20  ;;  %v591_v7 = vsel %vm588_vm10, %v577_v53, %v366_v40 }
  0xd3   :  { %5301 = vmatprep.subr.msk.mxu1 %vm532_vm1, %v523_v39  ;;  %v605_v43 = vsel %vm602_vm13, %v591_v7, %v418_v44 }
  0xd4   :  { %5302 = vmatpush1.msk.msra.mxu1 %vm532_vm1, %v522_v47  ;;  %v448_v51 = vpop.permute.xlu0 %447  ;;  %v6437_v60 = vpop.permute.xlu1 %449  ;;  %5300 = vmatmul.mubr.msk.f32.gmra.mxu0 %vm642_vm15, %v6420_v31 }
  0xd5   :  { %v470_v1 = vsel %vm467_vm12, %v6306_v62, %v448_v51  ;;  %v471_v36 = vsel %vm467_vm12, %v448_v51, %v6437_v60  ;;  %893 = vmatprep.mubr.f32.mxu0 %v9618_v13 }
  0xd6   :  { %359 = vrot.lane.b32.xlu0 %v6256_v45, %s5920_s17  ;;  %361 = vrot.lane.b32.xlu1 %v6260_v46, %s5920_s17  ;;  %v620_v49 = vsel %vm616_vm14, %v606_v42, %v471_v36  ;;  %v619_v50 = vsel %vm616_vm14, %v605_v43, %v470_v1 }
  0xd7   :  { %782 = vmatprep.subr.mxu1 %v620_v49 }
  0xd8   :  { %v140_v62 = vpop.permute.xlu0 %139  ;;  %783 = vmatpush1.msra.mxu1 %v619_v50  ;;  %v6454_v52 = vpop.permute.xlu1 %141 }
  0xd9   :  { %5303 = vmatmul.mubr.msk.f32.vlgmr.msra.gmra.mxu1 %vm642_vm15, %v6379_v26  ;;  %v161_v55 = vsel %vm155_vm3, %v140_v62, %v6454_v52 }
  0xda   :  { %411 = vrot.lane.b32.xlu0 %v6256_v45, %s5921_s18  ;;  %413 = vrot.lane.b32.xlu1 %v6260_v46, %s5921_s18  ;;  %v538_v59 = vsel %vm532_vm1, %v6108_v16, %v161_v55  ;;  %v160_v16 = vsel %vm155_vm3, %v6190_v29, %v140_v62 }
  0xdb   :  { %822 = vmatprep.mubr.f32.mxu1 %v9618_v13  ;;  %v537_v29 = vsel %vm532_vm1, %v6028_v12, %v160_v16 }
  0xdc   :  { %v192_v57 = vpop.permute.xlu0 %191  ;;  %v6463_v24 = vpop.permute.xlu1 %193 }
  0xdd   :  { %5304 = vmatmul.mubr.msk.f32.gmra.mxu1 %vm642_vm15, %v6420_v31  ;;  %v213_v39 = vsel %vm207_vm2, %v192_v57, %v6463_v24  ;;  %v212_v36 = vsel %vm207_vm2, %v6208_v34, %v192_v57 }
  0xde   :  { %515 = vrot.lane.b32.xlu0 %v6256_v45, %s5922_s19  ;;  %517 = vrot.lane.b32.xlu1 %v6260_v46, %s5922_s19  ;;  %v552_v44 = vsel %vm546_vm6, %v538_v59, %v213_v39  ;;  %v551_v62 = vsel %vm546_vm6, %v537_v29, %v212_v36 }
  0xdf   :  { %970 = vmatprep.mubr.f32.mxu1 %v9618_v13 }
  0xe0   :  { %v244_v19 = vpop.permute.xlu0 %243  ;;  %v6472_v28 = vpop.permute.xlu1 %245 }
  0xe1   :  { %v265_v54 = vsel %vm259_vm4, %v244_v19, %v6472_v28  ;;  %v264_v42 = vsel %vm259_vm4, %v6238_v41, %v244_v19 }
  0xe2   :  { %463 = vrot.lane.b32.xlu0 %v6256_v45, %s5924_s20  ;;  %465 = vrot.lane.b32.xlu1 %v6260_v46, %s5924_s20  ;;  %v566_v53 = vsel %vm560_vm7, %v552_v44, %v265_v54  ;;  %v565_v57 = vsel %vm560_vm7, %v551_v62, %v264_v42 }
  0xe4   :  { %v144_v22 = vpop.permute.xlu0 %143  ;;  %v6484_v32 = vpop.permute.xlu1 %145 }
  0xe6   :  { %634 = vperm.xlu1 %5792, %v44_v27   ;;  %639 = vperm.xlu0 %5791, %v45_v6  }
  0xe8   :  { %v296_v33 = vpop.permute.xlu0 %295  ;;  %v6486_v61 = vpop.permute.xlu1 %297 }
  0xe9   :  { %v317_v0 = vsel %vm311_vm5, %v296_v33, %v6486_v61 }
  0xea   :  { %v580_v43 = vsel %vm574_vm9, %v566_v53, %v317_v0  ;;  %v162_v0 = vsel %vm155_vm3, %v6454_v52, %v144_v22 }
  0xec   :  { %v196_v23 = vpop.permute.xlu0 %195  ;;  %v6488_v8 = vpop.permute.xlu1 %197 }
  0xed   :  { %v215_v44 = vsel %vm207_vm2, %v196_v23, %v6488_v8 }
  0xf0   :  { %v348_v25 = vpop.permute.xlu0 %347  ;;  %v6490_v30 = vpop.permute.xlu1 %349 }
  0xf1   :  { %v369_v49 = vsel %vm363_vm8, %v348_v25, %v6490_v30  ;;  %v368_v41 = vsel %vm363_vm8, %v6291_v56, %v348_v25 }
  0xf2   :  { %v594_v19 = vsel %vm588_vm10, %v580_v43, %v369_v49 }
  0xf4   :  { %v248_v10 = vpop.permute.xlu0 %247  ;;  %v6494_v40 = vpop.permute.xlu1 %249 }
  0xf5   :  { %v266_v49 = vsel %vm259_vm4, %v6472_v28, %v248_v10 }
  0xf8   :  { %v400_v47 = vpop.permute.xlu0 %399  ;;  %v6500_v35 = vpop.permute.xlu1 %401 }
  0xf9   :  { %v420_v27 = vsel %vm415_vm11, %v6366_v5, %v400_v47  ;;  %v421_v12 = vsel %vm415_vm11, %v400_v47, %v6500_v35 }
  0xfa   :  { %v608_v39 = vsel %vm602_vm13, %v594_v19, %v421_v12 }
  0xfc   :  { %v504_v7 = vpop.permute.xlu0 %503  ;;  %v506_v63 = vpop.permute.xlu1 %505 }
  0xfd   :  { %v524_v51 = vsel %vm519_vm0, %v6404_v58, %v504_v7  ;;  %v525_v1 = vsel %vm519_vm0, %v504_v7, %v506_v63  ;;  %v316_v58 = vsel %vm311_vm5, %v6264_v48, %v296_v33  ;;  %v163_v48 = vsel %vm155_vm3, %v144_v22, %v6484_v32 }
  0xfe   :  { %5305 = vmatprep.subr.msk.mxu0 %vm532_vm1, %v525_v1  ;;  %v579_v6 = vsel %vm574_vm9, %v565_v57, %v316_v58  ;;  %v540_v47 = vsel %vm532_vm1, %v6136_v20, %v163_v48  ;;  %v267_v20 = vsel %vm259_vm4, %v248_v10, %v6494_v40  ;;  %v214_v1 = vsel %vm207_vm2, %v6463_v24, %v196_v23 }
  0xff   :  { %5306 = vmatpush1.msk.msra.mxu0 %vm532_vm1, %v524_v51  ;;  %v593_v33 = vsel %vm588_vm10, %v579_v6, %v368_v41  ;;  %v554_v16 = vsel %vm546_vm6, %v540_v47, %v215_v44  ;;  %v539_v51 = vsel %vm532_vm1, %v6112_v17, %v162_v0 }
 0x100   :  { %v300_v50 = vpop.permute.xlu0 %299  ;;  %v6526_v34 = vpop.permute.xlu1 %301  ;;  %v607_v5 = vsel %vm602_vm13, %v593_v33, %v420_v27  ;;  %v568_v52 = vsel %vm560_vm7, %v554_v16, %v267_v20  ;;  %v553_v43 = vsel %vm546_vm6, %v539_v51, %v214_v1 }
 0x101   :  { %v319_v22 = vsel %vm311_vm5, %v300_v50, %v6526_v34  ;;  %v567_v23 = vsel %vm560_vm7, %v553_v43, %v266_v49  ;;  %v318_v29 = vsel %vm311_vm5, %v6486_v61, %v300_v50 }
 0x102   :  { %v582_v17 = vsel %vm574_vm9, %v568_v52, %v319_v22  ;;  %v581_v61 = vsel %vm574_vm9, %v567_v23, %v318_v29 }
 0x104   :  { %v452_v55 = vpop.permute.xlu0 %451  ;;  %v454_v59 = vpop.permute.xlu1 %453 }
 0x105   :  { %v472_v56 = vsel %vm467_vm12, %v6437_v60, %v452_v55  ;;  %v473_v25 = vsel %vm467_vm12, %v452_v55, %v454_v59 }
 0x106   :  { %v622_v54 = vsel %vm616_vm14, %v608_v39, %v473_v25  ;;  %v621_v53 = vsel %vm616_vm14, %v607_v5, %v472_v56 }
 0x107   :  { %859 = vmatprep.subr.mxu0 %v622_v54 }
 0x108   :  { %v352_v60 = vpop.permute.xlu0 %351  ;;  %860 = vmatpush1.msra.mxu0 %v621_v53  ;;  %v6554_v7 = vpop.permute.xlu1 %353 }
 0x109   :  { %5307 = vmatmul.mubr.msk.f32.vlgmr.msra.gmra.mxu0 %vm642_vm15, %v6379_v26  ;;  %v371_v24 = vsel %vm363_vm8, %v352_v60, %v6554_v7  ;;  %v370_v28 = vsel %vm363_vm8, %v6490_v30, %v352_v60 }
 0x10a   :  { %899 = vmatprep.mubr.f32.mxu0 %v9618_v13  ;;  %v596_v57 = vsel %vm588_vm10, %v582_v17, %v371_v24  ;;  %v595_v30 = vsel %vm588_vm10, %v581_v61, %v370_v28 }
 0x10c   :  { %v404_v36 = vpop.permute.xlu0 %403  ;;  %v6569_v42 = vpop.permute.xlu1 %405 }
 0x10d   :  { %5308 = vmatmul.mubr.msk.f32.gmra.mxu0 %vm642_vm15, %v6420_v31  ;;  %v422_v19 = vsel %vm415_vm11, %v6500_v35, %v404_v36  ;;  %v423_v27 = vsel %vm415_vm11, %v404_v36, %v6569_v42 }
 0x10e   :  { %1047 = vmatprep.mubr.f32.mxu0 %v9618_v13  ;;  %v610_v35 = vsel %vm602_vm13, %v596_v57, %v423_v27  ;;  %v609_v6 = vsel %vm602_vm13, %v595_v30, %v422_v19 }
 0x110   :  { %v508_v58 = vpop.permute.xlu0 %507  ;;  %v510_v62 = vpop.permute.xlu1 %509 }
 0x111   :  { %v526_v10 = vsel %vm519_vm0, %v506_v63, %v508_v58  ;;  %v527_v41 = vsel %vm519_vm0, %v508_v58, %v510_v62 }
 0x112   :  { %5309 = vmatprep.subr.msk.mxu1 %vm532_vm1, %v527_v41 }
 0x113   :  { %5310 = vmatpush1.msk.msra.mxu1 %vm532_vm1, %v526_v10 }
 0x114   :  { %v456_v50 = vpop.permute.xlu0 %455  ;;  %v6596_v63 = vpop.permute.xlu1 %457 }
 0x115   :  { %v474_v12 = vsel %vm467_vm12, %v454_v59, %v456_v50  ;;  %v475_v48 = vsel %vm467_vm12, %v456_v50, %v6596_v63 }
 0x116   :  { %v624_v33 = vsel %vm616_vm14, %v610_v35, %v475_v48  ;;  %v623_v55 = vsel %vm616_vm14, %v609_v6, %v474_v12 }
 0x117   :  { %936 = vmatprep.subr.mxu1 %v624_v33 }
 0x118   :  { %v148_v56 = vpop.permute.xlu0 %147  ;;  %937 = vmatpush1.msra.mxu1 %v623_v55  ;;  %v150_v25 = vpop.permute.xlu1 %149 }
 0x119   :  { %5311 = vmatmul.mubr.msk.f32.vlgmr.msra.gmra.mxu1 %vm642_vm15, %v6379_v26  ;;  %v165_v1 = vsel %vm155_vm3, %v148_v56, %v150_v25  ;;  %v164_v28 = vsel %vm155_vm3, %v6484_v32, %v148_v56 }
 0x11a   :  { %976 = vmatprep.mubr.f32.mxu1 %v9618_v13  ;;  %v542_v52 = vsel %vm532_vm1, %v6224_v37, %v165_v1  ;;  %v541_v32 = vsel %vm532_vm1, %v6140_v21, %v164_v28 }
 0x11c   :  { %v200_v59 = vpop.permute.xlu0 %199  ;;  %v202_v39 = vpop.permute.xlu1 %201 }
 0x11d   :  { %5312 = vmatmul.mubr.msk.f32.gmra.mxu1 %vm642_vm15, %v6420_v31  ;;  %v217_v22 = vsel %vm207_vm2, %v200_v59, %v202_v39  ;;  %v216_v61 = vsel %vm207_vm2, %v6488_v8, %v200_v59 }
 0x11e   :  { %1124 = vmatprep.mubr.f32.mxu1 %v9618_v13  ;;  %v556_v49 = vsel %vm546_vm6, %v542_v52, %v217_v22  ;;  %v555_v6 = vsel %vm546_vm6, %v541_v32, %v216_v61 }
 0x120   :  { %v252_v5 = vpop.permute.xlu0 %251  ;;  %v254_v47 = vpop.permute.xlu1 %253 }
 0x121   :  { %v269_v17 = vsel %vm259_vm4, %v252_v5, %v254_v47  ;;  %v268_v30 = vsel %vm259_vm4, %v6494_v40, %v252_v5 }
 0x122   :  { %v570_v29 = vsel %vm560_vm7, %v556_v49, %v269_v17  ;;  %v569_v33 = vsel %vm560_vm7, %v555_v6, %v268_v30 }
 0x124   :  { %v152_v44 = vpop.permute.xlu0 %151  ;;  %v154_v54 = vpop.permute.xlu1 %153 }
 0x125   :  { %v166_v50 = vsel %vm155_vm3, %v150_v25, %v152_v44  ;;  %v167_v21 = vsel %vm155_vm3, %v152_v44, %v154_v54  ;;  %v545_v56 = vsel %vm532_vm1, %v6260_v46, %v154_v54 }
 0x126   :  { %v544_v5 = vsel %vm532_vm1, %v6256_v45, %v167_v21 }
 0x128   :  { %v304_v53 = vpop.permute.xlu0 %303  ;;  %v6611_v0 = vpop.permute.xlu1 %305 }
 0x129   :  { %v321_v58 = vsel %vm311_vm5, %v304_v53, %v6611_v0 }
 0x12a   :  { %v584_v41 = vsel %vm574_vm9, %v570_v29, %v321_v58 }
 0x12c   :  { %v204_v60 = vpop.permute.xlu0 %203  ;;  %v206_v16 = vpop.permute.xlu1 %205 }
 0x12d   :  { %v219_v44 = vsel %vm207_vm2, %v204_v60, %v206_v16  ;;  %v559_v1 = vsel %vm546_vm6, %v545_v56, %v206_v16 }
 0x130   :  { %v356_v20 = vpop.permute.xlu0 %355  ;;  %v6613_v51 = vpop.permute.xlu1 %357 }
 0x131   :  { %v373_v57 = vsel %vm363_vm8, %v356_v20, %v6613_v51  ;;  %v372_v40 = vsel %vm363_vm8, %v6554_v7, %v356_v20  ;;  %v218_v7 = vsel %vm207_vm2, %v202_v39, %v204_v60  ;;  %v558_v60 = vsel %vm546_vm6, %v544_v5, %v219_v44 }
 0x132   :  { %v598_v12 = vsel %vm588_vm10, %v584_v41, %v373_v57 }
 0x134   :  { %v256_v36 = vpop.permute.xlu0 %255  ;;  %v258_v43 = vpop.permute.xlu1 %257 }
 0x135   :  { %v270_v22 = vsel %vm259_vm4, %v254_v47, %v256_v36  ;;  %v271_v49 = vsel %vm259_vm4, %v256_v36, %v258_v43 }
 0x136   :  { %v572_v29 = vsel %vm560_vm7, %v558_v60, %v271_v49 }
 0x138   :  { %v408_v24 = vpop.permute.xlu0 %407  ;;  %v6621_v23 = vpop.permute.xlu1 %409 }
 0x139   :  { %v425_v8 = vsel %vm415_vm11, %v408_v24, %v6621_v23  ;;  %v424_v55 = vsel %vm415_vm11, %v6569_v42, %v408_v24  ;;  %v573_v24 = vsel %vm560_vm7, %v559_v1, %v258_v43 }
 0x13a   :  { %v612_v59 = vsel %vm602_vm13, %v598_v12, %v425_v8 }
 0x13c   :  { %v512_v37 = vpop.permute.xlu0 %511  ;;  %v6628_v10 = vpop.permute.xlu1 %513 }
 0x13d   :  { %v528_v19 = vsel %vm519_vm0, %v510_v62, %v512_v37  ;;  %v529_v27 = vsel %vm519_vm0, %v512_v37, %v6628_v10  ;;  %v320_v62 = vsel %vm311_vm5, %v6526_v34, %v304_v53  ;;  %v543_v34 = vsel %vm532_vm1, %v6228_v38, %v166_v50 }
 0x13e   :  { %5313 = vmatprep.subr.msk.mxu0 %vm532_vm1, %v529_v27  ;;  %v583_v25 = vsel %vm574_vm9, %v569_v33, %v320_v62  ;;  %v557_v39 = vsel %vm546_vm6, %v543_v34, %v218_v7  ;;  %vm1238_vm6 = vcmask 261120  }
 0x13f   :  { %5314 = vmatpush1.msk.msra.mxu0 %vm532_vm1, %v528_v19  ;;  %v597_v53 = vsel %vm588_vm10, %v583_v25, %v372_v40  ;;  %v571_v16 = vsel %vm560_vm7, %v557_v39, %v270_v22 }
 0x140   :  { %v308_v48 = vpop.permute.xlu0 %307  ;;  %v310_v35 = vpop.permute.xlu1 %309  ;;  %v611_v54 = vsel %vm602_vm13, %v597_v53, %v424_v55 }
 0x141   :  { %v322_v58 = vsel %vm311_vm5, %v6611_v0, %v308_v48  ;;  %v323_v47 = vsel %vm311_vm5, %v308_v48, %v310_v35  ;;  %v587_v36 = vsel %vm574_vm9, %v573_v24, %v310_v35 }
 0x142   :  { %v585_v43 = vsel %vm574_vm9, %v571_v16, %v322_v58  ;;  %v586_v41 = vsel %vm574_vm9, %v572_v29, %v323_v47 }
 0x144   :  { %v460_v42 = vpop.permute.xlu0 %459  ;;  %v462_v20 = vpop.permute.xlu1 %461 }
 0x145   :  { %v476_v38 = vsel %vm467_vm12, %v6596_v63, %v460_v42  ;;  %v477_v46 = vsel %vm467_vm12, %v460_v42, %v462_v20 }
 0x146   :  { %v626_v52 = vsel %vm616_vm14, %v612_v59, %v477_v46  ;;  %v625_v45 = vsel %vm616_vm14, %v611_v54, %v476_v38 }
 0x147   :  { %1013 = vmatprep.subr.mxu0 %v626_v52 }
 0x148   :  { %v360_v63 = vpop.permute.xlu0 %359  ;;  %1014 = vmatpush1.msra.mxu0 %v625_v45  ;;  %v362_v17 = vpop.permute.xlu1 %361 }
 0x149   :  { %5315 = vmatmul.mubr.msk.f32.vlgmr.msra.gmra.mxu0 %vm642_vm15, %v6379_v26  ;;  %v374_v57 = vsel %vm363_vm8, %v6613_v51, %v360_v63  ;;  %v375_v19 = vsel %vm363_vm8, %v360_v63, %v362_v17  ;;  %v601_v0 = vsel %vm588_vm10, %v587_v36, %v362_v17 }
 0x14a   :  { %1053 = vmatprep.mubr.f32.mxu0 %v9618_v13  ;;  %v599_v27 = vsel %vm588_vm10, %v585_v43, %v374_v57  ;;  %v600_v61 = vsel %vm588_vm10, %v586_v41, %v375_v19 }
 0x14c   :  { %v412_v28 = vpop.permute.xlu0 %411  ;;  %v414_v37 = vpop.permute.xlu1 %413 }
 0x14d   :  { %5316 = vmatmul.mubr.msk.f32.gmra.mxu0 %vm642_vm15, %v6420_v31  ;;  %v426_v32 = vsel %vm415_vm11, %v6621_v23, %v412_v28  ;;  %v427_v30 = vsel %vm415_vm11, %v412_v28, %v414_v37  ;;  %v615_v8 = vsel %vm602_vm13, %v601_v0, %v414_v37 }
 0x14e   :  { %5742 = vmatprep.mubr.msk.f32.mxu0 %vm642_vm15, %v6379_v26  ;;  %v614_v23 = vsel %vm602_vm13, %v600_v61, %v427_v30  ;;  %v613_v48 = vsel %vm602_vm13, %v599_v27, %v426_v32 }
 0x150   :  { %v516_v51 = vpop.permute.xlu0 %515  ;;  %v518_v50 = vpop.permute.xlu1 %517 }
 0x151   :  { %v530_v62 = vsel %vm519_vm0, %v6628_v10, %v516_v51  ;;  %5738 = vmatprep.subr.msk.mxu0 %vm532_vm1, %v518_v50  ;;  %v531_v12 = vsel %vm519_vm0, %v516_v51, %v518_v50 }
 0x152   :  { %5317 = vmatprep.subr.msk.mxu1 %vm532_vm1, %v531_v12  ;;  %5739 = vmatpush3.msk.msra.mxu0 %vm532_vm1, %v518_v50 }
 0x153   :  { %5318 = vmatpush1.msk.msra.mxu1 %vm532_vm1, %v530_v62  ;;  %vm2091_vm1 = vcmask 130048  }
 0x154   :  { %v464_v35 = vpop.permute.xlu0 %463  ;;  %v466_v6 = vpop.permute.xlu1 %465 }
 0x155   :  { %v478_v10 = vsel %vm467_vm12, %v462_v20, %v464_v35  ;;  %v479_v21 = vsel %vm467_vm12, %v464_v35, %v466_v6  ;;  %v629_v40 = vsel %vm616_vm14, %v615_v8, %v466_v6  ;;  %v6902_v8 = vld [vmem:[%s9611_s2 + $0x8] sm:$0xff] }
 0x156   :  { %5740 = vmatprep.subr.mxu0 %v629_v40  ;;  %v628_v33 = vsel %vm616_vm14, %v614_v23, %v479_v21  ;;  %v627_v55 = vsel %vm616_vm14, %v613_v48, %v478_v10 }
 0x157   :  { %1090 = vmatprep.subr.mxu1 %v628_v33  ;;  %5741 = vmatpush3.msra.mxu0 %v629_v40 }
 0x158   :  { %1091 = vmatpush1.msra.mxu1 %v627_v55  ;;  %5743 = vmatmul.mubr.msk.f32.vlgmr.msra.gmra.mxu0 %vm642_vm15, %v6420_v31 }
 0x159   :  { %5319 = vmatmul.mubr.msk.f32.vlgmr.msra.gmra.mxu1 %vm642_vm15, %v6379_v26  ;;  %5328 = vmatprep.mubr.msk.f32.mxu0 %vm2091_vm1, %v6902_v8 }
 0x15a   :  { %1130 = vmatprep.mubr.f32.mxu1 %v9618_v13 }
 0x15d   :  { %5320 = vmatmul.mubr.msk.f32.gmra.mxu1 %vm642_vm15, %v6420_v31 }
 0x15e   :  { %5324 = vmatprep.mubr.msk.f32.mxu1 %vm2091_vm1, %v6902_v8 }
 0x161   :  { %v6726_v34 = vpop.permute.xlu1 %634  ;;  %v6774_v38 = vpop.permute.xlu0 %639 }
 0x190   :  { %v741_v56 = vpop.f32.mrf.mxu0 }
 0x191   :  { %v742_v25 = vadd.f32 %v741_v56, %v6726_v34 }
 0x192   :  { %v743_v31 = vpop.f32.mrf.mxu0 }
 0x193   :  { %v6729_v59 = vmax.f32 %v742_v25, 0.0  ;;  %v744_v44 = vadd.f32 %v743_v31, %v6726_v34 }
 0x194   :  { %v747_v54 = vpop.f32.mrf.mxu0 }
 0x195   :  { %1879 = vrot.lane.b32.xlu0 %v6729_v59, %s5924_s20  ;;  %v6763_v53 = vmax.f32 %v744_v44, 0.0  ;;  %v748_v1 = vadd.f32 %v747_v54, %v6774_v38 }
 0x196   :  { %v749_v22 = vpop.f32.mrf.mxu0 }
 0x197   :  { %v6787_v52 = vmax.f32 %v748_v1, 0.0  ;;  %v750_v49 = vadd.f32 %v749_v22, %v6774_v38 }
 0x199   :  { %v818_v5 = vpop.f32.mrf.mxu1  ;;  %1777 = vrot.lane.b32.xlu0 %v6729_v59, %s5921_s18  ;;  %v6825_v63 = vmax.f32 %v750_v49, 0.0 }
 0x19a   :  { %v819_v26 = vadd.f32 %v818_v5, %v6726_v34 }
 0x19b   :  { %v820_v42 = vpop.f32.mrf.mxu1 }
 0x19c   :  { %v6736_v7 = vmax.f32 %v819_v26, 0.0  ;;  %v821_v20 = vadd.f32 %v820_v42, %v6726_v34 }
 0x19d   :  { %1675 = vrot.lane.b32.xlu0 %v6729_v59, %s5920_s17  ;;  %v824_v45 = vpop.f32.mrf.mxu1 }
 0x19e   :  { %1883 = vrot.lane.b32.xlu1 %v6736_v7, %s5924_s20  ;;  %v6776_v46 = vmax.f32 %v821_v20, 0.0  ;;  %v825_v39 = vadd.f32 %v824_v45, %v6774_v38 }
 0x19f   :  { %v826_v17 = vpop.f32.mrf.mxu1 }
 0x1a0   :  { %v6810_v60 = vmax.f32 %v825_v39, 0.0  ;;  %v827_v19 = vadd.f32 %v826_v17, %v6774_v38 }
 0x1a1   :  { %1573 = vrot.lane.b32.xlu0 %v6729_v59, %s5919_s16 }
 0x1a2   :  { %1781 = vrot.lane.b32.xlu1 %v6736_v7, %s5921_s18  ;;  %v6872_v61 = vmax.f32 %v827_v19, 0.0 }
 0x1a5   :  { %1471 = vrot.lane.b32.xlu0 %v6729_v59, %s5918_s15 }
 0x1a6   :  { %1679 = vrot.lane.b32.xlu1 %v6736_v7, %s5920_s17 }
 0x1a9   :  { %1369 = vrot.lane.b32.xlu0 %v6729_v59, %s5917_s14 }
 0x1aa   :  { %1577 = vrot.lane.b32.xlu1 %v6736_v7, %s5919_s16 }
 0x1ad   :  { %1267 = vrot.lane.b32.xlu0 %v6729_v59, %s5916_s3 }
 0x1ae   :  { %1475 = vrot.lane.b32.xlu1 %v6736_v7, %s5918_s15 }
 0x1b1   :  { %1981 = vrot.lane.b32.xlu0 %v6729_v59, %s5922_s19 }
 0x1b2   :  { %1373 = vrot.lane.b32.xlu1 %v6736_v7, %s5917_s14 }
 0x1b5   :  { %1881 = vrot.lane.b32.xlu0 %v6763_v53, %s5924_s20 }
 0x1b6   :  { %1271 = vrot.lane.b32.xlu1 %v6736_v7, %s5916_s3 }
 0x1b9   :  { %1779 = vrot.lane.b32.xlu0 %v6763_v53, %s5921_s18 }
 0x1ba   :  { %1985 = vrot.lane.b32.xlu1 %v6736_v7, %s5922_s19 }
 0x1bd   :  { %1677 = vrot.lane.b32.xlu0 %v6763_v53, %s5920_s17 }
 0x1be   :  { %1783 = vrot.lane.b32.xlu1 %v6776_v46, %s5921_s18 }
 0x1c1   :  { %1575 = vrot.lane.b32.xlu0 %v6763_v53, %s5919_s16 }
 0x1c2   :  { %1681 = vrot.lane.b32.xlu1 %v6776_v46, %s5920_s17 }
 0x1c5   :  { %1473 = vrot.lane.b32.xlu0 %v6763_v53, %s5918_s15 }
 0x1c6   :  { %1905 = vrot.lane.b32.xlu1 %v6787_v52, %s5924_s20 }
 0x1c9   :  { %1371 = vrot.lane.b32.xlu0 %v6763_v53, %s5917_s14  ;;  %v895_v29 = vpop.f32.mrf.mxu0 }
 0x1ca   :  { %1803 = vrot.lane.b32.xlu1 %v6787_v52, %s5921_s18  ;;  %v896_v58 = vadd.f32 %v895_v29, %v6726_v34 }
 0x1cb   :  { %v897_v36 = vpop.f32.mrf.mxu0 }
 0x1cc   :  { %v6855_v28 = vmax.f32 %v896_v58, 0.0  ;;  %v898_v62 = vadd.f32 %v897_v36, %v6726_v34 }
 0x1cd   :  { %1269 = vrot.lane.b32.xlu0 %v6763_v53, %s5916_s3  ;;  %v901_v37 = vpop.f32.mrf.mxu0 }
 0x1ce   :  { %1701 = vrot.lane.b32.xlu1 %v6787_v52, %s5920_s17  ;;  %v902_v41 = vadd.f32 %v901_v37, %v6774_v38  ;;  %v6912_v48 = vmax.f32 %v898_v62, 0.0 }
 0x1cf   :  { %v903_v6 = vpop.f32.mrf.mxu0 }
 0x1d0   :  { %v6869_v0 = vmax.f32 %v902_v41, 0.0  ;;  %v904_v21 = vadd.f32 %v903_v6, %v6774_v38 }
 0x1d1   :  { %1983 = vrot.lane.b32.xlu0 %v6763_v53, %s5922_s19 }
 0x1d2   :  { %1599 = vrot.lane.b32.xlu1 %v6787_v52, %s5919_s16  ;;  %v6931_v55 = vmax.f32 %v904_v21, 0.0 }
 0x1d5   :  { %1885 = vrot.lane.b32.xlu0 %v6776_v46, %s5924_s20 }
 0x1d6   :  { %1497 = vrot.lane.b32.xlu1 %v6787_v52, %s5918_s15 }
 0x1d9   :  { %1909 = vrot.lane.b32.xlu0 %v6810_v60, %s5924_s20  ;;  %v972_v24 = vpop.f32.mrf.mxu1 }
 0x1da   :  { %1395 = vrot.lane.b32.xlu1 %v6787_v52, %s5917_s14  ;;  %v973_v16 = vadd.f32 %v972_v24, %v6726_v34 }
 0x1db   :  { %v6857_v43 = vpop.f32.mrf.mxu1 }
 0x1dc   :  { %v6849_v47 = vmax.f32 %v973_v16, 0.0 }
 0x1dd   :  { %1807 = vrot.lane.b32.xlu0 %v6810_v60, %s5921_s18  ;;  %v978_v57 = vpop.f32.mrf.mxu1 }
 0x1de   :  { %1293 = vrot.lane.b32.xlu1 %v6787_v52, %s5916_s3  ;;  %v979_v27 = vadd.f32 %v978_v57, %v6774_v38 }
 0x1e0   :  { %v6878_v32 = vmax.f32 %v979_v27, 0.0 }
 0x1e1   :  { %1705 = vrot.lane.b32.xlu0 %v6810_v60, %s5920_s17 }
 0x1e2   :  { %2007 = vrot.lane.b32.xlu1 %v6787_v52, %s5922_s19 }
 0x1e5   :  { %1603 = vrot.lane.b32.xlu0 %v6810_v60, %s5919_s16 }
 0x1e6   :  { %1907 = vrot.lane.b32.xlu1 %v6825_v63, %s5924_s20 }
 0x1e9   :  { %1501 = vrot.lane.b32.xlu0 %v6810_v60, %s5918_s15 }
 0x1ea   :  { %1805 = vrot.lane.b32.xlu1 %v6825_v63, %s5921_s18 }
 0x1ed   :  { %1399 = vrot.lane.b32.xlu0 %v6810_v60, %s5917_s14 }
 0x1ee   :  { %1703 = vrot.lane.b32.xlu1 %v6825_v63, %s5920_s17 }
 0x1f1   :  { %1297 = vrot.lane.b32.xlu0 %v6810_v60, %s5916_s3 }
 0x1f2   :  { %1601 = vrot.lane.b32.xlu1 %v6825_v63, %s5919_s16 }
 0x1f5   :  { %2011 = vrot.lane.b32.xlu0 %v6810_v60, %s5922_s19 }
 0x1f6   :  { %1499 = vrot.lane.b32.xlu1 %v6825_v63, %s5918_s15 }
 0x1f9   :  { %1891 = vrot.lane.b32.xlu0 %v6849_v47, %s5924_s20 }
 0x1fa   :  { %1397 = vrot.lane.b32.xlu1 %v6825_v63, %s5917_s14 }
 0x1fd   :  { %1785 = vrot.lane.b32.xlu0 %v6855_v28, %s5921_s18 }
 0x1fe   :  { %1295 = vrot.lane.b32.xlu1 %v6825_v63, %s5916_s3 }
 0x201   :  { %1789 = vrot.lane.b32.xlu0 %v6849_v47, %s5921_s18 }
 0x202   :  { %2009 = vrot.lane.b32.xlu1 %v6825_v63, %s5922_s19 }
 0x205   :  { %1913 = vrot.lane.b32.xlu0 %v6869_v0, %s5924_s20 }
 0x206   :  { %1911 = vrot.lane.b32.xlu1 %v6872_v61, %s5924_s20 }
 0x207   :  { %v6880_v30 = vpop.permute.xlu0 %1879 }
 0x209   :  { %1917 = vrot.lane.b32.xlu0 %v6878_v32, %s5924_s20 }
 0x20a   :  { %1809 = vrot.lane.b32.xlu1 %v6872_v61, %s5921_s18 }
 0x20b   :  { %v6886_v51 = vpop.permute.xlu0 %1777 }
 0x20d   :  { %1811 = vrot.lane.b32.xlu0 %v6869_v0, %s5921_s18 }
 0x20e   :  { %1707 = vrot.lane.b32.xlu1 %v6872_v61, %s5920_s17 }
 0x20f   :  { %v6892_v50 = vpop.permute.xlu0 %1675 }
 0x210   :  { %v6895_v12 = vpop.permute.xlu1 %1883 }
 0x211   :  { %1815 = vrot.lane.b32.xlu0 %v6878_v32, %s5921_s18 }
 0x212   :  { %1887 = vrot.lane.b32.xlu1 %v6855_v28, %s5924_s20 }
 0x213   :  { %v6908_v23 = vpop.permute.xlu0 %1573 }
 0x214   :  { %v6914_v35 = vpop.permute.xlu1 %1781 }
 0x215   :  { %1709 = vrot.lane.b32.xlu0 %v6869_v0, %s5920_s17 }
 0x216   :  { %1889 = vrot.lane.b32.xlu1 %v6912_v48, %s5924_s20 }
 0x217   :  { %v6920_v10 = vpop.permute.xlu0 %1471 }
 0x218   :  { %v6923_v40 = vpop.permute.xlu1 %1679 }
 0x219   :  { %1683 = vrot.lane.b32.xlu0 %v6855_v28, %s5920_s17 }
 0x21a   :  { %1787 = vrot.lane.b32.xlu1 %v6912_v48, %s5921_s18 }
 0x21b   :  { %v6929_v33 = vpop.permute.xlu0 %1369 }
 0x21c   :  { %v6933_v56 = vpop.permute.xlu1 %1577 }
 0x21d   :  { %1713 = vrot.lane.b32.xlu0 %v6878_v32, %s5920_s17 }
 0x21e   :  { %1915 = vrot.lane.b32.xlu1 %v6931_v55, %s5924_s20 }
 0x21f   :  { %v6939_v25 = vpop.permute.xlu0 %1267 }
 0x220   :  { %v6941_v5 = vpop.permute.xlu1 %1475 }
 0x221   :  { %1607 = vrot.lane.b32.xlu0 %v6869_v0, %s5919_s16 }
 0x222   :  { %1813 = vrot.lane.b32.xlu1 %v6931_v55, %s5921_s18 }
 0x223   :  { %v6947_v26 = vpop.permute.xlu0 %1981 }
 0x224   :  { %v6949_v31 = vpop.permute.xlu1 %1373 }
 0x225   :  { %1687 = vrot.lane.b32.xlu0 %v6849_v47, %s5920_s17 }
 0x226   :  { %1711 = vrot.lane.b32.xlu1 %v6931_v55, %s5920_s17 }
 0x227   :  { %v1882_v44 = vpop.permute.xlu0 %1881 }
 0x228   :  { %v6955_v42 = vpop.permute.xlu1 %1271  ;;  %v1932_v4 = vsel %vm467_vm12, %v1882_v44, %v6895_v12  ;;  %v1931_v3 = vsel %vm467_vm12, %v6880_v30, %v1882_v44  ;;  %v7068_v30 = vpop.f32.mrf.mxu0 }
 0x229   :  { %1581 = vrot.lane.b32.xlu0 %v6855_v28, %s5919_s16 }
 0x22a   :  { %1605 = vrot.lane.b32.xlu1 %v6872_v61, %s5919_s16 }
 0x22b   :  { %v6961_v20 = vpop.permute.xlu0 %1779 }
 0x22c   :  { %v6963_v54 = vpop.permute.xlu1 %1985 }
 0x22d   :  { %1611 = vrot.lane.b32.xlu0 %v6878_v32, %s5919_s16 }
 0x22e   :  { %1685 = vrot.lane.b32.xlu1 %v6912_v48, %s5920_s17 }
 0x22f   :  { %v6969_v1 = vpop.permute.xlu0 %1677 }
 0x230   :  { %v6971_v45 = vpop.permute.xlu1 %1783 }
 0x231   :  { %1505 = vrot.lane.b32.xlu0 %v6869_v0, %s5918_s15 }
 0x232   :  { %1579 = vrot.lane.b32.xlu1 %v6776_v46, %s5919_s16 }
 0x233   :  { %v6977_v39 = vpop.permute.xlu0 %1575 }
 0x234   :  { %v6979_v22 = vpop.permute.xlu1 %1681 }
 0x235   :  { %1585 = vrot.lane.b32.xlu0 %v6849_v47, %s5919_s16 }
 0x236   :  { %1609 = vrot.lane.b32.xlu1 %v6931_v55, %s5919_s16 }
 0x237   :  { %v6985_v49 = vpop.permute.xlu0 %1473 }
 0x238   :  { %v1906_v17 = vpop.permute.xlu1 %1905 }
 0x239   :  { %1479 = vrot.lane.b32.xlu0 %v6855_v28, %s5918_s15 }
 0x23a   :  { %1503 = vrot.lane.b32.xlu1 %v6872_v61, %s5918_s15 }
 0x23b   :  { %v6991_v24 = vpop.permute.xlu0 %1371 }
 0x23c   :  { %v1804_v16 = vpop.permute.xlu1 %1803 }
 0x23d   :  { %1509 = vrot.lane.b32.xlu0 %v6878_v32, %s5918_s15 }
 0x23e   :  { %1583 = vrot.lane.b32.xlu1 %v6912_v48, %s5919_s16 }
 0x23f   :  { %v6997_v29 = vpop.permute.xlu0 %1269 }
 0x240   :  { %v1702_v58 = vpop.permute.xlu1 %1701 }
 0x241   :  { %1403 = vrot.lane.b32.xlu0 %v6869_v0, %s5917_s14 }
 0x242   :  { %1477 = vrot.lane.b32.xlu1 %v6776_v46, %s5918_s15 }
 0x243   :  { %v7003_v36 = vpop.permute.xlu0 %1983 }
 0x244   :  { %v1600_v37 = vpop.permute.xlu1 %1599 }
 0x245   :  { %1483 = vrot.lane.b32.xlu0 %v6849_v47, %s5918_s15 }
 0x246   :  { %1507 = vrot.lane.b32.xlu1 %v6931_v55, %s5918_s15 }
 0x247   :  { %v7009_v41 = vpop.permute.xlu0 %1885 }
 0x248   :  { %v7011_v57 = vpop.permute.xlu1 %1497 }
 0x249   :  { %1377 = vrot.lane.b32.xlu0 %v6855_v28, %s5917_s14 }
 0x24a   :  { %1401 = vrot.lane.b32.xlu1 %v6872_v61, %s5917_s14 }
 0x24b   :  { %v7017_v19 = vpop.permute.xlu0 %1909 }
 0x24c   :  { %v7019_v27 = vpop.permute.xlu1 %1395 }
 0x24d   :  { %1407 = vrot.lane.b32.xlu0 %v6878_v32, %s5917_s14 }
 0x24e   :  { %1481 = vrot.lane.b32.xlu1 %v6912_v48, %s5918_s15 }
 0x24f   :  { %v7025_v62 = vpop.permute.xlu0 %1807 }
 0x250   :  { %v7027_v6 = vpop.permute.xlu1 %1293 }
 0x251   :  { %1301 = vrot.lane.b32.xlu0 %v6869_v0, %s5916_s3 }
 0x252   :  { %1375 = vrot.lane.b32.xlu1 %v6776_v46, %s5917_s14 }
 0x253   :  { %v7033_v21 = vpop.permute.xlu0 %1705 }
 0x254   :  { %v7035_v13 = vpop.permute.xlu1 %2007 }
 0x255   :  { %1381 = vrot.lane.b32.xlu0 %v6849_v47, %s5917_s14 }
 0x256   :  { %1405 = vrot.lane.b32.xlu1 %v6931_v55, %s5917_s14 }
 0x257   :  { %v7041_v18 = vpop.permute.xlu0 %1603 }
 0x258   :  { %v1908_v15 = vpop.permute.xlu1 %1907 }
 0x259   :  { %1275 = vrot.lane.b32.xlu0 %v6855_v28, %s5916_s3  ;;  %v1944_v14 = vsel %vm467_vm12, %v1908_v15, %v7017_v19  ;;  %v1943_v11 = vsel %vm467_vm12, %v1906_v17, %v1908_v15 }
 0x25a   :  { %1299 = vrot.lane.b32.xlu1 %v6872_v61, %s5916_s3  ;;  %2104 = vmatprep.subr.mxu1 %v1944_v14 }
 0x25b   :  { %2105 = vmatpush1.msra.mxu1 %v1943_v11  ;;  %v7050_v9 = vpop.permute.xlu0 %1501 }
 0x25c   :  { %v1806_v2 = vpop.permute.xlu1 %1805  ;;  %2106 = vmatprep.subr.mxu1 %v1932_v4  ;;  %v1830_v4 = vsel %vm415_vm11, %v6961_v20, %v6914_v35 }
 0x25d   :  { %1305 = vrot.lane.b32.xlu0 %v6878_v32, %s5916_s3  ;;  %2107 = vmatpush1.msra.mxu1 %v1931_v3  ;;  %v1842_v15 = vsel %vm415_vm11, %v1806_v2, %v7025_v62  ;;  %v1841_v14 = vsel %vm415_vm11, %v1804_v16, %v1806_v2  ;;  %v1829_v3 = vsel %vm415_vm11, %v6886_v51, %v6961_v20  ;;  %v7085_v20 = vpop.f32.mrf.mxu0 }
 0x25e   :  { %1379 = vrot.lane.b32.xlu1 %v6912_v48, %s5917_s14  ;;  %2108 = vmatprep.subr.mxu1 %v1842_v15  ;;  %v1728_v51 = vsel %vm363_vm8, %v6969_v1, %v6923_v40 }
 0x25f   :  { %2109 = vmatpush1.msra.mxu1 %v1841_v14  ;;  %v7063_v11 = vpop.permute.xlu0 %1399  ;;  %v1727_v14 = vsel %vm363_vm8, %v6892_v50, %v6969_v1  ;;  %v1626_v50 = vsel %vm311_vm5, %v6977_v39, %v6933_v56  ;;  %v1055_v1 = vpop.f32.mrf.mxu0 }
 0x260   :  { %v1704_v44 = vpop.permute.xlu1 %1703  ;;  %2110 = vmatprep.subr.mxu1 %v1830_v4 }
 0x261   :  { %1279 = vrot.lane.b32.xlu0 %v6849_v47, %s5916_s3  ;;  %2111 = vmatpush1.msra.mxu1 %v1829_v3  ;;  %v1740_v2 = vsel %vm363_vm8, %v1704_v44, %v7033_v21  ;;  %v1739_v17 = vsel %vm363_vm8, %v1702_v58, %v1704_v44 }
 0x262   :  { %1273 = vrot.lane.b32.xlu1 %v6776_v46, %s5916_s3  ;;  %2112 = vmatprep.subr.mxu1 %v1740_v2  ;;  %v1625_v2 = vsel %vm311_vm5, %v6908_v23, %v6977_v39  ;;  %v1524_v23 = vsel %vm259_vm4, %v6985_v49, %v6941_v5 }
 0x263   :  { %2113 = vmatpush1.msra.mxu1 %v1739_v17  ;;  %v7080_v16 = vpop.permute.xlu0 %1297 }
 0x264   :  { %v1602_v15 = vpop.permute.xlu1 %1601  ;;  %2114 = vmatprep.subr.mxu1 %v1728_v51  ;;  %v980_v51 = vpop.f32.mrf.mxu1 }
 0x265   :  { %2015 = vrot.lane.b32.xlu0 %v6869_v0, %s5922_s19  ;;  %2115 = vmatpush1.msra.mxu1 %v1727_v14  ;;  %v1638_v58 = vsel %vm311_vm5, %v1602_v15, %v7041_v18  ;;  %v1637_v4 = vsel %vm311_vm5, %v1600_v37, %v1602_v15  ;;  %v1056_v15 = vadd.f32 %v1055_v1, %v6774_v38 }
 0x266   :  { %1303 = vrot.lane.b32.xlu1 %v6931_v55, %s5916_s3  ;;  %2116 = vmatprep.subr.mxu1 %v1638_v58  ;;  %v7119_v39 = vpop.f32.mrf.mxu1 }
 0x267   :  { %2117 = vmatpush1.msra.mxu1 %v1637_v4  ;;  %v7097_v44 = vpop.permute.xlu0 %2011  ;;  %v7132_v1 = vmax.f32 %v1056_v15, 0.0  ;;  %v1050_v15 = vadd.f32 %v7068_v30, %v6726_v34 }
 0x268   :  { %v1500_v3 = vpop.permute.xlu1 %1499  ;;  %2118 = vmatprep.subr.mxu1 %v1626_v50 }
 0x269   :  { %1989 = vrot.lane.b32.xlu0 %v6855_v28, %s5922_s19  ;;  %2119 = vmatpush1.msra.mxu1 %v1625_v2  ;;  %v1536_v37 = vsel %vm259_vm4, %v1500_v3, %v7050_v9  ;;  %v1535_v17 = vsel %vm259_vm4, %v7011_v57, %v1500_v3  ;;  %v1523_v57 = vsel %vm259_vm4, %v6920_v10, %v6985_v49  ;;  %v7139_v49 = vpop.f32.mrf.mxu1  ;;  %v7168_v30 = vmax.f32 %v1050_v15, 0.0  ;;  %v1057_v15 = vpop.f32.mrf.mxu0 }
 0x26a   :  { %1277 = vrot.lane.b32.xlu1 %v6912_v48, %s5916_s3  ;;  %2120 = vmatprep.subr.mxu1 %v1536_v37  ;;  %v1422_v10 = vsel %vm207_vm2, %v6991_v24, %v6949_v31 }
 0x26b   :  { %2121 = vmatpush1.msra.mxu1 %v1535_v17  ;;  %v7114_v14 = vpop.permute.xlu0 %1891 }
 0x26c   :  { %v1398_v58 = vpop.permute.xlu1 %1397  ;;  %2122 = vmatprep.subr.mxu1 %v1524_v23 }
 0x26d   :  { %2019 = vrot.lane.b32.xlu0 %v6878_v32, %s5922_s19  ;;  %2123 = vmatpush1.msra.mxu1 %v1523_v57  ;;  %v1434_v4 = vsel %vm207_vm2, %v1398_v58, %v7063_v11  ;;  %v1433_v50 = vsel %vm207_vm2, %v7019_v27, %v1398_v58  ;;  %v1421_v27 = vsel %vm207_vm2, %v6929_v33, %v6991_v24  ;;  %v1132_v58 = vpop.f32.mrf.mxu1 }
 0x26e   :  { %2013 = vrot.lane.b32.xlu1 %v6872_v61, %s5922_s19  ;;  %2124 = vmatprep.subr.mxu1 %v1434_v4  ;;  %v1320_v33 = vsel %vm155_vm3, %v6997_v29, %v6955_v42  ;;  %v981_v24 = vadd.f32 %v980_v51, %v6774_v38  ;;  %v1133_v51 = vadd.f32 %v1132_v58, %v6774_v38 }
 0x26f   :  { %2125 = vmatpush1.msra.mxu1 %v1433_v50  ;;  %v7134_v3 = vpop.permute.xlu0 %1785 }
 0x270   :  { %v1296_v2 = vpop.permute.xlu1 %1295  ;;  %2126 = vmatprep.subr.mxu1 %v1422_v10  ;;  %v7174_v50 = vmax.f32 %v981_v24, 0.0  ;;  %v7190_v10 = vmax.f32 %v1133_v51, 0.0  ;;  %v1058_v24 = vadd.f32 %v1057_v15, %v6774_v38 }
 0x271   :  { %1921 = vrot.lane.b32.xlu0 %v7132_v1, %s5924_s20  ;;  %2127 = vmatpush1.msra.mxu1 %v1421_v27  ;;  %v1332_v37 = vsel %vm155_vm3, %v1296_v2, %v7080_v16  ;;  %v1331_v17 = vsel %vm155_vm3, %v7027_v6, %v1296_v2  ;;  %v1319_v6 = vsel %vm155_vm3, %v6939_v25, %v6997_v29 }
 0x272   :  { %1987 = vrot.lane.b32.xlu1 %v6776_v46, %s5922_s19  ;;  %2128 = vmatprep.subr.mxu1 %v1332_v37  ;;  %v2034_v2 = vsel %vm519_vm0, %v7003_v36, %v6963_v54  ;;  %v975_v27 = vadd.f32 %v6857_v43, %v6726_v34  ;;  %v2033_v37 = vsel %vm519_vm0, %v6947_v26, %v7003_v36  ;;  %v7226_v26 = vld [vmem:[%s9611_s2 + $0x10] sm:$0xff]  ;;  %v7247_v51 = vmax.f32 %v1058_v24, 0.0 }
 0x273   :  { %2129 = vmatpush1.msra.mxu1 %v1331_v17  ;;  %v7154_v23 = vpop.permute.xlu0 %1789  ;;  %v7210_v17 = vld [vmem:[%s9611_s2 + $0x18] sm:$0xff]  ;;  %v1127_v43 = vadd.f32 %v7119_v39, %v6726_v34 }
 0x274   :  { %v2010_v57 = vpop.permute.xlu1 %2009  ;;  %2130 = vmatprep.subr.mxu1 %v1320_v33  ;;  %v7228_v36 = vmax.f32 %v975_v27, 0.0 }
 0x275   :  { %1993 = vrot.lane.b32.xlu0 %v6849_v47, %s5922_s19  ;;  %2131 = vmatpush1.msra.mxu1 %v1319_v6  ;;  %v7241_v39 = vmax.f32 %v1127_v43, 0.0 }
 0x276   :  { %2017 = vrot.lane.b32.xlu1 %v6931_v55, %s5922_s19  ;;  %2132 = vmatprep.subr.mxu1 %v6825_v63  ;;  %v2046_v63 = vsel %vm519_vm0, %v2010_v57, %v7097_v44 }
 0x277   :  { %2133 = vmatpush1.msra.mxu1 %v6787_v52  ;;  %v7172_v4 = vpop.permute.xlu0 %1913 }
 0x278   :  { %v1912_v25 = vpop.permute.xlu1 %1911  ;;  %2134 = vmatprep.subr.mxu1 %v6763_v53  ;;  %v2045_v53 = vsel %vm519_vm0, %v7035_v13, %v2010_v57  ;;  %v7234_v57 = vld [vmem:[%s9611_s2 + $0x28] sm:$0xff] }
 0x279   :  { %1895 = vrot.lane.b32.xlu0 %v7168_v30, %s5924_s20  ;;  %2135 = vmatpush1.msra.mxu1 %v6729_v59  ;;  %v1946_v29 = vsel %vm467_vm12, %v1912_v25, %v7172_v4  ;;  %v1945_v52 = vsel %vm467_vm12, %v7017_v19, %v1912_v25  ;;  %v7200_v19 = vld [vmem:[%s9611_s2] sm:$0xff] }
 0x27a   :  { %1919 = vrot.lane.b32.xlu1 %v7174_v50, %s5924_s20  ;;  %2164 = vmatprep.subr.mxu1 %v2046_v63  ;;  %v7252_v63 = vld [vmem:[%s9611_s2 + $0x20] sm:$0xff] }
 0x27b   :  { %2193 = vmatprep.subr.mxu0 %v1946_v29  ;;  %2165 = vmatpush2.msra.mxu1 %v2045_v53  ;;  %v7192_v59 = vpop.permute.xlu0 %1917  ;;  %v1933_v53 = vsel %vm467_vm12, %v6895_v12, %v7009_v41  ;;  %v7280_v12 = vld [vmem:[%s9611_s2 + $0x30] sm:$0xff] }
 0x27c   :  { %2194 = vmatpush1.msra.mxu0 %v1945_v52  ;;  %v1810_v13 = vpop.permute.xlu1 %1809  ;;  %2166 = vmatprep.subr.mxu1 %v2034_v2  ;;  %v7261_v52 = vld [vmem:[%s9611_s2 + $0x38] sm:$0xff] }
 0x27d   :  { %1925 = vrot.lane.b32.xlu0 %v7190_v10, %s5924_s20  ;;  %2167 = vmatpush2.msra.mxu1 %v2033_v37  ;;  %v1052_v37 = vadd.f32 %v7085_v20, %v6726_v34  ;;  %v1843_v43 = vsel %vm415_vm11, %v7025_v62, %v1810_v13  ;;  %v1831_v62 = vsel %vm415_vm11, %v6914_v35, %v6971_v45 }
 0x27e   :  { %1991 = vrot.lane.b32.xlu1 %v6912_v48, %s5922_s19  ;;  %2169 = vmatmul.mubr.f32.vlgmr.msra.gmra.mxu1 %v7200_v19  ;;  %v1729_v35 = vsel %vm363_vm8, %v6923_v40, %v6979_v22 }
 0x27f   :  { %v7219_v33 = vpop.permute.xlu0 %1811  ;;  %5325 = vmatprep.mubr.msk.f32.mxu1 %vm2091_vm1, %v7210_v17  ;;  %v7294_v24 = vmax.f32 %v1052_v37, 0.0 }
 0x280   :  { %v1708_v58 = vpop.permute.xlu1 %1707  ;;  %v1844_v27 = vsel %vm415_vm11, %v1810_v13, %v7219_v33 }
 0x281   :  { %1819 = vrot.lane.b32.xlu0 %v7132_v1, %s5921_s18 }
 0x282   :  { %1893 = vrot.lane.b32.xlu1 %v7228_v36, %s5924_s20  ;;  %2175 = vmatmul.mubr.f32.gmra.mxu1 %v7226_v26 }
 0x283   :  { %v7243_v6 = vpop.permute.xlu0 %1815  ;;  %5326 = vmatprep.mubr.msk.f32.mxu1 %vm2091_vm1, %v7234_v57 }
 0x284   :  { %v1888_v25 = vpop.permute.xlu1 %1887 }
 0x285   :  { %1899 = vrot.lane.b32.xlu0 %v7241_v39, %s5924_s20  ;;  %v1934_v29 = vsel %vm467_vm12, %v7009_v41, %v1888_v25  ;;  %v1832_v41 = vsel %vm415_vm11, %v6971_v45, %v7134_v3 }
 0x286   :  { %1923 = vrot.lane.b32.xlu1 %v7247_v51, %s5924_s20  ;;  %2195 = vmatprep.subr.mxu0 %v1934_v29 }
 0x287   :  { %2196 = vmatpush1.msra.mxu0 %v1933_v53  ;;  %v1710_v2 = vpop.permute.xlu0 %1709  ;;  %2181 = vmatmul.mubr.f32.gmra.mxu1 %v7252_v63  ;;  %v1741_v53 = vsel %vm363_vm8, %v7033_v21, %v1708_v58 }
 0x288   :  { %v1890_v15 = vpop.permute.xlu1 %1889  ;;  %2197 = vmatprep.subr.mxu0 %v1844_v27  ;;  %5327 = vmatprep.mubr.msk.f32.mxu1 %vm2091_vm1, %v7261_v52  ;;  %v1742_v13 = vsel %vm363_vm8, %v1708_v58, %v1710_v2 }
 0x289   :  { %1793 = vrot.lane.b32.xlu0 %v7168_v30, %s5921_s18  ;;  %2198 = vmatpush1.msra.mxu0 %v1843_v43  ;;  %v1936_v40 = vsel %vm467_vm12, %v1890_v15, %v7114_v14 }
 0x28a   :  { %1817 = vrot.lane.b32.xlu1 %v7174_v50, %s5921_s18  ;;  %2199 = vmatprep.subr.mxu0 %v1832_v41  ;;  %v1935_v41 = vsel %vm467_vm12, %v1888_v25, %v1890_v15 }
 0x28b   :  { %2200 = vmatpush1.msra.mxu0 %v1831_v62  ;;  %v1684_v20 = vpop.permute.xlu0 %1683  ;;  %2187 = vmatmul.mubr.f32.gmra.mxu1 %v7280_v12 }
 0x28c   :  { %v1788_v29 = vpop.permute.xlu1 %1787  ;;  %2201 = vmatprep.subr.mxu0 %v1742_v13  ;;  %v1730_v27 = vsel %vm363_vm8, %v6979_v22, %v1684_v20  ;;  %5332 = vmatprep.mubr.msk.f32.mxu1 %vm2091_vm1, %v6902_v8 }
 0x28d   :  { %1823 = vrot.lane.b32.xlu0 %v7190_v10, %s5921_s18  ;;  %2202 = vmatpush1.msra.mxu0 %v1741_v53  ;;  %v1834_v25 = vsel %vm415_vm11, %v1788_v29, %v7154_v23  ;;  %v1833_v53 = vsel %vm415_vm11, %v7134_v3, %v1788_v29 }
 0x28e   :  { %1897 = vrot.lane.b32.xlu1 %v7294_v24, %s5924_s20  ;;  %2203 = vmatprep.subr.mxu0 %v1730_v27 }
 0x28f   :  { %2204 = vmatpush1.msra.mxu0 %v1729_v35  ;;  %v7309_v45 = vpop.permute.xlu0 %1713 }
 0x290   :  { %v1916_v21 = vpop.permute.xlu1 %1915 }
 0x291   :  { %1717 = vrot.lane.b32.xlu0 %v7132_v1, %s5920_s17  ;;  %v1948_v58 = vsel %vm467_vm12, %v1916_v21, %v7192_v59  ;;  %v1947_v37 = vsel %vm467_vm12, %v7172_v4, %v1916_v21 }
 0x292   :  { %1791 = vrot.lane.b32.xlu1 %v7228_v36, %s5921_s18  ;;  %2282 = vmatprep.subr.mxu1 %v1948_v58 }
 0x293   :  { %2283 = vmatpush1.msra.mxu1 %v1947_v37  ;;  %v1608_v43 = vpop.permute.xlu0 %1607 }
 0x294   :  { %v1814_v22 = vpop.permute.xlu1 %1813  ;;  %2284 = vmatprep.subr.mxu1 %v1936_v40 }
 0x295   :  { %1797 = vrot.lane.b32.xlu0 %v7241_v39, %s5921_s18  ;;  %2285 = vmatpush1.msra.mxu1 %v1935_v41  ;;  %v1846_v4 = vsel %vm415_vm11, %v1814_v22, %v7243_v6  ;;  %v1845_v62 = vsel %vm415_vm11, %v7219_v33, %v1814_v22 }
 0x296   :  { %1821 = vrot.lane.b32.xlu1 %v7247_v51, %s5921_s18  ;;  %2286 = vmatprep.subr.mxu1 %v1846_v4 }
 0x297   :  { %2287 = vmatpush1.msra.mxu1 %v1845_v62  ;;  %v7330_v13 = vpop.permute.xlu0 %1687 }
 0x298   :  { %v1712_v15 = vpop.permute.xlu1 %1711  ;;  %2288 = vmatprep.subr.mxu1 %v1834_v25 }
 0x299   :  { %1691 = vrot.lane.b32.xlu0 %v7168_v30, %s5920_s17  ;;  %2289 = vmatpush1.msra.mxu1 %v1833_v53  ;;  %v1744_v33 = vsel %vm363_vm8, %v1712_v15, %v7309_v45  ;;  %v1743_v27 = vsel %vm363_vm8, %v1710_v2, %v1712_v15 }
 0x29a   :  { %1715 = vrot.lane.b32.xlu1 %v7174_v50, %s5920_s17  ;;  %2290 = vmatprep.subr.mxu1 %v1744_v33 }
 0x29b   :  { %2291 = vmatpush1.msra.mxu1 %v1743_v27  ;;  %v1582_v35 = vpop.permute.xlu0 %1581 }
 0x29c   :  { %v1606_v21 = vpop.permute.xlu1 %1605 }
 0x29d   :  { %1721 = vrot.lane.b32.xlu0 %v7190_v10, %s5920_s17  ;;  %v1640_v3 = vsel %vm311_vm5, %v1606_v21, %v1608_v43  ;;  %v1639_v29 = vsel %vm311_vm5, %v7041_v18, %v1606_v21 }
 0x29e   :  { %1795 = vrot.lane.b32.xlu1 %v7294_v24, %s5921_s18  ;;  %2205 = vmatprep.subr.mxu0 %v1640_v3 }
 0x29f   :  { %2206 = vmatpush1.msra.mxu0 %v1639_v29  ;;  %v7350_v2 = vpop.permute.xlu0 %1611 }
 0x2a0   :  { %v1686_v58 = vpop.permute.xlu1 %1685 }
 0x2a1   :  { %1615 = vrot.lane.b32.xlu0 %v7132_v1, %s5919_s16  ;;  %v1732_v37 = vsel %vm363_vm8, %v1686_v58, %v7330_v13  ;;  %v1731_v40 = vsel %vm363_vm8, %v1684_v20, %v1686_v58 }
 0x2a2   :  { %1689 = vrot.lane.b32.xlu1 %v7228_v36, %s5920_s17  ;;  %2292 = vmatprep.subr.mxu1 %v1732_v37 }
 0x2a3   :  { %2293 = vmatpush1.msra.mxu1 %v1731_v40  ;;  %v1506_v18 = vpop.permute.xlu0 %1505 }
 0x2a4   :  { %v1580_v22 = vpop.permute.xlu1 %1579 }
 0x2a5   :  { %1695 = vrot.lane.b32.xlu0 %v7241_v39, %s5920_s17  ;;  %v1628_v41 = vsel %vm311_vm5, %v1580_v22, %v1582_v35  ;;  %v1627_v4 = vsel %vm311_vm5, %v6933_v56, %v1580_v22 }
 0x2a6   :  { %1719 = vrot.lane.b32.xlu1 %v7247_v51, %s5920_s17  ;;  %2207 = vmatprep.subr.mxu0 %v1628_v41 }
 0x2a7   :  { %2208 = vmatpush1.msra.mxu0 %v1627_v4  ;;  %v7366_v20 = vpop.permute.xlu0 %1585 }
 0x2a8   :  { %v1610_v62 = vpop.permute.xlu1 %1609 }
 0x2a9   :  { %1589 = vrot.lane.b32.xlu0 %v7168_v30, %s5919_s16  ;;  %v1642_v25 = vsel %vm311_vm5, %v1610_v62, %v7350_v2  ;;  %v1641_v15 = vsel %vm311_vm5, %v1608_v43, %v1610_v62 }
 0x2aa   :  { %1613 = vrot.lane.b32.xlu1 %v7174_v50, %s5919_s16  ;;  %2294 = vmatprep.subr.mxu1 %v1642_v25 }
 0x2ab   :  { %2295 = vmatpush1.msra.mxu1 %v1641_v15  ;;  %v1480_v56 = vpop.permute.xlu0 %1479 }
 0x2ac   :  { %v1504_v53 = vpop.permute.xlu1 %1503 }
 0x2ad   :  { %1619 = vrot.lane.b32.xlu0 %v7190_v10, %s5919_s16  ;;  %v1538_v33 = vsel %vm259_vm4, %v1504_v53, %v1506_v18  ;;  %v1537_v27 = vsel %vm259_vm4, %v7050_v9, %v1504_v53 }
 0x2ae   :  { %1693 = vrot.lane.b32.xlu1 %v7294_v24, %s5920_s17  ;;  %2209 = vmatprep.subr.mxu0 %v1538_v33 }
 0x2af   :  { %2210 = vmatpush1.msra.mxu0 %v1537_v27  ;;  %v7382_v43 = vpop.permute.xlu0 %1509 }
 0x2b0   :  { %v1584_v21 = vpop.permute.xlu1 %1583 }
 0x2b1   :  { %1513 = vrot.lane.b32.xlu0 %v7132_v1, %s5918_s15  ;;  %v1630_v3 = vsel %vm311_vm5, %v1584_v21, %v7366_v20  ;;  %v1629_v29 = vsel %vm311_vm5, %v1582_v35, %v1584_v21 }
 0x2b2   :  { %1587 = vrot.lane.b32.xlu1 %v7228_v36, %s5919_s16  ;;  %2296 = vmatprep.subr.mxu1 %v1630_v3 }
 0x2b3   :  { %2297 = vmatpush1.msra.mxu1 %v1629_v29  ;;  %v1404_v9 = vpop.permute.xlu0 %1403 }
 0x2b4   :  { %v1478_v58 = vpop.permute.xlu1 %1477 }
 0x2b5   :  { %1593 = vrot.lane.b32.xlu0 %v7241_v39, %s5919_s16  ;;  %v1526_v37 = vsel %vm259_vm4, %v1478_v58, %v1480_v56  ;;  %v1525_v40 = vsel %vm259_vm4, %v6941_v5, %v1478_v58 }
 0x2b6   :  { %1617 = vrot.lane.b32.xlu1 %v7247_v51, %s5919_s16  ;;  %2211 = vmatprep.subr.mxu0 %v1526_v37 }
 0x2b7   :  { %2212 = vmatpush1.msra.mxu0 %v1525_v40  ;;  %v7398_v35 = vpop.permute.xlu0 %1483 }
 0x2b8   :  { %v1508_v22 = vpop.permute.xlu1 %1507 }
 0x2b9   :  { %1487 = vrot.lane.b32.xlu0 %v7168_v30, %s5918_s15  ;;  %v1540_v41 = vsel %vm259_vm4, %v1508_v22, %v7382_v43  ;;  %v1539_v4 = vsel %vm259_vm4, %v1506_v18, %v1508_v22 }
 0x2ba   :  { %1511 = vrot.lane.b32.xlu1 %v7174_v50, %s5918_s15  ;;  %2298 = vmatprep.subr.mxu1 %v1540_v41 }
 0x2bb   :  { %2299 = vmatpush1.msra.mxu1 %v1539_v4  ;;  %v1378_v5 = vpop.permute.xlu0 %1377 }
 0x2bc   :  { %v1402_v62 = vpop.permute.xlu1 %1401 }
 0x2bd   :  { %1517 = vrot.lane.b32.xlu0 %v7190_v10, %s5918_s15  ;;  %v1436_v25 = vsel %vm207_vm2, %v1402_v62, %v1404_v9  ;;  %v1435_v15 = vsel %vm207_vm2, %v7063_v11, %v1402_v62 }
 0x2be   :  { %1591 = vrot.lane.b32.xlu1 %v7294_v24, %s5919_s16  ;;  %2213 = vmatprep.subr.mxu0 %v1436_v25 }
 0x2bf   :  { %2214 = vmatpush1.msra.mxu0 %v1435_v15  ;;  %v7414_v18 = vpop.permute.xlu0 %1407 }
 0x2c0   :  { %v1482_v53 = vpop.permute.xlu1 %1481 }
 0x2c1   :  { %1411 = vrot.lane.b32.xlu0 %v7132_v1, %s5917_s14  ;;  %v1528_v33 = vsel %vm259_vm4, %v1482_v53, %v7398_v35  ;;  %v1527_v27 = vsel %vm259_vm4, %v1480_v56, %v1482_v53 }
 0x2c2   :  { %1485 = vrot.lane.b32.xlu1 %v7228_v36, %s5918_s15  ;;  %2300 = vmatprep.subr.mxu1 %v1528_v33 }
 0x2c3   :  { %2301 = vmatpush1.msra.mxu1 %v1527_v27  ;;  %v1302_v11 = vpop.permute.xlu0 %1301 }
 0x2c4   :  { %v1376_v21 = vpop.permute.xlu1 %1375 }
 0x2c5   :  { %1491 = vrot.lane.b32.xlu0 %v7241_v39, %s5918_s15  ;;  %v1424_v3 = vsel %vm207_vm2, %v1376_v21, %v1378_v5  ;;  %v1423_v29 = vsel %vm207_vm2, %v6949_v31, %v1376_v21 }
 0x2c6   :  { %1515 = vrot.lane.b32.xlu1 %v7247_v51, %s5918_s15  ;;  %2215 = vmatprep.subr.mxu0 %v1424_v3 }
 0x2c7   :  { %2216 = vmatpush1.msra.mxu0 %v1423_v29  ;;  %v7430_v56 = vpop.permute.xlu0 %1381 }
 0x2c8   :  { %v1406_v58 = vpop.permute.xlu1 %1405 }
 0x2c9   :  { %1385 = vrot.lane.b32.xlu0 %v7168_v30, %s5917_s14  ;;  %v1438_v37 = vsel %vm207_vm2, %v1406_v58, %v7414_v18  ;;  %v1437_v40 = vsel %vm207_vm2, %v1404_v9, %v1406_v58 }
 0x2ca   :  { %1409 = vrot.lane.b32.xlu1 %v7174_v50, %s5917_s14  ;;  %2302 = vmatprep.subr.mxu1 %v1438_v37 }
 0x2cb   :  { %2303 = vmatpush1.msra.mxu1 %v1437_v40  ;;  %v1276_v31 = vpop.permute.xlu0 %1275 }
 0x2cc   :  { %v1300_v22 = vpop.permute.xlu1 %1299 }
 0x2cd   :  { %1415 = vrot.lane.b32.xlu0 %v7190_v10, %s5917_s14  ;;  %v1334_v41 = vsel %vm155_vm3, %v1300_v22, %v1302_v11  ;;  %v1333_v4 = vsel %vm155_vm3, %v7080_v16, %v1300_v22 }
 0x2ce   :  { %1489 = vrot.lane.b32.xlu1 %v7294_v24, %s5918_s15  ;;  %2217 = vmatprep.subr.mxu0 %v1334_v41 }
 0x2cf   :  { %2218 = vmatpush1.msra.mxu0 %v1333_v4  ;;  %v7446_v9 = vpop.permute.xlu0 %1305 }
 0x2d0   :  { %v1380_v62 = vpop.permute.xlu1 %1379 }
 0x2d1   :  { %1309 = vrot.lane.b32.xlu0 %v7132_v1, %s5916_s3  ;;  %v1426_v25 = vsel %vm207_vm2, %v1380_v62, %v7430_v56  ;;  %v1425_v15 = vsel %vm207_vm2, %v1378_v5, %v1380_v62 }
 0x2d2   :  { %1383 = vrot.lane.b32.xlu1 %v7228_v36, %s5917_s14  ;;  %2304 = vmatprep.subr.mxu1 %v1426_v25 }
 0x2d3   :  { %2305 = vmatpush1.msra.mxu1 %v1425_v15  ;;  %v7455_v16 = vpop.permute.xlu0 %1279 }
 0x2d4   :  { %v1274_v53 = vpop.permute.xlu1 %1273 }
 0x2d5   :  { %1389 = vrot.lane.b32.xlu0 %v7241_v39, %s5917_s14  ;;  %v1322_v33 = vsel %vm155_vm3, %v1274_v53, %v1276_v31  ;;  %v1321_v27 = vsel %vm155_vm3, %v6955_v42, %v1274_v53 }
 0x2d6   :  { %1413 = vrot.lane.b32.xlu1 %v7247_v51, %s5917_s14  ;;  %2219 = vmatprep.subr.mxu0 %v1322_v33 }
 0x2d7   :  { %2220 = vmatpush1.msra.mxu0 %v1321_v27  ;;  %v2016_v5 = vpop.permute.xlu0 %2015 }
 0x2d8   :  { %v1304_v21 = vpop.permute.xlu1 %1303  ;;  %2221 = vmatprep.subr.mxu0 %v6872_v61 }
 0x2d9   :  { %1283 = vrot.lane.b32.xlu0 %v7168_v30, %s5916_s3  ;;  %2222 = vmatpush1.msra.mxu0 %v6810_v60  ;;  %v1336_v3 = vsel %vm155_vm3, %v1304_v21, %v7446_v9  ;;  %v1335_v29 = vsel %vm155_vm3, %v1302_v11, %v1304_v21 }
 0x2da   :  { %1307 = vrot.lane.b32.xlu1 %v7174_v50, %s5916_s3  ;;  %2223 = vmatprep.subr.mxu0 %v6776_v46 }
 0x2db   :  { %2306 = vmatprep.subr.mxu1 %v1336_v3  ;;  %2224 = vmatpush1.msra.mxu0 %v6736_v7  ;;  %v7475_v42 = vpop.permute.xlu0 %1989 }
 0x2dc   :  { %2307 = vmatpush1.msra.mxu1 %v1335_v29  ;;  %v1278_v61 = vpop.permute.xlu1 %1277 }
 0x2dd   :  { %1313 = vrot.lane.b32.xlu0 %v7190_v10, %s5916_s3  ;;  %v1324_v60 = vsel %vm155_vm3, %v1278_v61, %v7455_v16  ;;  %v1323_v11 = vsel %vm155_vm3, %v1276_v31, %v1278_v61  ;;  %v5744_v31 = vpop.f32.mrf.mxu0 }
 0x2de   :  { %1387 = vrot.lane.b32.xlu1 %v7294_v24, %s5917_s14  ;;  %2308 = vmatprep.subr.mxu1 %v1324_v60 }
 0x2df   :  { %2309 = vmatpush1.msra.mxu1 %v1323_v11  ;;  %v7484_v46 = vpop.permute.xlu0 %2019  ;;  %v1203_v15 = vpop.f32.mrf.mxu0 }
 0x2e0   :  { %v2014_v7 = vpop.permute.xlu1 %2013  ;;  %2310 = vmatprep.subr.mxu1 %v6931_v55  ;;  %v7544_v21 = vadd.f32 %v1203_v15, %v6726_v34 }
 0x2e1   :  { %1287 = vrot.lane.b32.xlu0 %v7241_v39, %s5916_s3  ;;  %2311 = vmatpush1.msra.mxu1 %v6869_v0  ;;  %v2048_v58 = vsel %vm519_vm0, %v2014_v7, %v2016_v5  ;;  %v2047_v37 = vsel %vm519_vm0, %v7097_v44, %v2014_v7 }
 0x2e2   :  { %1281 = vrot.lane.b32.xlu1 %v7228_v36, %s5916_s3  ;;  %2253 = vmatprep.subr.mxu0 %v2048_v58  ;;  %v1224_v11 = vmax.f32 %v7544_v21, 0.0 }
 0x2e3   :  { %2312 = vmatprep.subr.mxu1 %v6912_v48  ;;  %2254 = vmatpush2.msra.mxu0 %v2047_v37  ;;  %v7496_v40 = vpop.permute.xlu0 %1921 }
 0x2e4   :  { %2313 = vmatpush1.msra.mxu1 %v6855_v28  ;;  %v1988_v55 = vpop.permute.xlu1 %1987  ;;  %v7510_v28 = vadd.f32 %v5744_v31, %v6774_v38 }
 0x2e5   :  { %2023 = vrot.lane.b32.xlu0 %v7132_v1, %s5922_s19  ;;  %v2036_v0 = vsel %vm519_vm0, %v1988_v55, %v7475_v42  ;;  %v2035_v44 = vsel %vm519_vm0, %v6963_v54, %v1988_v55 }
 0x2e6   :  { %1311 = vrot.lane.b32.xlu1 %v7247_v51, %s5916_s3  ;;  %2255 = vmatprep.subr.mxu0 %v2036_v0  ;;  %v1237_v62 = vmax.f32 %v7510_v28, 0.0 }
 0x2e7   :  { %2256 = vmatpush2.msra.mxu0 %v2035_v44  ;;  %v7507_v48 = vpop.permute.xlu0 %1993  ;;  %v7619_v44 = vld [vmem:[%s9611_s2 + $0x8] sm:$0xff] }
 0x2e8   :  { %v2018_v22 = vpop.permute.xlu1 %2017  ;;  %2258 = vmatmul.mubr.f32.vlgmr.msra.gmra.mxu0 %v7200_v19 }
 0x2e9   :  { %1997 = vrot.lane.b32.xlu0 %v7168_v30, %s5922_s19  ;;  %v2050_v41 = vsel %vm519_vm0, %v2018_v22, %v7484_v46  ;;  %v2049_v54 = vsel %vm519_vm0, %v2016_v5, %v2018_v22  ;;  %5329 = vmatprep.mubr.msk.f32.mxu0 %vm2091_vm1, %v7210_v17  ;;  %v7541_v5 = vsel %vm1238_vm6, %v1237_v62, 0.0 }
 0x2ea   :  { %1285 = vrot.lane.b32.xlu1 %v7294_v24, %s5916_s3  ;;  %2342 = vmatprep.subr.mxu1 %v2050_v41 }
 0x2eb   :  { %2343 = vmatpush2.msra.mxu1 %v2049_v54  ;;  %v7522_v4 = vpop.permute.xlu0 %1895 }
 0x2ec   :  { %v1920_v25 = vpop.permute.xlu1 %1919  ;;  %2264 = vmatmul.mubr.f32.gmra.mxu0 %v7226_v26 }
 0x2ed   :  { %2027 = vrot.lane.b32.xlu0 %v7190_v10, %s5922_s19  ;;  %v1950_v53 = vsel %vm467_vm12, %v1920_v25, %v7496_v40  ;;  %v1949_v33 = vsel %vm467_vm12, %v7192_v59, %v1920_v25  ;;  %5330 = vmatprep.mubr.msk.f32.mxu0 %vm2091_vm1, %v7234_v57  ;;  %v1134_v59 = vpop.f32.mrf.mxu1 }
 0x2ee   :  { %2021 = vrot.lane.b32.xlu1 %v7174_v50, %s5922_s19  ;;  %2371 = vmatprep.subr.mxu0 %v1950_v53  ;;  %v1135_v7 = vadd.f32 %v1134_v59, %v6774_v38 }
 0x2ef   :  { %2372 = vmatpush1.msra.mxu0 %v1949_v33  ;;  %v7536_v27 = vpop.permute.xlu0 %1925 }
 0x2f0   :  { %v1992_v3 = vpop.permute.xlu1 %1991  ;;  %2270 = vmatmul.mubr.f32.gmra.mxu0 %v7252_v63  ;;  %v7580_v55 = vmax.f32 %v1135_v7, 0.0 }
 0x2f1   :  { %1929 = vrot.lane.b32.xlu0 %v7541_v5, %s5924_s20  ;;  %v2038_v29 = vsel %vm519_vm0, %v1992_v3, %v7507_v48  ;;  %v2037_v61 = vsel %vm519_vm0, %v7475_v42, %v1992_v3  ;;  %5331 = vmatprep.mubr.msk.f32.mxu0 %vm2091_vm1, %v7261_v52 }
 0x2f2   :  { %1995 = vrot.lane.b32.xlu1 %v7228_v36, %s5922_s19  ;;  %2344 = vmatprep.subr.mxu1 %v2038_v29 }
 0x2f3   :  { %2345 = vmatpush2.msra.mxu1 %v2037_v61  ;;  %v1820_v60 = vpop.permute.xlu0 %1819 }
 0x2f4   :  { %v1894_v58 = vpop.permute.xlu1 %1893  ;;  %2347 = vmatmul.mubr.f32.vlgmr.msra.gmra.mxu1 %v7200_v19  ;;  %2276 = vmatmul.mubr.f32.gmra.mxu0 %v7280_v12  ;;  %v7578_v19 = vsel %vm1238_vm6, %v1224_v11, 0.0 }
 0x2f5   :  { %2001 = vrot.lane.b32.xlu0 %v7241_v39, %s5922_s19  ;;  %v1938_v42 = vsel %vm467_vm12, %v1894_v58, %v7522_v4  ;;  %v1937_v37 = vsel %vm467_vm12, %v7114_v14, %v1894_v58  ;;  %5333 = vmatprep.mubr.msk.f32.mxu1 %vm2091_vm1, %v7210_v17 }
 0x2f6   :  { %2025 = vrot.lane.b32.xlu1 %v7247_v51, %s5922_s19  ;;  %2373 = vmatprep.subr.mxu0 %v1938_v42 }
 0x2f7   :  { %2374 = vmatpush1.msra.mxu0 %v1937_v37  ;;  %v7571_v38 = vpop.permute.xlu0 %1899  ;;  %5336 = vmatprep.mubr.msk.f32.mxu0 %vm2091_vm1, %v6902_v8 }
 0x2f8   :  { %v1924_v14 = vpop.permute.xlu1 %1923  ;;  %2353 = vmatmul.mubr.f32.gmra.mxu1 %v7226_v26  ;;  %v1129_v26 = vadd.f32 %v7139_v49, %v6726_v34 }
 0x2f9   :  { %1903 = vrot.lane.b32.xlu0 %v7578_v19, %s5924_s20  ;;  %v1952_v17 = vsel %vm467_vm12, %v1924_v14, %v7536_v27  ;;  %v1951_v31 = vsel %vm467_vm12, %v7496_v40, %v1924_v14  ;;  %5334 = vmatprep.mubr.msk.f32.mxu1 %vm2091_vm1, %v7234_v57 }
 0x2fa   :  { %1927 = vrot.lane.b32.xlu1 %v7580_v55, %s5924_s20  ;;  %2460 = vmatprep.subr.mxu1 %v1952_v17  ;;  %v7607_v49 = vmax.f32 %v1129_v26, 0.0 }
 0x2fb   :  { %2461 = vmatpush1.msra.mxu1 %v1951_v31  ;;  %v1794_v8 = vpop.permute.xlu0 %1793 }
 0x2fc   :  { %v1818_v0 = vpop.permute.xlu1 %1817  ;;  %2359 = vmatmul.mubr.f32.gmra.mxu1 %v7252_v63 }
 0x2fd   :  { %1827 = vrot.lane.b32.xlu0 %v7541_v5, %s5921_s18  ;;  %v1848_v40 = vsel %vm415_vm11, %v1818_v0, %v1820_v60  ;;  %v1847_v57 = vsel %vm415_vm11, %v7243_v6, %v1818_v0  ;;  %5335 = vmatprep.mubr.msk.f32.mxu1 %vm2091_vm1, %v7261_v52 }
 0x2fe   :  { %1999 = vrot.lane.b32.xlu1 %v7294_v24, %s5922_s19  ;;  %2375 = vmatprep.subr.mxu0 %v1848_v40 }
 0x2ff   :  { %2376 = vmatpush1.msra.mxu0 %v1847_v57  ;;  %v7605_v34 = vpop.permute.xlu0 %1823 }
 0x300   :  { %v1898_v63 = vpop.permute.xlu1 %1897  ;;  %2365 = vmatmul.mubr.f32.gmra.mxu1 %v7280_v12 }
 0x301   :  { %1801 = vrot.lane.b32.xlu0 %v7578_v19, %s5921_s18  ;;  %v1940_v6 = vsel %vm467_vm12, %v1898_v63, %v7571_v38  ;;  %v1939_v52 = vsel %vm467_vm12, %v7522_v4, %v1898_v63  ;;  %5340 = vmatprep.mubr.msk.f32.mxu1 %vm2091_vm1, %v7619_v44 }
 0x302   :  { %1901 = vrot.lane.b32.xlu1 %v7607_v49, %s5924_s20  ;;  %2462 = vmatprep.subr.mxu1 %v1940_v6  ;;  %s5926_s20 = smov 112  }
 0x303   :  { %2463 = vmatpush1.msra.mxu1 %v1939_v52  ;;  %v1718_v22 = vpop.permute.xlu0 %1717 }
 0x304   :  { %v1792_v41 = vpop.permute.xlu1 %1791 }
 0x305   :  { %1725 = vrot.lane.b32.xlu0 %v7541_v5, %s5920_s17  ;;  %v1836_v54 = vsel %vm415_vm11, %v1792_v41, %v1794_v8  ;;  %v1835_v4 = vsel %vm415_vm11, %v7154_v23, %v1792_v41 }
 0x306   :  { %1825 = vrot.lane.b32.xlu1 %v7580_v55, %s5921_s18  ;;  %2377 = vmatprep.subr.mxu0 %v1836_v54 }
 0x307   :  { %2378 = vmatpush1.msra.mxu0 %v1835_v4  ;;  %v7632_v25 = vpop.permute.xlu0 %1797 }
 0x308   :  { %v1822_v15 = vpop.permute.xlu1 %1821 }
 0x309   :  { %1699 = vrot.lane.b32.xlu0 %v7578_v19, %s5920_s17  ;;  %v1850_v53 = vsel %vm415_vm11, %v1822_v15, %v7605_v34  ;;  %v1849_v33 = vsel %vm415_vm11, %v1820_v60, %v1822_v15 }
 0x30a   :  { %1799 = vrot.lane.b32.xlu1 %v7607_v49, %s5921_s18  ;;  %2464 = vmatprep.subr.mxu1 %v1850_v53 }
 0x30b   :  { %2465 = vmatpush1.msra.mxu1 %v1849_v33  ;;  %v1692_v23 = vpop.permute.xlu0 %1691 }
 0x30c   :  { %v1716_v3 = vpop.permute.xlu1 %1715 }
 0x30d   :  { %1623 = vrot.lane.b32.xlu0 %v7541_v5, %s5919_s16  ;;  %v1746_v59 = vsel %vm363_vm8, %v1716_v3, %v1718_v22  ;;  %v1745_v29 = vsel %vm363_vm8, %v7309_v45, %v1716_v3 }
 0x30e   :  { %1723 = vrot.lane.b32.xlu1 %v7580_v55, %s5920_s17  ;;  %2379 = vmatprep.subr.mxu0 %v1746_v59 }
 0x30f   :  { %2380 = vmatpush1.msra.mxu0 %v1745_v29  ;;  %v7648_v61 = vpop.permute.xlu0 %1721 }
 0x310   :  { %v1796_v60 = vpop.permute.xlu1 %1795 }
 0x311   :  { %1597 = vrot.lane.b32.xlu0 %v7578_v19, %s5919_s16  ;;  %v1838_v7 = vsel %vm415_vm11, %v1796_v60, %v7632_v25  ;;  %v1837_v58 = vsel %vm415_vm11, %v1794_v8, %v1796_v60 }
 0x312   :  { %1697 = vrot.lane.b32.xlu1 %v7607_v49, %s5920_s17  ;;  %2466 = vmatprep.subr.mxu1 %v1838_v7 }
 0x313   :  { %2467 = vmatpush1.msra.mxu1 %v1837_v58  ;;  %v1616_v45 = vpop.permute.xlu0 %1615 }
 0x314   :  { %v1690_v42 = vpop.permute.xlu1 %1689 }
 0x315   :  { %1521 = vrot.lane.b32.xlu0 %v7541_v5, %s5918_s15  ;;  %v1734_v37 = vsel %vm363_vm8, %v1690_v42, %v1692_v23  ;;  %v1733_v14 = vsel %vm363_vm8, %v7330_v13, %v1690_v42 }
 0x316   :  { %1621 = vrot.lane.b32.xlu1 %v7580_v55, %s5919_s16  ;;  %2381 = vmatprep.subr.mxu0 %v1734_v37 }
 0x317   :  { %2382 = vmatpush1.msra.mxu0 %v1733_v14  ;;  %v7664_v17 = vpop.permute.xlu0 %1695 }
 0x318   :  { %v1720_v31 = vpop.permute.xlu1 %1719 }
 0x319   :  { %1495 = vrot.lane.b32.xlu0 %v7578_v19, %s5918_s15  ;;  %v1748_v8 = vsel %vm363_vm8, %v1720_v31, %v7648_v61  ;;  %v1747_v26 = vsel %vm363_vm8, %v1718_v22, %v1720_v31 }
 0x31a   :  { %1595 = vrot.lane.b32.xlu1 %v7607_v49, %s5919_s16  ;;  %2468 = vmatprep.subr.mxu1 %v1748_v8 }
 0x31b   :  { %2469 = vmatpush1.msra.mxu1 %v1747_v26  ;;  %v1590_v13 = vpop.permute.xlu0 %1589 }
 0x31c   :  { %v1614_v0 = vpop.permute.xlu1 %1613 }
 0x31d   :  { %1419 = vrot.lane.b32.xlu0 %v7541_v5, %s5917_s14  ;;  %v1644_v40 = vsel %vm311_vm5, %v1614_v0, %v1616_v45  ;;  %v1643_v57 = vsel %vm311_vm5, %v7350_v2, %v1614_v0 }
 0x31e   :  { %1519 = vrot.lane.b32.xlu1 %v7580_v55, %s5918_s15  ;;  %2383 = vmatprep.subr.mxu0 %v1644_v40 }
 0x31f   :  { %2384 = vmatpush1.msra.mxu0 %v1643_v57  ;;  %v7680_v63 = vpop.permute.xlu0 %1619 }
 0x320   :  { %v1694_v6 = vpop.permute.xlu1 %1693 }
 0x321   :  { %1393 = vrot.lane.b32.xlu0 %v7578_v19, %s5917_s14  ;;  %v1736_v52 = vsel %vm363_vm8, %v1694_v6, %v7664_v17  ;;  %v1735_v22 = vsel %vm363_vm8, %v1692_v23, %v1694_v6 }
 0x322   :  { %1493 = vrot.lane.b32.xlu1 %v7607_v49, %s5918_s15  ;;  %2470 = vmatprep.subr.mxu1 %v1736_v52 }
 0x323   :  { %2471 = vmatpush1.msra.mxu1 %v1735_v22  ;;  %v1514_v2 = vpop.permute.xlu0 %1513 }
 0x324   :  { %v1588_v41 = vpop.permute.xlu1 %1587 }
 0x325   :  { %1317 = vrot.lane.b32.xlu0 %v7541_v5, %s5916_s3  ;;  %v1632_v54 = vsel %vm311_vm5, %v1588_v41, %v1590_v13  ;;  %v1631_v4 = vsel %vm311_vm5, %v7366_v20, %v1588_v41 }
 0x326   :  { %1417 = vrot.lane.b32.xlu1 %v7580_v55, %s5917_s14  ;;  %2385 = vmatprep.subr.mxu0 %v1632_v54 }
 0x327   :  { %2386 = vmatpush1.msra.mxu0 %v1631_v4  ;;  %v7696_v15 = vpop.permute.xlu0 %1593 }
 0x328   :  { %v1618_v53 = vpop.permute.xlu1 %1617 }
 0x329   :  { %1291 = vrot.lane.b32.xlu0 %v7578_v19, %s5916_s3  ;;  %v1646_v33 = vsel %vm311_vm5, %v1618_v53, %v7680_v63  ;;  %v1645_v23 = vsel %vm311_vm5, %v1616_v45, %v1618_v53 }
 0x32a   :  { %1391 = vrot.lane.b32.xlu1 %v7607_v49, %s5917_s14  ;;  %2472 = vmatprep.subr.mxu1 %v1646_v33 }
 0x32b   :  { %2473 = vmatpush1.msra.mxu1 %v1645_v23  ;;  %v1488_v20 = vpop.permute.xlu0 %1487 }
 0x32c   :  { %v1512_v3 = vpop.permute.xlu1 %1511 }
 0x32d   :  { %2031 = vrot.lane.b32.xlu0 %v7541_v5, %s5922_s19  ;;  %v1542_v59 = vsel %vm259_vm4, %v1512_v3, %v1514_v2  ;;  %v1541_v29 = vsel %vm259_vm4, %v7382_v43, %v1512_v3 }
 0x32e   :  { %1315 = vrot.lane.b32.xlu1 %v7580_v55, %s5916_s3  ;;  %2387 = vmatprep.subr.mxu0 %v1542_v59 }
 0x32f   :  { %2388 = vmatpush1.msra.mxu0 %v1541_v29  ;;  %v7712_v60 = vpop.permute.xlu0 %1517 }
 0x330   :  { %v1592_v7 = vpop.permute.xlu1 %1591 }
 0x331   :  { %2005 = vrot.lane.b32.xlu0 %v7578_v19, %s5922_s19  ;;  %v1634_v58 = vsel %vm311_vm5, %v1592_v7, %v7696_v15  ;;  %v1633_v5 = vsel %vm311_vm5, %v1590_v13, %v1592_v7 }
 0x332   :  { %1289 = vrot.lane.b32.xlu1 %v7607_v49, %s5916_s3  ;;  %2474 = vmatprep.subr.mxu1 %v1634_v58  ;;  %s5288_s3 = sshll.u32 %s5927_s29, 4  ;;  %s5289_s3 = int_to_ptr.vmem [resolvable:$true] %s5288_s3 }
 0x333   :  { %2475 = vmatpush1.msra.mxu1 %v1633_v5  ;;  %v1412_v43 = vpop.permute.xlu0 %1411  ;;  %s5889_s14 = scalar_lea.vmem %s5289_s3, 32  ;;  %p5894_p6 = scmp.lt.s32.totalorder %s5289_s3, %s5289_s3 }
 0x334   :  { %v1486_v45 = vpop.permute.xlu1 %1485  ;;  %p5890_p5 = scmp.ne.s32.totalorder %s5289_s3, %s5889_s14  ;;  %p5895_p7 = scmp.lt.s32.totalorder %s5889_s14, %s5889_s14 }
 0x335   :  { %v1530_v42 = vsel %vm259_vm4, %v1486_v45, %v1488_v20  ;;  %v1529_v37 = vsel %vm259_vm4, %v7398_v35, %v1486_v45 }
 0x336   :  { %2029 = vrot.lane.b32.xlu1 %v7580_v55, %s5922_s19  ;;  %2389 = vmatprep.subr.mxu0 %v1530_v42  ;;  %p5896_p8 = por %p5895_p7, %p5894_p6 }
 0x337   :  { %2390 = vmatpush1.msra.mxu0 %v1529_v37  ;;  %v7726_v19 = vpop.permute.xlu0 %1491 }
 0x338   :  { %v1516_v14 = vpop.permute.xlu1 %1515  ;;  %p5897_p9 = pnand %p5896_p8, %p5890_p5 }
 0x339   :  { %v1544_v31 = vsel %vm259_vm4, %v1516_v14, %v7712_v60  ;;  %v1543_v8 = vsel %vm259_vm4, %v1514_v2, %v1516_v14 }
 0x33a   :  { %2003 = vrot.lane.b32.xlu1 %v7607_v49, %s5922_s19  ;;  %2476 = vmatprep.subr.mxu1 %v1544_v31 }
 0x33b   :  { %2477 = vmatpush1.msra.mxu1 %v1543_v8  ;;  %v1386_v26 = vpop.permute.xlu0 %1385 }
 0x33c   :  { %v1410_v35 = vpop.permute.xlu1 %1409 }
 0x33d   :  { %v1440_v13 = vsel %vm207_vm2, %v1410_v35, %v1412_v43  ;;  %v1439_v0 = vsel %vm207_vm2, %v7414_v18, %v1410_v35 }
 0x33e   :  { %2391 = vmatprep.subr.mxu0 %v1440_v13 }
 0x33f   :  { %2392 = vmatpush1.msra.mxu0 %v1439_v0  ;;  %v7736_v40 = vpop.permute.xlu0 %1415 }
 0x340   :  { %v1490_v57 = vpop.permute.xlu1 %1489 }
 0x341   :  { %v1532_v6 = vsel %vm259_vm4, %v1490_v57, %v7726_v19  ;;  %v1531_v52 = vsel %vm259_vm4, %v1488_v20, %v1490_v57 }
 0x342   :  { %2478 = vmatprep.subr.mxu1 %v1532_v6 }
 0x343   :  { %2479 = vmatpush1.msra.mxu1 %v1531_v52  ;;  %v1310_v22 = vpop.permute.xlu0 %1309 }
 0x344   :  { %v1384_v2 = vpop.permute.xlu1 %1383 }
 0x345   :  { %v1428_v41 = vsel %vm207_vm2, %v1384_v2, %v1386_v26  ;;  %v1427_v54 = vsel %vm207_vm2, %v7430_v56, %v1384_v2  ;;  %v7805_v2 = vld [vmem:[%s9611_s2 + $0x10] sm:$0xff] }
 0x346   :  { %2393 = vmatprep.subr.mxu0 %v1428_v41 }
 0x347   :  { %2394 = vmatpush1.msra.mxu0 %v1427_v54  ;;  %v7744_v18 = vpop.permute.xlu0 %1389  ;;  %v7812_v54 = vld [vmem:[%s9611_s2 + $0x28] sm:$0xff] }
 0x348   :  { %v1414_v4 = vpop.permute.xlu1 %1413 }
 0x349   :  { %v1442_v53 = vsel %vm207_vm2, %v1414_v4, %v7736_v40  ;;  %v1441_v33 = vsel %vm207_vm2, %v1412_v43, %v1414_v4 }
 0x34a   :  { %2480 = vmatprep.subr.mxu1 %v1442_v53 }
 0x34b   :  { %2481 = vmatpush1.msra.mxu1 %v1441_v33  ;;  %v1284_v23 = vpop.permute.xlu0 %1283 }
 0x34c   :  { %v1308_v20 = vpop.permute.xlu1 %1307 }
 0x34d   :  { %v1338_v3 = vsel %vm155_vm3, %v1308_v20, %v1310_v22  ;;  %v1337_v59 = vsel %vm155_vm3, %v7446_v9, %v1308_v20 }
 0x34e   :  { %2395 = vmatprep.subr.mxu0 %v1338_v3  ;;  %v7829_v3 = vld [vmem:[%s9611_s2 + $0x38] sm:$0xff] }
 0x34f   :  { %2396 = vmatpush1.msra.mxu0 %v1337_v59  ;;  %v7752_v56 = vpop.permute.xlu0 %1313 }
 0x350   :  { %v1388_v29 = vpop.permute.xlu1 %1387 }
 0x351   :  { %v1430_v7 = vsel %vm207_vm2, %v1388_v29, %v7744_v18  ;;  %v1429_v58 = vsel %vm207_vm2, %v1386_v26, %v1388_v29 }
 0x352   :  { %2482 = vmatprep.subr.mxu1 %v1430_v7  ;;  %v9721_v7 = vmov 0.0  }
 0x353   :  { %2483 = vmatpush1.msra.mxu1 %v1429_v58  ;;  %v7757_v5 = vpop.permute.xlu0 %1287 }
 0x354   :  { %v1282_v43 = vpop.permute.xlu1 %1281 }
 0x355   :  { %v1326_v45 = vsel %vm155_vm3, %v1282_v43, %v1284_v23  ;;  %v1325_v9 = vsel %vm155_vm3, %v7455_v16, %v1282_v43 }
 0x356   :  { %2397 = vmatprep.subr.mxu0 %v1326_v45 }
 0x357   :  { %2398 = vmatpush1.msra.mxu0 %v1325_v9  ;;  %v2024_v42 = vpop.permute.xlu0 %2023 }
 0x358   :  { %v1312_v37 = vpop.permute.xlu1 %1311  ;;  %2399 = vmatprep.subr.mxu0 %v7174_v50 }
 0x359   :  { %2400 = vmatpush1.msra.mxu0 %v6878_v32  ;;  %v1340_v14 = vsel %vm155_vm3, %v1312_v37, %v7752_v56  ;;  %v1339_v31 = vsel %vm155_vm3, %v1310_v22, %v1312_v37 }
 0x35a   :  { %2401 = vmatprep.subr.mxu0 %v7228_v36  ;;  %2484 = vmatprep.subr.mxu1 %v1340_v14 }
 0x35b   :  { %2402 = vmatpush1.msra.mxu0 %v6849_v47  ;;  %2485 = vmatpush1.msra.mxu1 %v1339_v31  ;;  %v1998_v16 = vpop.permute.xlu0 %1997 }
 0x35c   :  { %v1286_v8 = vpop.permute.xlu1 %1285 }
 0x35d   :  { %v1328_v26 = vsel %vm155_vm3, %v1286_v8, %v7757_v5  ;;  %v1327_v50 = vsel %vm155_vm3, %v1284_v23, %v1286_v8  ;;  %v7821_v23 = vld [vmem:[%s9611_s2 + $0x20] sm:$0xff]  ;;  %v7864_v8 = vld [vmem:[%s9611_s2 + $0x30] sm:$0xff] }
 0x35e   :  { %2486 = vmatprep.subr.mxu1 %v1328_v26 }
 0x35f   :  { %2487 = vmatpush1.msra.mxu1 %v1327_v50  ;;  %v7772_v32 = vpop.permute.xlu0 %2027 }
 0x360   :  { %v2022_v35 = vpop.permute.xlu1 %2021  ;;  %2488 = vmatprep.subr.mxu1 %v7247_v51 }
 0x361   :  { %2489 = vmatpush1.msra.mxu1 %v7132_v1  ;;  %v2052_v36 = vsel %vm519_vm0, %v2022_v35, %v2024_v42  ;;  %v2051_v47 = vsel %vm519_vm0, %v7484_v46, %v2022_v35  ;;  %v7789_v46 = vld [vmem:[%s9611_s2] sm:$0xff] }
 0x362   :  { %2431 = vmatprep.subr.mxu0 %v2052_v36  ;;  %2490 = vmatprep.subr.mxu1 %v7294_v24  ;;  %v7797_v24 = vld [vmem:[%s9611_s2 + $0x18] sm:$0xff] }
 0x363   :  { %2432 = vmatpush2.msra.mxu0 %v2051_v47  ;;  %2491 = vmatpush1.msra.mxu1 %v7168_v30  ;;  %v1930_v13 = vpop.permute.xlu0 %1929 }
 0x364   :  { %v1996_v0 = vpop.permute.xlu1 %1995 }
 0x365   :  { %v2040_v57 = vsel %vm519_vm0, %v1996_v0, %v1998_v16  ;;  %v2039_v51 = vsel %vm519_vm0, %v7507_v48, %v1996_v0 }
 0x366   :  { %2433 = vmatprep.subr.mxu0 %v2040_v57 }
 0x367   :  { %2434 = vmatpush2.msra.mxu0 %v2039_v51  ;;  %v7784_v1 = vpop.permute.xlu0 %2001 }
 0x368   :  { %v2026_v6 = vpop.permute.xlu1 %2025  ;;  %2436 = vmatmul.mubr.f32.vlgmr.msra.gmra.mxu0 %v7789_v46 }
 0x369   :  { %v2054_v30 = vsel %vm519_vm0, %v2026_v6, %v7772_v32  ;;  %5337 = vmatprep.mubr.msk.f32.mxu0 %vm2091_vm1, %v7797_v24  ;;  %v2053_v48 = vsel %vm519_vm0, %v2024_v42, %v2026_v6 }
 0x36a   :  { %2520 = vmatprep.subr.mxu1 %v2054_v30 }
 0x36b   :  { %2521 = vmatpush2.msra.mxu1 %v2053_v48  ;;  %v1904_v52 = vpop.permute.xlu0 %1903 }
 0x36c   :  { %v1928_v22 = vpop.permute.xlu1 %1927  ;;  %2442 = vmatmul.mubr.f32.gmra.mxu0 %v7805_v2 }
 0x36d   :  { %v1954_v41 = vsel %vm467_vm12, %v1928_v22, %v1930_v13  ;;  %5338 = vmatprep.mubr.msk.f32.mxu0 %vm2091_vm1, %v7812_v54  ;;  %v1953_v4 = vsel %vm467_vm12, %v7536_v27, %v1928_v22 }
 0x36e   :  { %2549 = vmatprep.subr.mxu0 %v1954_v41 }
 0x36f   :  { %2550 = vmatpush1.msra.mxu0 %v1953_v4  ;;  %v1828_v53 = vpop.permute.xlu0 %1827 }
 0x370   :  { %v2000_v33 = vpop.permute.xlu1 %1999  ;;  %2448 = vmatmul.mubr.f32.gmra.mxu0 %v7821_v23 }
 0x371   :  { %v2042_v20 = vsel %vm519_vm0, %v2000_v33, %v7784_v1  ;;  %5339 = vmatprep.mubr.msk.f32.mxu0 %vm2091_vm1, %v7829_v3  ;;  %v2041_v27 = vsel %vm519_vm0, %v1998_v16, %v2000_v33 }
 0x372   :  { %2522 = vmatprep.subr.mxu1 %v2042_v20 }
 0x373   :  { %2523 = vmatpush2.msra.mxu1 %v2041_v27  ;;  %v1802_v59 = vpop.permute.xlu0 %1801 }
 0x374   :  { %v1902_v29 = vpop.permute.xlu1 %1901  ;;  %2454 = vmatmul.mubr.f32.gmra.mxu0 %v7280_v12  ;;  %2525 = vmatmul.mubr.f32.vlgmr.msra.gmra.mxu1 %v7789_v46 }
 0x375   :  { %2638 = vmatprep.subr.mxu1 %v9721_v7  ;;  %v1942_v58 = vsel %vm467_vm12, %v1902_v29, %v1904_v52  ;;  %5341 = vmatprep.mubr.msk.f32.mxu1 %vm2091_vm1, %v7797_v24  ;;  %v1941_v43 = vsel %vm467_vm12, %v7571_v38, %v1902_v29 }
 0x376   :  { %2639 = vmatpush1.msra.mxu1 %v1930_v13  ;;  %2551 = vmatprep.subr.mxu0 %v1942_v58 }
 0x377   :  { %2640 = vmatprep.subr.mxu1 %v9721_v7  ;;  %2552 = vmatpush1.msra.mxu0 %v1941_v43  ;;  %v1726_v45 = vpop.permute.xlu0 %1725 }
 0x378   :  { %2641 = vmatpush1.msra.mxu1 %v1904_v52  ;;  %v1826_v12 = vpop.permute.xlu1 %1825  ;;  %5344 = vmatprep.mubr.msk.f32.mxu0 %vm2091_vm1, %v7619_v44 }
 0x379   :  { %2531 = vmatmul.mubr.f32.gmra.mxu1 %v7805_v2  ;;  %2642 = vmatprep.subr.mxu1 %v9721_v7  ;;  %v1852_v9 = vsel %vm415_vm11, %v1826_v12, %v1828_v53  ;;  %v1851_v38 = vsel %vm415_vm11, %v7605_v34, %v1826_v12 }
 0x37a   :  { %2643 = vmatpush1.msra.mxu1 %v1828_v53  ;;  %2553 = vmatprep.subr.mxu0 %v1852_v9 }
 0x37b   :  { %2644 = vmatprep.subr.mxu1 %v9721_v7  ;;  %5342 = vmatprep.mubr.msk.f32.mxu1 %vm2091_vm1, %v7812_v54  ;;  %v1700_v42 = vpop.permute.xlu0 %1699 }
 0x37c   :  { %2554 = vmatpush1.msra.mxu0 %v1851_v38  ;;  %2645 = vmatpush1.msra.mxu1 %v1802_v59  ;;  %v1800_v37 = vpop.permute.xlu1 %1799 }
 0x37d   :  { %2537 = vmatmul.mubr.f32.gmra.mxu1 %v7821_v23  ;;  %2646 = vmatprep.subr.mxu1 %v9721_v7  ;;  %v1840_v14 = vsel %vm415_vm11, %v1800_v37, %v1802_v59  ;;  %v1839_v34 = vsel %vm415_vm11, %v7632_v25, %v1800_v37 }
 0x37e   :  { %2647 = vmatpush1.msra.mxu1 %v1726_v45  ;;  %2555 = vmatprep.subr.mxu0 %v1840_v14 }
 0x37f   :  { %2648 = vmatprep.subr.mxu1 %v9721_v7  ;;  %5343 = vmatprep.mubr.msk.f32.mxu1 %vm2091_vm1, %v7829_v3  ;;  %v1624_v31 = vpop.permute.xlu0 %1623 }
 0x380   :  { %2556 = vmatpush1.msra.mxu0 %v1839_v34  ;;  %2649 = vmatpush1.msra.mxu1 %v1700_v42  ;;  %v1724_v16 = vpop.permute.xlu1 %1723 }
 0x381   :  { %2543 = vmatmul.mubr.f32.gmra.mxu1 %v7864_v8  ;;  %2650 = vmatprep.subr.mxu1 %v9721_v7  ;;  %v1750_v25 = vsel %vm363_vm8, %v1724_v16, %v1726_v45  ;;  %v1749_v26 = vsel %vm363_vm8, %v7648_v61, %v1724_v16 }
 0x382   :  { %2651 = vmatpush1.msra.mxu1 %v1624_v31  ;;  %2557 = vmatprep.subr.mxu0 %v1750_v25 }
 0x383   :  { %2558 = vmatpush1.msra.mxu0 %v1749_v26  ;;  %2652 = vmatprep.subr.mxu1 %v9721_v7  ;;  %v1598_v50 = vpop.permute.xlu0 %1597 }
 0x384   :  { %v1698_v35 = vpop.permute.xlu1 %1697  ;;  %2653 = vmatpush1.msra.mxu1 %v1598_v50  ;;  %5350 = vmatprep.mubr.msk.f32.mxu1 %vm2091_vm1, %v7619_v44 }
 0x385   :  { %v1738_v36 = vsel %vm363_vm8, %v1698_v35, %v1700_v42  ;;  %v1737_v47 = vsel %vm363_vm8, %v7664_v17, %v1698_v35  ;;  %2654 = vmatprep.subr.mxu1 %v9721_v7  ;;  %v9722_v35 = vld [vmem:[#allocation9_spill] sm:$0xff] }
 0x386   :  { %2559 = vmatprep.subr.mxu0 %v1738_v36 }
 0x387   :  { %2560 = vmatpush1.msra.mxu0 %v1737_v47  ;;  %v1522_v61 = vpop.permute.xlu0 %1521  ;;  %v9723_v47 = vld [vmem:[#allocation8_spill] sm:$0xff] }
 0x388   :  { %v1622_v13 = vpop.permute.xlu1 %1621  ;;  %2655 = vmatpush1.msra.mxu1 %v1522_v61 }
 0x389   :  { %v1648_v0 = vsel %vm311_vm5, %v1622_v13, %v1624_v31  ;;  %v1647_v57 = vsel %vm311_vm5, %v7680_v63, %v1622_v13  ;;  %2656 = vmatprep.subr.mxu1 %v9721_v7 }
 0x38a   :  { %2561 = vmatprep.subr.mxu0 %v1648_v0 }
 0x38b   :  { %2562 = vmatpush1.msra.mxu0 %v1647_v57  ;;  %v1496_v44 = vpop.permute.xlu0 %1495 }
 0x38c   :  { %v1596_v51 = vpop.permute.xlu1 %1595  ;;  %2657 = vmatpush1.msra.mxu1 %v1496_v44 }
 0x38d   :  { %v1636_v17 = vsel %vm311_vm5, %v1596_v51, %v1598_v50  ;;  %v1635_v6 = vsel %vm311_vm5, %v7696_v15, %v1596_v51  ;;  %2658 = vmatprep.subr.mxu1 %v9721_v7  ;;  %v7964_v50 = vld [vmem:[%s9613_s4] sm:$0xff] }
 0x38e   :  { %2563 = vmatprep.subr.mxu0 %v1636_v17  ;;  %v2730_v36 = vrot.slane %v7964_v50, %v9722_v35  ;;  %v9724_v17 = vld [vmem:[#allocation10_spill] sm:$0xff] }
 0x38f   :  { %2564 = vmatpush1.msra.mxu0 %v1635_v6  ;;  %v1420_v30 = vpop.permute.xlu0 %1419  ;;  %v2738_v6 = vrot.slane %v7964_v50, %v9724_v17 }
 0x390   :  { %v1520_v48 = vpop.permute.xlu1 %1519  ;;  %2659 = vmatpush1.msra.mxu1 %v1420_v30 }
 0x391   :  { %v1546_v63 = vsel %vm259_vm4, %v1520_v48, %v1522_v61  ;;  %v1545_v52 = vsel %vm259_vm4, %v7712_v60, %v1520_v48  ;;  %2660 = vmatprep.subr.mxu1 %v9721_v7  ;;  %v2734_v61 = vrot.slane %v7964_v50, %v9723_v47 }
 0x392   :  { %2565 = vmatprep.subr.mxu0 %v1546_v63 }
 0x393   :  { %2566 = vmatpush1.msra.mxu0 %v1545_v52  ;;  %v1394_v22 = vpop.permute.xlu0 %1393 }
 0x394   :  { %v1494_v41 = vpop.permute.xlu1 %1493  ;;  %2661 = vmatpush1.msra.mxu1 %v1394_v22 }
 0x395   :  { %v1534_v15 = vsel %vm259_vm4, %v1494_v41, %v1496_v44  ;;  %v1533_v4 = vsel %vm259_vm4, %v7726_v19, %v1494_v41  ;;  %2662 = vmatprep.subr.mxu1 %v9721_v7 }
 0x396   :  { %2567 = vmatprep.subr.mxu0 %v1534_v15 }
 0x397   :  { %2568 = vmatpush1.msra.mxu0 %v1533_v4  ;;  %v1318_v53 = vpop.permute.xlu0 %1317 }
 0x398   :  { %v1418_v33 = vpop.permute.xlu1 %1417  ;;  %2663 = vmatpush1.msra.mxu1 %v1318_v53 }
 0x399   :  { %v1444_v60 = vsel %vm207_vm2, %v1418_v33, %v1420_v30  ;;  %v1443_v20 = vsel %vm207_vm2, %v7736_v40, %v1418_v33  ;;  %2664 = vmatprep.subr.mxu1 %v9721_v7 }
 0x39a   :  { %2569 = vmatprep.subr.mxu0 %v1444_v60 }
 0x39b   :  { %2570 = vmatpush1.msra.mxu0 %v1443_v20  ;;  %v1292_v27 = vpop.permute.xlu0 %1291  ;;  %v9725_v20 = vld [vmem:[#allocation11_spill] sm:$0xff] }
 0x39c   :  { %v1392_v59 = vpop.permute.xlu1 %1391  ;;  %2665 = vmatpush1.msra.mxu1 %v1292_v27 }
 0x39d   :  { %2666 = vmatprep.subr.mxu1 %v9721_v7  ;;  %v1432_v19 = vsel %vm207_vm2, %v1392_v59, %v1394_v22  ;;  %v1431_v29 = vsel %vm207_vm2, %v7744_v18, %v1392_v59  ;;  %vm4880_vm2 = vcmask 7168  }
 0x39e   :  { %2571 = vmatprep.subr.mxu0 %v1432_v19  ;;  %5348 = vmatpush1.msk.msra.mxu1 %vm1238_vm6, %v1237_v62 }
 0x39f   :  { %2572 = vmatpush1.msra.mxu0 %v1431_v29  ;;  %2668 = vmatprep.subr.mxu1 %v9721_v7  ;;  %v2032_v40 = vpop.permute.xlu0 %2031 }
 0x3a0   :  { %v1316_v58 = vpop.permute.xlu1 %1315  ;;  %5349 = vmatpush1.msk.msra.mxu1 %vm1238_vm6, %v1224_v11 }
 0x3a1   :  { %2698 = vmatprep.subr.mxu1 %v9721_v7  ;;  %v1342_v43 = vsel %vm155_vm3, %v1316_v58, %v1318_v53  ;;  %v1341_v18 = vsel %vm155_vm3, %v7752_v56, %v1316_v58 }
 0x3a2   :  { %2573 = vmatprep.subr.mxu0 %v1342_v43  ;;  %2699 = vmatpush2.msra.mxu1 %v2032_v40 }
 0x3a3   :  { %2574 = vmatpush1.msra.mxu0 %v1341_v18  ;;  %2700 = vmatprep.subr.mxu1 %v9721_v7  ;;  %v2006_v28 = vpop.permute.xlu0 %2005 }
 0x3a4   :  { %v1290_v62 = vpop.permute.xlu1 %1289  ;;  %2701 = vmatpush2.msra.mxu1 %v2006_v28 }
 0x3a5   :  { %v1330_v45 = vsel %vm155_vm3, %v1290_v62, %v1292_v27  ;;  %v1329_v21 = vsel %vm155_vm3, %v7757_v5, %v1290_v62  ;;  %2703 = vmatmul.mubr.f32.vlgmr.msra.gmra.mxu1 %v7789_v46  ;;  %v2742_v27 = vrot.slane %v7964_v50, %v9725_v20  ;;  %vm5280_vm3 = vcmask 74752  }
 0x3a6   :  { %2575 = vmatprep.subr.mxu0 %v1330_v45  ;;  %5351 = vmatprep.mubr.msk.f32.mxu1 %vm2091_vm1, %v7797_v24 }
 0x3a7   :  { %2576 = vmatpush1.msra.mxu0 %v1329_v21 }
 0x3a8   :  { %v2030_v11 = vpop.permute.xlu1 %2029  ;;  %2577 = vmatprep.subr.mxu0 %v7580_v55  ;;  %v2259_v38 = vpop.f32.mrf.mxu0 }
 0x3a9   :  { %2578 = vmatpush1.msra.mxu0 %v7190_v10  ;;  %2708 = vmatmul.mubr.f32.gmra.mxu1 %v7805_v2  ;;  %v2056_v56 = vsel %vm519_vm0, %v2030_v11, %v2032_v40  ;;  %v2055_v7 = vsel %vm519_vm0, %v7772_v32, %v2030_v11  ;;  %v8000_v60 = vmul.f32 %v2738_v6, %v2259_v38 }
 0x3aa   :  { %2579 = vmatprep.subr.mxu0 %v7607_v49  ;;  %5352 = vmatprep.mubr.msk.f32.mxu1 %vm2091_vm1, %v7812_v54  ;;  %v2261_v42 = vpop.f32.mrf.mxu0 }
 0x3ab   :  { %2580 = vmatpush1.msra.mxu0 %v7241_v39  ;;  %v2170_v39 = vpop.f32.mrf.mxu1 }
 0x3ac   :  { %v2004_v5 = vpop.permute.xlu1 %2003  ;;  %2609 = vmatprep.subr.mxu0 %v2056_v56  ;;  %v7974_v44 = vmul.f32 %v2730_v36, %v2170_v39  ;;  %v9727_v56 = vld [vmem:[#allocation13_spill] sm:$0xff]  ;;  %v8032_v39 = vmul.f32 %v2742_v27, %v2261_v42 }
 0x3ad   :  { %2610 = vmatpush2.msra.mxu0 %v2055_v7  ;;  %v2044_v55 = vsel %vm519_vm0, %v2004_v5, %v2006_v28  ;;  %v2043_v10 = vsel %vm519_vm0, %v7784_v1, %v2004_v5  ;;  %2713 = vmatmul.mubr.f32.gmra.mxu1 %v7821_v23  ;;  %v2172_v49 = vpop.f32.mrf.mxu1  ;;  %v9726_v28 = vld [vmem:[#allocation12_spill] sm:$0xff]  ;;  %v2750_v5 = vrot.slane %v7964_v50, %v9727_v56  ;;  %v9732_v56 = vld [vmem:[#allocation15_spill] sm:$0xff]  ;;  %vm3779_vm0 = vcmask 916480  }
 0x3ae   :  { %2611 = vmatprep.subr.mxu0 %v2044_v55  ;;  %5353 = vmatprep.mubr.msk.f32.mxu1 %vm2091_vm1, %v7829_v3  ;;  %v7976_v51 = vmul.f32 %v2734_v61, %v2172_v49  ;;  %v2904_v53 = vmul.f32 %v7974_v44, %v7974_v44  ;;  %v2746_v62 = vrot.slane %v7964_v50, %v9726_v28 }
 0x3af   :  { %2612 = vmatpush2.msra.mxu0 %v2043_v10  ;;  %v2176_v32 = vpop.f32.mrf.mxu1  ;;  %v2906_v10 = vmul.f32 %v8000_v60, %v8000_v60 }
 0x3b0   :  { %2614 = vmatmul.mubr.f32.vlgmr.msra.gmra.mxu0 %v7789_v46  ;;  %v7982_v48 = vmul.f32 %v2730_v36, %v2176_v32  ;;  %v2905_v33 = vmul.f32 %v7976_v51, %v7976_v51  ;;  %v2844_v58 = vadd.f32 %v7976_v51, %v7974_v44 }
 0x3b1   :  { %5345 = vmatprep.mubr.msk.f32.mxu0 %vm2091_vm1, %v7797_v24  ;;  %2718 = vmatmul.mubr.f32.gmra.mxu1 %v7864_v8  ;;  %v2178_v1 = vpop.f32.mrf.mxu1 }
 0x3b2   :  { %v7984_v63 = vmul.f32 %v2734_v61, %v2178_v1  ;;  %v2917_v19 = vmul.f32 %v7982_v48, %v7982_v48  ;;  %v2956_v55 = vadd.f32 %v2905_v33, %v2904_v53  ;;  %v2907_v33 = vmul.f32 %v8032_v39, %v8032_v39 }
 0x3b3   :  { %v2182_v46 = vpop.f32.mrf.mxu1 }
 0x3b4   :  { %2620 = vmatmul.mubr.f32.gmra.mxu0 %v7805_v2  ;;  %v7986_v52 = vmul.f32 %v2730_v36, %v2182_v46  ;;  %v2918_v29 = vmul.f32 %v7984_v63, %v7984_v63  ;;  %v2859_v1 = vadd.f32 %v7984_v63, %v7982_v48  ;;  %v2957_v53 = vadd.f32 %v2956_v55, %v2906_v10 }
 0x3b5   :  { %5346 = vmatprep.mubr.msk.f32.mxu0 %vm2091_vm1, %v7812_v54  ;;  %v2184_v24 = vpop.f32.mrf.mxu1 }
 0x3b6   :  { %v7988_v22 = vmul.f32 %v2734_v61, %v2184_v24  ;;  %v2930_v43 = vmul.f32 %v7986_v52, %v7986_v52  ;;  %v2971_v46 = vadd.f32 %v2918_v29, %v2917_v19 }
 0x3b7   :  { %v2188_v12 = vpop.f32.mrf.mxu1 }
 0x3b8   :  { %2626 = vmatmul.mubr.f32.gmra.mxu0 %v7821_v23  ;;  %v2265_v23 = vpop.f32.mrf.mxu0  ;;  %v7992_v15 = vmul.f32 %v2730_v36, %v2188_v12  ;;  %v2931_v18 = vmul.f32 %v7988_v22, %v7988_v22 }
 0x3b9   :  { %5347 = vmatprep.mubr.msk.f32.mxu0 %vm2091_vm1, %v7829_v3  ;;  %v2190_v9 = vpop.f32.mrf.mxu1  ;;  %v8010_v40 = vmul.f32 %v2738_v6, %v2265_v23  ;;  %v2845_v23 = vadd.f32 %v2844_v58, %v8000_v60 }
 0x3ba   :  { %v2267_v3 = vpop.f32.mrf.mxu0  ;;  %v7994_v4 = vmul.f32 %v2734_v61, %v2190_v9  ;;  %v2943_v21 = vmul.f32 %v7992_v15, %v7992_v15  ;;  %v2874_v9 = vadd.f32 %v7988_v22, %v7986_v52  ;;  %v2986_v38 = vadd.f32 %v2931_v18, %v2930_v43 }
 0x3bb   :  { %v7947_v2 = vpop.f32.mrf.mxu1  ;;  %v2919_v24 = vmul.f32 %v8010_v40, %v8010_v40  ;;  %v8040_v12 = vmul.f32 %v2742_v27, %v2267_v3 }
 0x3bc   :  { %2632 = vmatmul.mubr.f32.gmra.mxu0 %v7864_v8  ;;  %v2271_v34 = vpop.f32.mrf.mxu0  ;;  %v2944_v11 = vmul.f32 %v7994_v4, %v7994_v4  ;;  %v2889_v42 = vadd.f32 %v7994_v4, %v7992_v15  ;;  %v8064_v43 = vmul.f32 %v2746_v62, %v7947_v2 }
 0x3bd   :  { %v7949_v54 = vpop.f32.mrf.mxu1  ;;  %v8028_v7 = vmul.f32 %v2738_v6, %v2271_v34  ;;  %v2972_v18 = vadd.f32 %v2971_v46, %v2919_v24 }
 0x3be   :  { %v2273_v16 = vpop.f32.mrf.mxu0  ;;  %9730 = vst [vmem:[#allocation17_spill] sm:$0xff] %v8064_v43 }
 0x3bf   :  { %v7951_v37 = vpop.f32.mrf.mxu1  ;;  %v2932_v36 = vmul.f32 %v8028_v7, %v8028_v7  ;;  %v8051_v61 = vmul.f32 %v2742_v27, %v2273_v16  ;;  %v2860_v16 = vadd.f32 %v2859_v1, %v8010_v40  ;;  %v2875_v55 = vadd.f32 %v2874_v9, %v8028_v7 }
 0x3c0   :  { %v2277_v25 = vpop.f32.mrf.mxu0  ;;  %v8072_v10 = vmul.f32 %v2746_v62, %v7951_v37 }
 0x3c1   :  { %v7953_v14 = vpop.f32.mrf.mxu1  ;;  %v8034_v49 = vmul.f32 %v2738_v6, %v2277_v25  ;;  %v3001_v25 = vadd.f32 %v2944_v11, %v2943_v21  ;;  %v9729_v6 = vld [vmem:[#allocation14_spill] sm:$0xff]  ;;  %v2920_v21 = vmul.f32 %v8040_v12, %v8040_v12  ;;  %v2846_v11 = vadd.f32 %v2845_v23, %v8032_v39 }
 0x3c2   :  { %v2279_v13 = vpop.f32.mrf.mxu0  ;;  %v8055_v3 = vrot.slane %v7964_v50, %v9729_v6  ;;  %9731 = vst [vmem:[#allocation18_spill] sm:$0xff] %v8072_v10  ;;  %v2987_v2 = vadd.f32 %v2986_v38, %v2932_v36  ;;  %v2933_v1 = vmul.f32 %v8051_v61, %v8051_v61  ;;  %v2958_v23 = vadd.f32 %v2957_v53, %v2907_v33 }
 0x3c3   :  { %v7955_v31 = vpop.f32.mrf.mxu1  ;;  %9728 = vst [vmem:[#allocation16_spill] sm:$0xff] %v8034_v49  ;;  %v2945_v19 = vmul.f32 %v8034_v49, %v8034_v49  ;;  %v8061_v29 = vmul.f32 %v2742_v27, %v2279_v13  ;;  %v8076_v13 = vrot.slane %v7964_v50, %v9732_v56  ;;  %v2890_v46 = vadd.f32 %v2889_v42, %v8034_v49 }
 0x3c4   :  { %v8084_v24 = vmul.f32 %v2746_v62, %v7955_v31  ;;  %v2908_v38 = vmul.f32 %v8064_v43, %v8064_v43  ;;  %v8094_v36 = vmul.f32 %v2750_v5, %v7949_v54  ;;  %v2861_v42 = vadd.f32 %v2860_v16, %v8040_v12 }
 0x3c5   :  { %v7957_v8 = vpop.f32.mrf.mxu1  ;;  %v3002_v9 = vadd.f32 %v3001_v25, %v2945_v19  ;;  %v2946_v37 = vmul.f32 %v8061_v29, %v8061_v29  ;;  %v2973_v56 = vadd.f32 %v2972_v18, %v2920_v21  ;;  %v2847_v31 = vadd.f32 %v2846_v11, %v8064_v43 }
 0x3c6   :  { %9733 = vst [vmem:[#allocation19_spill] sm:$0xff] %v8084_v24  ;;  %v2876_v25 = vadd.f32 %v2875_v55, %v8051_v61  ;;  %v2921_v53 = vmul.f32 %v8072_v10, %v8072_v10  ;;  %v2988_v33 = vadd.f32 %v2987_v2, %v2933_v1  ;;  %v2891_v19 = vadd.f32 %v2890_v46, %v8061_v29 }
 0x3c7   :  { %v7959_v26 = vpop.f32.mrf.mxu1  ;;  %v2934_v16 = vmul.f32 %v8084_v24, %v8084_v24  ;;  %v8115_v18 = vmul.f32 %v2750_v5, %v7957_v8  ;;  %v3003_v21 = vadd.f32 %v3002_v9, %v2946_v37  ;;  %v2959_v1 = vadd.f32 %v2958_v23, %v2908_v38 }
 0x3c8   :  { %v8089_v6 = vmul.f32 %v2746_v62, %v7959_v26  ;;  %v8102_v26 = vmul.f32 %v2750_v5, %v7953_v14  ;;  %v8107_v62 = vld [vmem:[%s9613_s4 + $0x8] sm:$0x1f]  ;;  %v2909_v46 = vmul.f32 %v8094_v36, %v8094_v36  ;;  %v2974_v9 = vadd.f32 %v2973_v56, %v2921_v53 }
 0x3c9   :  { %v7970_v0 = vpop.f32.mrf.mxu1  ;;  %9736 = vst [vmem:[#allocation22_spill] sm:$0xff] %v8115_v18  ;;  %v8133_v8 = vrot.slane %v8107_v62, %v9722_v35  ;;  %v2989_v23 = vadd.f32 %v2988_v33, %v2934_v16  ;;  %v2935_v38 = vmul.f32 %v8115_v18, %v8115_v18  ;;  %v8146_v35 = vrot.slane %v8107_v62, %v9723_v47 }
 0x3ca   :  { %9734 = vst [vmem:[#allocation20_spill] sm:$0xff] %v8089_v6  ;;  %9735 = vst [vmem:[#allocation21_spill] sm:$0xff] %v8102_v26  ;;  %v2947_v11 = vmul.f32 %v8089_v6, %v8089_v6  ;;  %v8124_v55 = vmul.f32 %v2750_v5, %v7970_v0  ;;  %v2922_v37 = vmul.f32 %v8102_v26, %v8102_v26 }
 0x3cb   :  { %v2877_v0 = vadd.f32 %v2876_v25, %v8084_v24  ;;  %v2960_v33 = vadd.f32 %v2959_v1, %v2909_v46  ;;  %v2990_v1 = vadd.f32 %v2989_v23, %v2935_v38 }
 0x3cc   :  { %9737 = vst [vmem:[#allocation23_spill] sm:$0xff] %v8124_v55  ;;  %v3004_v53 = vadd.f32 %v3003_v21, %v2947_v11  ;;  %v2948_v25 = vmul.f32 %v8124_v55, %v8124_v55 }
 0x3cd   :  { %v2878_v21 = vadd.f32 %v2877_v0, %v8115_v18 }
 0x428   :  { %v7980_v30 = vpop.f32.mrf.mxu0 }
 0x429   :  { %v8119_v14 = vmul.f32 %v8055_v3, %v7980_v30  ;;  %v2862_v30 = vadd.f32 %v2861_v42, %v8072_v10  ;;  %v2848_v42 = vadd.f32 %v2847_v31, %v8094_v36 }
 0x42a   :  { %v8004_v59 = vpop.f32.mrf.mxu0 }
 0x42b   :  { %v2910_v56 = vmul.f32 %v8119_v14, %v8119_v14  ;;  %v8155_v16 = vmul.f32 %v8076_v13, %v8004_v59  ;;  %v2863_v31 = vadd.f32 %v2862_v30, %v8102_v26  ;;  %v2849_v30 = vadd.f32 %v2848_v42, %v8119_v14 }
 0x42c   :  { %v2443_v32 = vpop.f32.mrf.mxu0 }
 0x42d   :  { %v8129_v43 = vmul.f32 %v8055_v3, %v2443_v32  ;;  %v2892_v32 = vadd.f32 %v2891_v19, %v8089_v6  ;;  %v2975_v6 = vadd.f32 %v2974_v9, %v2922_v37  ;;  %v2961_v9 = vadd.f32 %v2960_v33, %v2910_v56 }
 0x42e   :  { %v2445_v58 = vpop.f32.mrf.mxu0  ;;  %v3005_v37 = vadd.f32 %v3004_v53, %v2948_v25  ;;  %v2911_v23 = vmul.f32 %v8155_v16, %v8155_v16  ;;  %v8206_v33 = vrot.slane %v8107_v62, %v9726_v28 }
 0x42f   :  { %v2923_v19 = vmul.f32 %v8129_v43, %v8129_v43  ;;  %v8160_v47 = vmul.f32 %v8076_v13, %v2445_v58  ;;  %v2893_v59 = vadd.f32 %v2892_v32, %v8124_v55 }
 0x430   :  { %v2449_v50 = vpop.f32.mrf.mxu0 }
 0x431   :  { %v8165_v11 = vmul.f32 %v8055_v3, %v2449_v50 }
 0x432   :  { %v2451_v2 = vpop.f32.mrf.mxu0 }
 0x433   :  { %9738 = vst [vmem:[#allocation24_spill] sm:$0xff] %v8165_v11  ;;  %v2879_v38 = vadd.f32 %v2878_v21, %v8165_v11  ;;  %v2936_v32 = vmul.f32 %v8165_v11, %v8165_v11  ;;  %v8191_v42 = vmul.f32 %v8076_v13, %v2451_v2  ;;  %v2850_v2 = vadd.f32 %v2849_v30, %v8155_v16 }
 0x434   :  { %v7972_v57 = vpop.f32.mrf.mxu1  ;;  %v2455_v24 = vpop.f32.mrf.mxu0 }
 0x435   :  { %v8171_v46 = vmul.f32 %v8055_v3, %v2455_v24  ;;  %v8175_v58 = vmul.f32 %v8133_v8, %v7972_v57  ;;  %v2864_v3 = vadd.f32 %v2863_v31, %v8129_v43  ;;  %v2976_v24 = vadd.f32 %v2975_v6, %v2923_v19 }
 0x436   :  { %v7990_v41 = vpop.f32.mrf.mxu1  ;;  %v2457_v0 = vpop.f32.mrf.mxu0  ;;  %v2924_v57 = vmul.f32 %v8160_v47, %v8160_v47  ;;  %v2991_v30 = vadd.f32 %v2990_v1, %v2936_v32  ;;  %v2937_v55 = vmul.f32 %v8191_v42, %v8191_v42 }
 0x437   :  { %9739 = vst [vmem:[#allocation25_spill] sm:$0xff] %v8171_v46  ;;  %v2949_v53 = vmul.f32 %v8171_v46, %v8171_v46  ;;  %v2912_v6 = vmul.f32 %v8175_v58, %v8175_v58  ;;  %v8202_v25 = vmul.f32 %v8076_v13, %v2457_v0  ;;  %v8211_v19 = vmul.f32 %v8146_v35, %v7990_v41 }
 0x438   :  { %v2962_v13 = vadd.f32 %v2961_v9, %v2911_v23  ;;  %v2865_v0 = vadd.f32 %v2864_v3, %v8160_v47  ;;  %v2880_v41 = vadd.f32 %v2879_v38, %v8191_v42  ;;  %v2894_v26 = vadd.f32 %v2893_v59, %v8171_v46 }
 0x439   :  { %v8020_v45 = vpop.f32.mrf.mxu1  ;;  %v2851_v49 = vadd.f32 %v2850_v2, %v8175_v58  ;;  %v2950_v23 = vmul.f32 %v8202_v25, %v8202_v25  ;;  %v2992_v38 = vadd.f32 %v2991_v30, %v2937_v55 }
 0x43a   :  { %v8180_v50 = vmul.f32 %v8133_v8, %v8020_v45  ;;  %v8195_v45 = vrot.slane %v8107_v62, %v9724_v17  ;;  %v2977_v17 = vadd.f32 %v2976_v24, %v2924_v57  ;;  %v2963_v9 = vadd.f32 %v2962_v13, %v2912_v6 }
 0x43b   :  { %v8047_v34 = vpop.f32.mrf.mxu1  ;;  %v2895_v6 = vadd.f32 %v2894_v26, %v8202_v25 }
 0x43c   :  { %v2925_v31 = vmul.f32 %v8180_v50, %v8180_v50  ;;  %v8217_v21 = vmul.f32 %v8146_v35, %v8047_v34  ;;  %v3006_v34 = vadd.f32 %v3005_v37, %v2949_v53  ;;  %v2866_v1 = vadd.f32 %v2865_v0, %v8180_v50 }
 0x43d   :  { %v8078_v27 = vpop.f32.mrf.mxu1 }
 0x43e   :  { %v8222_v28 = vmul.f32 %v8133_v8, %v8078_v27  ;;  %v2913_v27 = vmul.f32 %v8211_v19, %v8211_v19  ;;  %v2978_v3 = vadd.f32 %v2977_v17, %v2925_v31  ;;  %v2926_v24 = vmul.f32 %v8217_v21, %v8217_v21 }
 0x43f   :  { %v8109_v54 = vpop.f32.mrf.mxu1  ;;  %v8248_v17 = vrot.slane %v8107_v62, %v9725_v20  ;;  %v3007_v2 = vadd.f32 %v3006_v34, %v2950_v23  ;;  %v2852_v31 = vadd.f32 %v2851_v49, %v8211_v19  ;;  %v2867_v55 = vadd.f32 %v2866_v1, %v8217_v21 }
 0x440   :  { %v8240_v59 = vmul.f32 %v8146_v35, %v8109_v54  ;;  %v2881_v32 = vadd.f32 %v2880_v41, %v8222_v28  ;;  %v2979_v0 = vadd.f32 %v2978_v3, %v2926_v24 }
 0x441   :  { %v8139_v5 = vpop.f32.mrf.mxu1 }
 0x442   :  { %9740 = vst [vmem:[#allocation26_spill] sm:$0xff] %v8240_v59  ;;  %v8254_v54 = vmul.f32 %v8133_v8, %v8139_v5  ;;  %v2939_v26 = vmul.f32 %v8240_v59, %v8240_v59  ;;  %v2882_v5 = vadd.f32 %v2881_v32, %v8240_v59 }
 0x443   :  { %v8167_v10 = vpop.f32.mrf.mxu1 }
 0x444   :  { %v2951_v3 = vmul.f32 %v8254_v54, %v8254_v54  ;;  %v8278_v24 = vmul.f32 %v8146_v35, %v8167_v10  ;;  %v2896_v35 = vadd.f32 %v2895_v6, %v8254_v54 }
 0x465   :  { %v2704_v18 = vpop.f32.mrf.mxu1 }
 0x466   :  { %v8243_v37 = vmul.f32 %v8206_v33, %v2704_v18  ;;  %v2964_v18 = vadd.f32 %v2963_v9, %v2913_v27 }
 0x467   :  { %v2706_v56 = vpop.f32.mrf.mxu1 }
 0x468   :  { %v2916_v49 = vmul.f32 %v8243_v37, %v8243_v37 }
 0x469   :  { %v2709_v56 = vpop.f32.mrf.mxu1 }
 0x46a   :  { %v8265_v8 = vmul.f32 %v8206_v33, %v2709_v56  ;;  %v2967_v20 = vsel %vm1238_vm6, %v2916_v49, 0.0 }
 0x46b   :  { %v2711_v11 = vpop.f32.mrf.mxu1 }
 0x46c   :  { %v2938_v11 = vmul.f32 %v8222_v28, %v8222_v28  ;;  %9741 = vst [vmem:[#allocation27_spill] sm:$0xff] %v8265_v8  ;;  %v2870_v59 = vsel %vm1238_vm6, %v8265_v8, 0.0 }
 0x46d   :  { %v2714_v57 = vpop.f32.mrf.mxu1 }
 0x46e   :  { %v2993_v41 = vadd.f32 %v2992_v38, %v2938_v11  ;;  %v2855_v11 = vsel %vm1238_vm6, %v8243_v37, 0.0  ;;  %v8283_v38 = vmul.f32 %v8206_v33, %v2714_v57 }
 0x46f   :  { %v2716_v53 = vpop.f32.mrf.mxu1 }
 0x470   :  { %v2615_v13 = vpop.f32.mrf.mxu0 }
 0x471   :  { %v8258_v30 = vmul.f32 %v8195_v45, %v2615_v13  ;;  %v2719_v62 = vpop.f32.mrf.mxu1 }
 0x472   :  { %v2617_v34 = vpop.f32.mrf.mxu0 }
 0x473   :  { %v2853_v9 = vadd.f32 %v2852_v31, %v8258_v30  ;;  %v2914_v23 = vmul.f32 %v8258_v30, %v8258_v30  ;;  %v8272_v27 = vmul.f32 %v8248_v17, %v2617_v34  ;;  %v2721_v1 = vpop.f32.mrf.mxu1  ;;  %v2994_v34 = vadd.f32 %v2993_v41, %v2939_v26 }
 0x474   :  { %v2621_v56 = vpop.f32.mrf.mxu0  ;;  %v2929_v1 = vmul.f32 %v8265_v8, %v8265_v8  ;;  %v2952_v41 = vmul.f32 %v8278_v24, %v8278_v24 }
 0x475   :  { %v2965_v32 = vadd.f32 %v2964_v18, %v2914_v23  ;;  %v2854_v53 = vadd.f32 %v2853_v9, %v8272_v27  ;;  %v2915_v31 = vmul.f32 %v8272_v27, %v8272_v27  ;;  %v8289_v13 = vmul.f32 %v8195_v45, %v2621_v56 }
 0x476   :  { %v2623_v10 = vpop.f32.mrf.mxu0  ;;  %v3008_v56 = vadd.f32 %v3007_v2, %v2951_v3 }
 0x477   :  { %v2868_v57 = vadd.f32 %v2867_v55, %v8289_v13  ;;  %v2927_v18 = vmul.f32 %v8289_v13, %v8289_v13  ;;  %v8299_v9 = vmul.f32 %v8248_v17, %v2623_v10  ;;  %v2856_v23 = vadd.f32 %v2855_v11, %v2854_v53 }
 0x478   :  { %v2627_v6 = vpop.f32.mrf.mxu0  ;;  %v2966_v26 = vadd.f32 %v2965_v32, %v2915_v31  ;;  %v2942_v11 = vmul.f32 %v8283_v38, %v8283_v38  ;;  %v8314_v32 = vmul.f32 %v8206_v33, %v2719_v62  ;;  %v2982_v31 = vsel %vm1238_vm6, %v2929_v1, 0.0 }
 0x479   :  { %v2980_v46 = vadd.f32 %v2979_v0, %v2927_v18  ;;  %v2928_v55 = vmul.f32 %v8299_v9, %v8299_v9  ;;  %v8308_v49 = vmul.f32 %v8195_v45, %v2627_v6  ;;  %2857 = vadd.xlane.f32.xlu1 %v2856_v23  ;;  %v2869_v2 = vadd.f32 %v2868_v57, %v8299_v9 }
 0x47a   :  { %v2629_v3 = vpop.f32.mrf.mxu0  ;;  %v2968_v53 = vadd.f32 %v2967_v20, %v2966_v26  ;;  %v2897_v6 = vadd.f32 %v2896_v35, %v8278_v24  ;;  %v3009_v8 = vadd.f32 %v3008_v56, %v2952_v41  ;;  %v2885_v20 = vsel %vm1238_vm6, %v8283_v38, 0.0 }
 0x47b   :  { %v2883_v0 = vadd.f32 %v2882_v5, %v8308_v49  ;;  %v2940_v10 = vmul.f32 %v8308_v49, %v8308_v49  ;;  %v8321_v18 = vmul.f32 %v8248_v17, %v2629_v3  ;;  %v2981_v23 = vadd.f32 %v2980_v46, %v2928_v55 }
 0x47c   :  { %2969 = vadd.xlane.f32.xlu0 %v2968_v53  ;;  %v2633_v57 = vpop.f32.mrf.mxu0  ;;  %v2997_v1 = vsel %vm1238_vm6, %v2942_v11, 0.0  ;;  %v2955_v35 = vmul.f32 %v8314_v32, %v8314_v32  ;;  %v2871_v41 = vadd.f32 %v2870_v59, %v2869_v2 }
 0x47d   :  { %v2995_v33 = vadd.f32 %v2994_v34, %v2940_v10  ;;  %v2941_v62 = vmul.f32 %v8321_v18, %v8321_v18  ;;  %v8329_v5 = vmul.f32 %v8195_v45, %v2633_v57  ;;  %v2884_v26 = vadd.f32 %v2883_v0, %v8321_v18  ;;  %v8349_v57 = vld [vmem:[#allocation2 + $0x78] sm:$0xff] }
 0x47e   :  { %v2635_v46 = vpop.f32.mrf.mxu0  ;;  %v2983_v56 = vadd.f32 %v2982_v31, %v2981_v23  ;;  %v3012_v59 = vsel %vm1238_vm6, %v2955_v35, 0.0  ;;  %v2900_v23 = vsel %vm1238_vm6, %v8314_v32, 0.0  ;;  %v8367_v35 = vld [vmem:[#allocation2 + $0x170] sm:$0xff] }
 0x47f   :  { %v2898_v55 = vadd.f32 %v2897_v6, %v8329_v5  ;;  %v2953_v34 = vmul.f32 %v8329_v5, %v8329_v5  ;;  %v8339_v3 = vmul.f32 %v8248_v17, %v2635_v46  ;;  %v2996_v45 = vadd.f32 %v2995_v33, %v2941_v62  ;;  %v8351_v33 = vld [vmem:[#allocation2 + $0x1f8] sm:$0xff]  ;;  %v8365_v46 = vld [vmem:[#allocation2 + $0xe8] sm:$0xff]  ;;  %9744 = vst [vmem:[#allocation30_spill] sm:$0xff] %v8367_v35 }
 0x480   :  { %2984 = vadd.xlane.f32.xlu1 %v2983_v56  ;;  %2872 = vadd.xlane.f32.xlu0 %v2871_v41  ;;  %v2886_v31 = vadd.f32 %v2885_v20, %v2884_v26  ;;  %v8355_v20 = vld [vmem:[#allocation2 + $0xf0] sm:$0xff]  ;;  %v8357_v62 = vld [vmem:[#allocation2 + $0x178] sm:$0xff]  ;;  %9743 = vst [vmem:[#allocation29_spill] sm:$0xff] %v8365_v46  ;;  %v8371_v56 = vld [vmem:[#allocation2 + $0x68] sm:$0xff] }
 0x481   :  { %v3010_v11 = vadd.f32 %v3009_v8, %v2953_v34  ;;  %v2954_v53 = vmul.f32 %v8339_v3, %v8339_v3  ;;  %v2998_v0 = vadd.f32 %v2997_v1, %v2996_v45  ;;  %v2899_v10 = vadd.f32 %v2898_v55, %v8339_v3  ;;  %v8347_v8 = vld [vmem:[#allocation2 + $0xf8] sm:$0xff]  ;;  %5412 = vmatprep.subr.mxu1 %v8351_v33  ;;  %v8359_v1 = vld [vmem:[#allocation2 + $0x70] sm:$0xff]  ;;  %v8373_v41 = vld [vmem:[#allocation2 + $0x1e8] sm:$0xff] }
 0x482   :  { %5368 = vmatprep.subr.mxu0 %v8347_v8  ;;  %5413 = vmatpush3.msra.mxu1 %v8357_v62  ;;  %v8363_v26 = vld [vmem:[#allocation2 + $0x1f0] sm:$0xff]  ;;  %9745 = vst [vmem:[#allocation31_spill] sm:$0xff] %v8371_v56  ;;  %9746 = vst [vmem:[#allocation32_spill] sm:$0xff] %v8373_v41  ;;  %v8377_v55 = vld [vmem:[#allocation2 + $0xe0] sm:$0xff] }
 0x483   :  { %v3011_v2 = vadd.f32 %v3010_v11, %v2954_v53  ;;  %v2901_v6 = vadd.f32 %v2900_v23, %v2899_v10  ;;  %5369 = vmatpush3.msra.mxu0 %v8349_v57  ;;  %9742 = vst [vmem:[#allocation28_spill] sm:$0xff] %v8363_v26  ;;  %5414 = vmatprep.subr.mxu1 %v8363_v26  ;;  %9747 = vst [vmem:[#allocation33_spill] sm:$0xff] %v8377_v55  ;;  %v8379_v34 = vld [vmem:[#allocation2 + $0x168] sm:$0xff]  ;;  %v8381_v45 = vld [vmem:[#allocation2 + $0x1e0] sm:$0xff] }
 0x484   :  { %2999 = vadd.xlane.f32.xlu1 %v2998_v0  ;;  %2887 = vadd.xlane.f32.xlu0 %v2886_v31  ;;  %9748 = vst [vmem:[#allocation34_spill] sm:$0xff] %v8379_v34  ;;  %9749 = vst [vmem:[#allocation35_spill] sm:$0xff] %v8381_v45  ;;  %v8385_v11 = vld [vmem:[#allocation2 + $0x60] sm:$0xff]  ;;  %v8391_v0 = vld [vmem:[#allocation2 + $0xd8] sm:$0xff] }
 0x485   :  { %v3013_v17 = vadd.f32 %v3012_v59, %v3011_v2  ;;  %5370 = vmatprep.subr.mxu0 %v8355_v20  ;;  %5415 = vmatpush3.msra.mxu1 %v8367_v35  ;;  %9750 = vst [vmem:[#allocation36_spill] sm:$0xff] %v8385_v11  ;;  %v8387_v53 = vld [vmem:[#allocation2 + $0x160] sm:$0xff]  ;;  %9752 = vst [vmem:[#allocation38_spill] sm:$0xff] %v8391_v0  ;;  %v8393_v10 = vld [vmem:[#allocation2 + $0x1d8] sm:$0xff] }
 0x486   :  { %5371 = vmatpush3.msra.mxu0 %v8359_v1  ;;  %5416 = vmatprep.subr.mxu1 %v8373_v41  ;;  %9751 = vst [vmem:[#allocation37_spill] sm:$0xff] %v8387_v53  ;;  %9753 = vst [vmem:[#allocation39_spill] sm:$0xff] %v8393_v10  ;;  %v8397_v31 = vld [vmem:[#allocation2 + $0x58] sm:$0xff]  ;;  %v8403_v2 = vld [vmem:[#allocation2 + $0xd0] sm:$0xff] }
 0x487   :  { %5372 = vmatprep.subr.mxu0 %v8365_v46  ;;  %5417 = vmatpush3.msra.mxu1 %v8379_v34  ;;  %9754 = vst [vmem:[#allocation40_spill] sm:$0xff] %v8397_v31  ;;  %v8399_v59 = vld [vmem:[#allocation2 + $0x158] sm:$0xff]  ;;  %9756 = vst [vmem:[#allocation42_spill] sm:$0xff] %v8403_v2  ;;  %v8405_v23 = vld [vmem:[#allocation2 + $0x1d0] sm:$0xff] }
 0x488   :  { %3014 = vadd.xlane.f32.xlu1 %v3013_v17  ;;  %2902 = vadd.xlane.f32.xlu0 %v2901_v6  ;;  %9755 = vst [vmem:[#allocation41_spill] sm:$0xff] %v8399_v59  ;;  %9757 = vst [vmem:[#allocation43_spill] sm:$0xff] %v8405_v23  ;;  %v8409_v17 = vld [vmem:[#allocation2 + $0x50] sm:$0xff]  ;;  %v8417_v34 = vld [vmem:[#allocation2 + $0x1c8] sm:$0xff] }
 0x489   :  { %5373 = vmatpush3.msra.mxu0 %v8371_v56  ;;  %5418 = vmatprep.subr.mxu1 %v8381_v45  ;;  %9758 = vst [vmem:[#allocation44_spill] sm:$0xff] %v8409_v17  ;;  %v8411_v6 = vld [vmem:[#allocation2 + $0x150] sm:$0xff]  ;;  %v8415_v45 = vld [vmem:[#allocation2 + $0xc8] sm:$0xff]  ;;  %9761 = vst [vmem:[#allocation47_spill] sm:$0xff] %v8417_v34 }
 0x48a   :  { %5374 = vmatprep.subr.mxu0 %v8377_v55  ;;  %5419 = vmatpush3.msra.mxu1 %v8387_v53  ;;  %9759 = vst [vmem:[#allocation45_spill] sm:$0xff] %v8411_v6  ;;  %9760 = vst [vmem:[#allocation46_spill] sm:$0xff] %v8415_v45  ;;  %v8421_v53 = vld [vmem:[#allocation2 + $0x48] sm:$0xff]  ;;  %v8429_v35 = vld [vmem:[#allocation2 + $0x1c0] sm:$0xff] }
 0x48b   :  { %5375 = vmatpush3.msra.mxu0 %v8385_v11  ;;  %5420 = vmatprep.subr.mxu1 %v8393_v10  ;;  %9762 = vst [vmem:[#allocation48_spill] sm:$0xff] %v8421_v53  ;;  %v8423_v41 = vld [vmem:[#allocation2 + $0x148] sm:$0xff]  ;;  %v8427_v10 = vld [vmem:[#allocation2 + $0xc0] sm:$0xff]  ;;  %9765 = vst [vmem:[#allocation51_spill] sm:$0xff] %v8429_v35 }
 0x48c   :  { %5376 = vmatprep.subr.mxu0 %v8391_v0  ;;  %5421 = vmatpush3.msra.mxu1 %v8399_v59  ;;  %9763 = vst [vmem:[#allocation49_spill] sm:$0xff] %v8423_v41  ;;  %9764 = vst [vmem:[#allocation50_spill] sm:$0xff] %v8427_v10  ;;  %v8433_v59 = vld [vmem:[#allocation2 + $0x40] sm:$0xff] }
 0x48d   :  { %5377 = vmatpush3.msra.mxu0 %v8397_v31  ;;  %5422 = vmatprep.subr.mxu1 %v8405_v23  ;;  %9766 = vst [vmem:[#allocation52_spill] sm:$0xff] %v8433_v59  ;;  %v8439_v23 = vld [vmem:[#allocation2 + $0xb8] sm:$0xff] }
 0x48e   :  { %5378 = vmatprep.subr.mxu0 %v8403_v2  ;;  %5423 = vmatpush3.msra.mxu1 %v8411_v6  ;;  %v8435_v2 = vld [vmem:[#allocation2 + $0x140] sm:$0xff]  ;;  %9768 = vst [vmem:[#allocation54_spill] sm:$0xff] %v8439_v23  ;;  %v8445_v6 = vld [vmem:[#allocation2 + $0x38] sm:$0xff] }
 0x48f   :  { %5379 = vmatpush3.msra.mxu0 %v8409_v17  ;;  %5424 = vmatprep.subr.mxu1 %v8417_v34  ;;  %9767 = vst [vmem:[#allocation53_spill] sm:$0xff] %v8435_v2  ;;  %v8441_v17 = vld [vmem:[#allocation2 + $0x1b8] sm:$0xff]  ;;  %9770 = vst [vmem:[#allocation56_spill] sm:$0xff] %v8445_v6  ;;  %v8451_v34 = vld [vmem:[#allocation2 + $0xb0] sm:$0xff] }
 0x490   :  { %5380 = vmatprep.subr.mxu0 %v8415_v45  ;;  %5425 = vmatpush3.msra.mxu1 %v8423_v41  ;;  %9769 = vst [vmem:[#allocation55_spill] sm:$0xff] %v8441_v17  ;;  %v8447_v45 = vld [vmem:[#allocation2 + $0x138] sm:$0xff]  ;;  %9772 = vst [vmem:[#allocation58_spill] sm:$0xff] %v8451_v34  ;;  %v8457_v41 = vld [vmem:[#allocation2 + $0x30] sm:$0xff] }
 0x491   :  { %5381 = vmatpush3.msra.mxu0 %v8421_v53  ;;  %5426 = vmatprep.subr.mxu1 %v8429_v35  ;;  %9771 = vst [vmem:[#allocation57_spill] sm:$0xff] %v8447_v45  ;;  %v8453_v53 = vld [vmem:[#allocation2 + $0x1b0] sm:$0xff]  ;;  %9774 = vst [vmem:[#allocation60_spill] sm:$0xff] %v8457_v41  ;;  %v8463_v35 = vld [vmem:[#allocation2 + $0xa8] sm:$0xff] }
 0x492   :  { %5382 = vmatprep.subr.mxu0 %v8427_v10  ;;  %5427 = vmatpush3.msra.mxu1 %v8435_v2  ;;  %9773 = vst [vmem:[#allocation59_spill] sm:$0xff] %v8453_v53  ;;  %v8459_v10 = vld [vmem:[#allocation2 + $0x130] sm:$0xff]  ;;  %9776 = vst [vmem:[#allocation62_spill] sm:$0xff] %v8463_v35  ;;  %v8469_v2 = vld [vmem:[#allocation2 + $0x28] sm:$0xff] }
 0x493   :  { %5383 = vmatpush3.msra.mxu0 %v8433_v59  ;;  %5428 = vmatprep.subr.mxu1 %v8441_v17  ;;  %9775 = vst [vmem:[#allocation61_spill] sm:$0xff] %v8459_v10  ;;  %v8465_v59 = vld [vmem:[#allocation2 + $0x1a8] sm:$0xff]  ;;  %9778 = vst [vmem:[#allocation64_spill] sm:$0xff] %v8469_v2  ;;  %v8475_v17 = vld [vmem:[#allocation2 + $0xa0] sm:$0xff] }
 0x494   :  { %5384 = vmatprep.subr.mxu0 %v8439_v23  ;;  %5429 = vmatpush3.msra.mxu1 %v8447_v45  ;;  %9777 = vst [vmem:[#allocation63_spill] sm:$0xff] %v8465_v59  ;;  %v8471_v23 = vld [vmem:[#allocation2 + $0x128] sm:$0xff]  ;;  %9780 = vst [vmem:[#allocation66_spill] sm:$0xff] %v8475_v17  ;;  %v8481_v45 = vld [vmem:[#allocation2 + $0x20] sm:$0xff] }
 0x495   :  { %5385 = vmatpush3.msra.mxu0 %v8445_v6  ;;  %5430 = vmatprep.subr.mxu1 %v8453_v53  ;;  %9779 = vst [vmem:[#allocation65_spill] sm:$0xff] %v8471_v23  ;;  %v8477_v6 = vld [vmem:[#allocation2 + $0x1a0] sm:$0xff]  ;;  %9782 = vst [vmem:[#allocation68_spill] sm:$0xff] %v8481_v45 }
 0x496   :  { %5386 = vmatprep.subr.mxu0 %v8451_v34  ;;  %5431 = vmatpush3.msra.mxu1 %v8459_v10  ;;  %9781 = vst [vmem:[#allocation67_spill] sm:$0xff] %v8477_v6 }
 0x497   :  { %5387 = vmatpush3.msra.mxu0 %v8457_v41  ;;  %5432 = vmatprep.subr.mxu1 %v8465_v59 }
 0x498   :  { %5388 = vmatprep.subr.mxu0 %v8463_v35  ;;  %5433 = vmatpush3.msra.mxu1 %v8471_v23 }
 0x499   :  { %5389 = vmatpush3.msra.mxu0 %v8469_v2  ;;  %5434 = vmatprep.subr.mxu1 %v8477_v6 }
 0x49a   :  { %5390 = vmatprep.subr.mxu0 %v8475_v17 }
 0x49b   :  { %5391 = vmatpush3.msra.mxu0 %v8481_v45 }
 0x502   :  { %v2858_v10 = vpop.xlane.xlu1 %2857 }
 0x503   :  { %v3017_v53 = vmul.f32 0.00086805556, %v2858_v10 }
 0x505   :  { %v3025_v41 = vmul.f32 %v3017_v53, %v3017_v53  ;;  %v2970_v34 = vpop.xlane.xlu0 %2969 }
 0x506   :  { %v3021_v31 = vmul.f32 0.00086805556, %v2970_v34 }
 0x508   :  { %v3029_v35 = vsub.f32 %v3021_v31, %v3025_v41 }
 0x509   :  { %v2985_v0 = vpop.xlane.xlu1 %2984  ;;  %v2873_v59 = vpop.xlane.xlu0 %2872 }
 0x50a   :  { %v3033_v26 = vadd.f32 1e-05, %v3029_v35  ;;  %v8488_v11 = vmul.f32 0.00086805556, %v2873_v59  ;;  %v3022_v2 = vmul.f32 0.00086805556, %v2985_v0 }
 0x50c   :  { %5853 = vrsqrt.f32 %v3033_v26  ;;  %v3026_v23 = vmul.f32 %v8488_v11, %v8488_v11 }
 0x50d   :  { %v3000_v17 = vpop.xlane.xlu1 %2999  ;;  %v2888_v6 = vpop.xlane.xlu0 %2887 }
 0x50e   :  { %v3030_v55 = vsub.f32 %v3022_v2, %v3026_v23  ;;  %v8492_v45 = vmul.f32 0.00086805556, %v2888_v6  ;;  %v3023_v56 = vmul.f32 0.00086805556, %v3000_v17  ;;  %v8503_v23 = vld [vmem:[#allocation2 + $0x98] sm:$0xff]  ;;  %v8505_v17 = vld [vmem:[#allocation2 + $0x120] sm:$0xff] }
 0x50f   :  { %9783 = vst [vmem:[#allocation69_spill] sm:$0xff] %v8505_v17  ;;  %v8507_v6 = vld [vmem:[#allocation2 + $0x18] sm:$0xff]  ;;  %5392 = vmatprep.subr.mxu0 %v8503_v23  ;;  %5435 = vmatpush3.msra.mxu1 %v8505_v17  ;;  %v8534_v17 = vld [vmem:[#allocation2 + $0x8] sm:$0xff] }
 0x510   :  { %v3034_v10 = vadd.f32 1e-05, %v3030_v55  ;;  %v3027_v41 = vmul.f32 %v8492_v45, %v8492_v45  ;;  %v46_v55 = vld [vmem:[%s9616_s7 + $0x10] sm:$0xff]  ;;  %9784 = vst [vmem:[#allocation70_spill] sm:$0xff] %v8507_v6  ;;  %5393 = vmatpush3.msra.mxu0 %v8507_v6  ;;  %v8558_v6 = vld [vmem:[#allocation2 + $0x2f8] sm:$0xff] }
 0x511   :  { %v3015_v34 = vpop.xlane.xlu1 %3014  ;;  %v2903_v31 = vpop.xlane.xlu0 %2902  ;;  %9798 = vst [vmem:[#allocation84_spill] sm:$0xff] %v8558_v6 }
 0x512   :  { %5855 = vrsqrt.f32 %v3034_v10  ;;  %v3031_v35 = vsub.f32 %v3023_v56, %v3027_v41  ;;  %v8496_v59 = vmul.f32 0.00086805556, %v2903_v31  ;;  %v3024_v0 = vmul.f32 0.00086805556, %v3015_v34  ;;  %v8511_v10 = vld [vmem:[#allocation2 + $0x198] sm:$0xff]  ;;  %v8513_v41 = vld [vmem:[#allocation2 + $0x90] sm:$0xff] }
 0x513   :  { %9785 = vst [vmem:[#allocation71_spill] sm:$0xff] %v8511_v10  ;;  %9786 = vst [vmem:[#allocation72_spill] sm:$0xff] %v8513_v41  ;;  %5436 = vmatprep.subr.mxu1 %v8511_v10  ;;  %v8519_v31 = vld [vmem:[#allocation2 + $0x10] sm:$0xff]  ;;  %5394 = vmatprep.subr.mxu0 %v8513_v41  ;;  %v8541_v41 = vld [vmem:[#allocation2 + $0x108] sm:$0xff] }
 0x514   :  { %v3035_v26 = vadd.f32 1e-05, %v3031_v35  ;;  %v3028_v46 = vmul.f32 %v8496_v59, %v8496_v59  ;;  %9788 = vst [vmem:[#allocation74_spill] sm:$0xff] %v8519_v31  ;;  %v8521_v35 = vld [vmem:[#allocation2 + $0x190] sm:$0xff]  ;;  %5395 = vmatpush3.msra.mxu0 %v8519_v31  ;;  %9794 = vst [vmem:[#allocation80_spill] sm:$0xff] %v8541_v41  ;;  %v8550_v31 = vld [vmem:[#allocation2 + $0x180] sm:$0xff] }
 0x515   :  { %9789 = vst [vmem:[#allocation75_spill] sm:$0xff] %v8521_v35  ;;  %v8532_v10 = vld [vmem:[#allocation2 + $0x110] sm:$0xff]  ;;  %9796 = vst [vmem:[#allocation82_spill] sm:$0xff] %v8550_v31 }
 0x516   :  { %5857 = vrsqrt.f32 %v3035_v26  ;;  %v3032_v2 = vsub.f32 %v3024_v0, %v3028_v46  ;;  %v8515_v46 = vld [vmem:[#allocation2 + $0x118] sm:$0xff]  ;;  %v50_v0 = vld [vmem:[%s9616_s7 + $0x30] sm:$0xff]  ;;  %9791 = vst [vmem:[#allocation77_spill] sm:$0xff] %v8532_v10 }
 0x517   :  { %9787 = vst [vmem:[#allocation73_spill] sm:$0xff] %v8515_v46  ;;  %5437 = vmatpush3.msra.mxu1 %v8515_v46  ;;  %v8548_v46 = vld [vmem:[#allocation2] sm:$0xff] }
 0x518   :  { %v3036_v56 = vadd.f32 1e-05, %v3032_v2  ;;  %5438 = vmatprep.subr.mxu1 %v8521_v35  ;;  %v8530_v2 = vld [vmem:[#allocation2 + $0x88] sm:$0xff]  ;;  %v47_v35 = vld [vmem:[%s9616_s7 + $0x18] sm:$0xff]  ;;  %9795 = vst [vmem:[#allocation81_spill] sm:$0xff] %v8548_v46 }
 0x519   :  { %v5854_v34 = vpop.eup %5853  ;;  %9790 = vst [vmem:[#allocation76_spill] sm:$0xff] %v8530_v2  ;;  %5396 = vmatprep.subr.mxu0 %v8530_v2  ;;  %5439 = vmatpush3.msra.mxu1 %v8532_v10  ;;  %v8556_v2 = vld [vmem:[#allocation2 + $0x100] sm:$0xff] }
 0x51a   :  { %5859 = vrsqrt.f32 %v3036_v56  ;;  %v3041_v26 = vmul.f32 %v5854_v34, %v46_v55  ;;  %v8537_v56 = vld [vmem:[#allocation2 + $0x188] sm:$0xff]  ;;  %v8539_v34 = vld [vmem:[#allocation2 + $0x80] sm:$0xff]  ;;  %5397 = vmatpush3.msra.mxu0 %v8534_v17  ;;  %9797 = vst [vmem:[#allocation83_spill] sm:$0xff] %v8556_v2 }
 0x51b   :  { %9792 = vst [vmem:[#allocation78_spill] sm:$0xff] %v8537_v56  ;;  %9793 = vst [vmem:[#allocation79_spill] sm:$0xff] %v8539_v34  ;;  %5440 = vmatprep.subr.mxu1 %v8537_v56  ;;  %5398 = vmatprep.subr.mxu0 %v8539_v34 }
 0x51c   :  { %3055 = vperm.xlu0 %5791, %v3041_v26   ;;  %v3045_v55 = vmul.f32 %v3041_v26, %v3017_v53  ;;  %5441 = vmatpush3.msra.mxu1 %v8541_v41 }
 0x51d   :  { %5399 = vmatpush3.msra.mxu0 %v8548_v46  ;;  %5442 = vmatprep.subr.mxu1 %v8550_v31 }
 0x51e   :  { %v3049_v53 = vsub.f32 %v50_v0, %v3045_v55  ;;  %v51_v0 = vld [vmem:[%s9616_s7 + $0x38] sm:$0xff]  ;;  %v48_v55 = vld [vmem:[%s9616_s7 + $0x20] sm:$0xff]  ;;  %5443 = vmatpush3.msra.mxu1 %v8556_v2  ;;  %5456 = vmatprep.subr.mxu0 %v8558_v6 }
 0x51f   :  { %v5856_v26 = vpop.eup %5855 }
 0x520   :  { %v3042_v10 = vmul.f32 %v5856_v26, %v47_v35  ;;  %3127 = vperm.xlu1 %5792, %v3049_v53   ;;  %v52_v53 = vld [vmem:[%s9616_s7 + $0x40] sm:$0xff]  ;;  %v49_v26 = vld [vmem:[%s9616_s7 + $0x28] sm:$0xff] }
 0x522   :  { %v3046_v41 = vmul.f32 %v3042_v10, %v8488_v11  ;;  %v53_v11 = vld [vmem:[%s9616_s7 + $0x48] sm:$0xff] }
 0x523   :  { %v5858_v56 = vpop.eup %5857 }
 0x524   :  { %v3050_v46 = vsub.f32 %v51_v0, %v3046_v41  ;;  %v3043_v35 = vmul.f32 %v5858_v56, %v48_v55  ;;  %3060 = vperm.xlu1 %5792, %v3042_v10   ;;  %v8581_v56 = vld [vmem:[#allocation2 + $0x308] sm:$0xff] }
 0x525   :  { %5745 = vmatprep.subr.mxu1 %v8581_v56 }
 0x526   :  { %v3047_v31 = vmul.f32 %v3043_v35, %v8492_v45  ;;  %3132 = vperm.xlu0 %5791, %v3050_v46  }
 0x527   :  { %v5860_v2 = vpop.eup %5859 }
 0x528   :  { %v3051_v34 = vsub.f32 %v52_v53, %v3047_v31  ;;  %v3044_v6 = vmul.f32 %v5860_v2, %v49_v26  ;;  %3065 = vperm.xlu1 %5792, %v3043_v35  }
 0x52a   :  { %v3048_v10 = vmul.f32 %v3044_v6, %v8496_v59  ;;  %3137 = vperm.xlu0 %5791, %v3051_v34  }
 0x52c   :  { %v3052_v41 = vsub.f32 %v53_v11, %v3048_v10  ;;  %3070 = vperm.xlu1 %5792, %v3044_v6  }
 0x52e   :  { %3142 = vperm.xlu0 %5791, %v3052_v41  }
 0x597   :  { %v8584_v45 = vpop.permute.xlu0 %3055 }
 0x598   :  { %v3074_v46 = vmul.f32 %v8584_v45, %v7976_v51  ;;  %v3076_v31 = vmul.f32 %v8584_v45, %v8032_v39  ;;  %v3073_v2 = vmul.f32 %v8584_v45, %v7974_v44  ;;  %v3075_v59 = vmul.f32 %v8584_v45, %v8000_v60 }
 0x599   :  { %v3080_v6 = vmul.f32 %v8584_v45, %v8155_v16  ;;  %v3081_v34 = vmul.f32 %v8584_v45, %v8175_v58  ;;  %v3079_v51 = vmul.f32 %v8584_v45, %v8119_v14  ;;  %v3084_v39 = vmul.f32 %v8584_v45, %v8272_v27 }
 0x59a   :  { %v8606_v44 = vmul.f32 %v8584_v45, %v8243_v37  ;;  %v8610_v60 = vmul.f32 %v8584_v45, %v8094_v36  ;;  %v8620_v37 = vmul.f32 %v8584_v45, %v8211_v19  ;;  %v8624_v36 = vmul.f32 %v8584_v45, %v8258_v30  ;;  %v8636_v30 = vld [vmem:[#allocation2 + $0x2f0] sm:$0xff] }
 0x59b   :  { %v8598_v0 = vpop.permute.xlu1 %3127 }
 0x59c   :  { %v3146_v16 = vadd.f32 %v8598_v0, %v3074_v46  ;;  %v3148_v58 = vadd.f32 %v8598_v0, %v3076_v31  ;;  %v3145_v55 = vadd.f32 %v8598_v0, %v3073_v2  ;;  %v3147_v35 = vadd.f32 %v8598_v0, %v3075_v59  ;;  %v8628_v46 = vld [vmem:[#allocation2 + $0x278] sm:$0xff] }
 0x59d   :  { %v3152_v14 = vadd.f32 %v8598_v0, %v3080_v6  ;;  %v3153_v27 = vadd.f32 %v8598_v0, %v3081_v34  ;;  %v8631_v59 = vadd.f32 %v8598_v0, %v3079_v51  ;;  %v8634_v19 = vadd.f32 %v8598_v0, %v3084_v39  ;;  %v8646_v39 = vld [vmem:[#allocation2 + $0x270] sm:$0xff] }
 0x59e   :  { %v3198_v53 = vmax.f32 %v3146_v16, 0.0  ;;  %v3200_v26 = vmax.f32 %v3148_v58, 0.0  ;;  %v3197_v11 = vmax.f32 %v3145_v55, 0.0  ;;  %v3199_v10 = vmax.f32 %v3147_v35, 0.0 }
 0x59f   :  { %v8626_v41 = vpop.permute.xlu1 %3060  ;;  %v3204_v31 = vmax.f32 %v3152_v14, 0.0  ;;  %v3205_v2 = vmax.f32 %v3153_v27, 0.0 }
 0x5a0   :  { %3423 = vmatprep.mubr.f32.mxu0 %v3198_v53  ;;  %3508 = vmatprep.mubr.f32.mxu1 %v3200_v26  ;;  %v3087_v6 = vmul.f32 %v8626_v41, %v7984_v63  ;;  %v3089_v34 = vmul.f32 %v8626_v41, %v8040_v12  ;;  %v3086_v16 = vmul.f32 %v8626_v41, %v7982_v48  ;;  %v8653_v63 = vld [vmem:[#allocation2 + $0x2e8] sm:$0xff]  ;;  %v8660_v53 = vld [vmem:[#allocation2 + $0x300] sm:$0xff] }
 0x5a1   :  { %3424 = vmatmul.mubr.f32.vlgmr.msra.gmra.mxu0 %v3197_v11  ;;  %3509 = vmatmul.mubr.f32.vlgmr.msra.gmra.mxu1 %v3199_v10  ;;  %v8644_v51 = vpop.permute.xlu0 %3132  ;;  %v5793_v58 = vpack.i.bf16 %v3205_v2, %v3204_v31  ;;  %v3088_v55 = vmul.f32 %v8626_v41, %v8010_v40  ;;  %v3093_v35 = vmul.f32 %v8626_v41, %v8160_v47  ;;  %v8666_v40 = vld [vmem:[#allocation2 + $0x268] sm:$0xff]  ;;  %v9712_v10 = vmax.f32 %v8631_v59, 0.0 }
 0x5a2   :  { %5457 = vmatpush3.msra.mxu0 %v8628_v46  ;;  %v3159_v12 = vadd.f32 %v8644_v51, %v3087_v6  ;;  %v3161_v48 = vadd.f32 %v8644_v51, %v3089_v34  ;;  %v3158_v14 = vadd.f32 %v8644_v51, %v3086_v16  ;;  %v3092_v27 = vmul.f32 %v8626_v41, %v8129_v43  ;;  %v8674_v6 = vld [vmem:[#allocation2 + $0x2e0] sm:$0xff] }
 0x5a3   :  { %5794 = vrot.lane.b32.xlu1 %v5793_v58, %s5926_s20  ;;  %5458 = vmatprep.subr.mxu0 %v8636_v30  ;;  %v8664_v47 = vpop.permute.xlu1 %3065  ;;  %9799 = vst [vmem:[#allocation85_spill] sm:$0xff] %v8666_v40  ;;  %v3160_v26 = vadd.f32 %v8644_v51, %v3088_v55  ;;  %v3165_v11 = vadd.f32 %v8644_v51, %v3093_v35  ;;  %9800 = vst [vmem:[#allocation86_spill] sm:$0xff] %v8674_v6 }
 0x5a4   :  { %v3094_v43 = vmul.f32 %v8626_v41, %v8180_v50  ;;  %5459 = vmatpush3.msra.mxu0 %v8646_v39  ;;  %v3211_v31 = vmax.f32 %v3159_v12, 0.0  ;;  %v3213_v2 = vmax.f32 %v3161_v48, 0.0  ;;  %v3210_v34 = vmax.f32 %v3158_v14, 0.0  ;;  %5746 = vmatpush3.msra.mxu1 %v8581_v56  ;;  %v8688_v48 = vld [vmem:[#allocation2 + $0x260] sm:$0xff] }
 0x5a5   :  { %v8677_v16 = vadd.f32 %v8644_v51, %v3092_v27  ;;  %5460 = vmatprep.subr.mxu0 %v8653_v63  ;;  %v8681_v58 = vpop.permute.xlu0 %3137  ;;  %v3212_v55 = vmax.f32 %v3160_v26, 0.0  ;;  %v3217_v35 = vmax.f32 %v3165_v11, 0.0  ;;  %v3100_v12 = vmul.f32 %v8664_v47, %v7988_v22  ;;  %5747 = vmatprep.subr.mxu1 %v8660_v53 }
 0x5a6   :  { %v3166_v50 = vadd.f32 %v8644_v51, %v3094_v43  ;;  %5461 = vmatpush3.msra.mxu0 %v8666_v40  ;;  %3428 = vmatprep.mubr.f32.mxu0 %v3211_v31  ;;  %v3102_v27 = vmul.f32 %v8664_v47, %v8051_v61  ;;  %v3099_v26 = vmul.f32 %v8664_v47, %v7986_v52  ;;  %v8700_v43 = vld [vmem:[#allocation2 + $0x2d8] sm:$0xff] }
 0x5a7   :  { %v3101_v11 = vmul.f32 %v8664_v47, %v8028_v7  ;;  %3513 = vmatprep.mubr.f32.mxu1 %v3213_v2  ;;  %5462 = vmatprep.subr.mxu0 %v8674_v6  ;;  %v8698_v22 = vpop.permute.xlu1 %3070  ;;  %v5798_v31 = vpack.i.bf16 %v3217_v35, %v9712_v10  ;;  %v3172_v40 = vadd.f32 %v8681_v58, %v3100_v12  ;;  %v8707_v52 = vld [vmem:[#allocation2 + $0x258] sm:$0xff]  ;;  %v9801_v35 = vmax.f32 %v8677_v16, 0.0 }
 0x5a8   :  { %v3218_v14 = vmax.f32 %v3166_v50, 0.0  ;;  %v3095_v61 = vmul.f32 %v8626_v41, %v8217_v21  ;;  %3429 = vmatmul.mubr.f32.gmra.mxu0 %v3210_v34  ;;  %3514 = vmatmul.mubr.f32.gmra.mxu1 %v3212_v55  ;;  %v3174_v7 = vadd.f32 %v8681_v58, %v3102_v27  ;;  %v3171_v2 = vadd.f32 %v8681_v58, %v3099_v26  ;;  %v8722_v26 = vld [vmem:[#allocation2 + $0x2d0] sm:$0xff] }
 0x5a9   :  { %v3173_v6 = vadd.f32 %v8681_v58, %v3101_v11  ;;  %5463 = vmatpush3.msra.mxu0 %v8688_v48  ;;  %5799 = vrot.lane.b32.xlu0 %v5798_v31, %s5926_s20  ;;  %v8716_v12 = vpop.permute.xlu0 %3142  ;;  %v3224_v21 = vmax.f32 %v3172_v40, 0.0  ;;  %v3157_v55 = vadd.f32 %v8598_v0, %v8606_v44  ;;  %v3113_v31 = vmul.f32 %v8698_v22, %v7994_v4  ;;  %v8729_v40 = vld [vmem:[#allocation2 + $0x250] sm:$0xff]  ;;  %v8736_v4 = vld [vmem:[#allocation2 + $0x2c8] sm:$0xff] }
 0x5aa   :  { %v5803_v50 = vpack.i.bf16 %v9801_v35, %v3218_v14  ;;  %v3167_v34 = vadd.f32 %v8644_v51, %v3095_v61  ;;  %5464 = vmatprep.subr.mxu0 %v8700_v43  ;;  %v3226_v27 = vmax.f32 %v3174_v7, 0.0  ;;  %v3223_v11 = vmax.f32 %v3171_v2, 0.0  ;;  %5748 = vmatpush3.msra.mxu1 %v8660_v53  ;;  %v9802_v2 = vld [vmem:[#allocation16_spill] sm:$0xff] }
 0x5ab   :  { %v3225_v10 = vmax.f32 %v3173_v6, 0.0  ;;  %5465 = vmatpush3.msra.mxu0 %v8707_v52  ;;  %v3208_v44 = vmax.f32 %v8634_v19, 0.0  ;;  %v3115_v61 = vmul.f32 %v8698_v22, %v8061_v29  ;;  %v3112_v6 = vmul.f32 %v8698_v22, %v7992_v15  ;;  %3433 = vmatprep.mubr.f32.mxu0 %v3224_v21 }
 0x5ac   :  { %5804 = vrot.lane.b32.xlu1 %v5803_v50, %s5926_s20  ;;  %v3219_v14 = vmax.f32 %v3167_v34, 0.0  ;;  %3518 = vmatprep.mubr.f32.mxu1 %v3226_v27  ;;  %v3185_v7 = vadd.f32 %v8716_v12, %v3113_v31  ;;  %v3114_v35 = vmul.f32 %v8698_v22, %v9802_v2  ;;  %v3106_v50 = vmul.f32 %v8664_v47, %v8191_v42  ;;  %v8744_v34 = vld [vmem:[#allocation2 + $0x248] sm:$0xff] }
 0x5ad   :  { %5466 = vmatprep.subr.mxu0 %v8722_v26  ;;  %3434 = vmatmul.mubr.f32.gmra.mxu0 %v3223_v11  ;;  %v3209_v29 = vmax.f32 %v3157_v55, 0.0  ;;  %v3187_v15 = vadd.f32 %v8716_v12, %v3115_v61  ;;  %v3184_v21 = vadd.f32 %v8716_v12, %v3112_v6  ;;  %v3107_v42 = vmul.f32 %v8664_v47, %v8222_v28  ;;  %v8755_v11 = vld [vmem:[#allocation2 + $0x2c0] sm:$0xff] }
 0x5ae   :  { %v5808_v19 = vpack.i.bf16 %v3219_v14, %v3208_v44  ;;  %3519 = vmatmul.mubr.f32.gmra.mxu1 %v3225_v10  ;;  %5467 = vmatpush3.msra.mxu0 %v8729_v40  ;;  %v3237_v27 = vmax.f32 %v3185_v7, 0.0  ;;  %v3186_v31 = vadd.f32 %v8716_v12, %v3114_v35  ;;  %v3178_v2 = vadd.f32 %v8681_v58, %v3106_v50  ;;  %v9803_v14 = vld [vmem:[#allocation24_spill] sm:$0xff]  ;;  %v8763_v6 = vld [vmem:[#allocation2 + $0x240] sm:$0xff] }
 0x5af   :  { %5468 = vmatprep.subr.mxu0 %v8736_v4  ;;  %v3239_v55 = vmax.f32 %v3187_v15, 0.0  ;;  %v3236_v44 = vmax.f32 %v3184_v21, 0.0  ;;  %v3105_v10 = vmul.f32 %v8664_v47, %v9803_v14  ;;  %v3119_v61 = vmul.f32 %v8698_v22, %v8202_v25  ;;  %5550 = vmatprep.subr.mxu1 %v8351_v33  ;;  %v8871_v33 = vld [vmem:[#allocation2 + $0x280] sm:$0xff] }
 0x5b0   :  { %5809 = vrot.lane.b32.xlu0 %v5808_v19, %s5926_s20  ;;  %3735 = vrot.lane.b32.xlu1 %v3209_v29, %s5926_s20  ;;  %v3238_v28 = vmax.f32 %v3186_v31, 0.0  ;;  %v3179_v7 = vadd.f32 %v8681_v58, %v3107_v42  ;;  %v3230_v35 = vmax.f32 %v3178_v2, 0.0  ;;  %v3150_v50 = vadd.f32 %v8598_v0, %v8610_v60  ;;  %v8768_v19 = vld [vmem:[#allocation2 + $0x2b8] sm:$0xff] }
 0x5b1   :  { %5469 = vmatpush3.msra.mxu0 %v8744_v34  ;;  %3438 = vmatprep.mubr.f32.mxu0 %v3237_v27  ;;  %v3177_v15 = vadd.f32 %v8681_v58, %v3105_v10  ;;  %v3191_v25 = vadd.f32 %v8716_v12, %v3119_v61  ;;  %v3120_v29 = vmul.f32 %v8698_v22, %v8254_v54  ;;  %v8775_v42 = vld [vmem:[#allocation2 + $0x238] sm:$0xff]  ;;  %v8782_v10 = vld [vmem:[#allocation2 + $0x2b0] sm:$0xff] }
 0x5b2   :  { %3523 = vmatprep.mubr.f32.mxu1 %v3239_v55  ;;  %5470 = vmatprep.subr.mxu0 %v8755_v11  ;;  %v3231_v21 = vmax.f32 %v3179_v7, 0.0  ;;  %v3202_v31 = vmax.f32 %v3150_v50, 0.0  ;;  %v3154_v60 = vadd.f32 %v8598_v0, %v8620_v37  ;;  %v9804_v27 = vld [vmem:[#allocation25_spill] sm:$0xff]  ;;  %v8788_v37 = vld [vmem:[#allocation2 + $0x230] sm:$0xff]  ;;  %v3096_v50 = vmul.f32 %v8626_v41, %v8289_v13  ;;  %v8803_v13 = vld [vmem:[#allocation2 + $0x228] sm:$0xff] }
 0x5b3   :  { %3439 = vmatmul.mubr.f32.gmra.mxu0 %v3236_v44  ;;  %v3118_v2 = vmul.f32 %v8698_v22, %v9804_v27  ;;  %3524 = vmatmul.mubr.f32.gmra.mxu1 %v3238_v28  ;;  %v3229_v55 = vmax.f32 %v3177_v15, 0.0  ;;  %v3243_v14 = vmax.f32 %v3191_v25, 0.0  ;;  %v3192_v54 = vadd.f32 %v8716_v12, %v3120_v29 }
 0x5b4   :  { %5471 = vmatpush3.msra.mxu0 %v8763_v6  ;;  %v3155_v44 = vadd.f32 %v8598_v0, %v8624_v36  ;;  %v5813_v61 = vpack.i.bf16 %v3231_v21, %v3230_v35  ;;  %3593 = vmatprep.mubr.f32.mxu0 %v3202_v31  ;;  %v3206_v7 = vmax.f32 %v3154_v60, 0.0  ;;  %v9805_v25 = vmax.f32 %v8631_v59, 0.0  ;;  %v8797_v36 = vld [vmem:[#allocation2 + $0x2a8] sm:$0xff] }
 0x5b5   :  { %5472 = vmatprep.subr.mxu0 %v8768_v19  ;;  %v3190_v28 = vadd.f32 %v8716_v12, %v3118_v2  ;;  %v5818_v15 = vpack.i.bf16 %v3243_v14, %v3229_v55  ;;  %v3244_v29 = vmax.f32 %v3192_v54, 0.0  ;;  %v3097_v21 = vmul.f32 %v8626_v41, %v8299_v9  ;;  %v9806_v60 = vld [vmem:[#allocation27_spill] sm:$0xff]  ;;  %v9807_v2 = vld [vmem:[#allocation26_spill] sm:$0xff] }
 0x5b6   :  { %5749 = vmatprep.mubr.msk.f32.mxu1 %vm2091_vm1, %v9805_v25  ;;  %5473 = vmatpush3.msra.mxu0 %v8775_v42  ;;  %v3207_v35 = vmax.f32 %v3155_v44, 0.0  ;;  %v3168_v59 = vadd.f32 %v8644_v51, %v3096_v50  ;;  %v3098_v27 = vmul.f32 %v8626_v41, %v9806_v60  ;;  %v3108_v14 = vmul.f32 %v8664_v47, %v9807_v2  ;;  %v8812_v54 = vld [vmem:[#allocation2 + $0x2a0] sm:$0xff]  ;;  %v8842_v2 = vld [vmem:[#allocation2 + $0x290] sm:$0xff] }
 0x5b7   :  { %5814 = vrot.lane.b32.xlu0 %v5813_v61, %s5926_s20  ;;  %5474 = vmatprep.subr.mxu0 %v8782_v10  ;;  %v3242_v31 = vmax.f32 %v3190_v28, 0.0  ;;  %v5823_v9 = vpack.i.bf16 %v3206_v7, %v3244_v29  ;;  %v3169_v44 = vadd.f32 %v8644_v51, %v3097_v21  ;;  %v3109_v61 = vmul.f32 %v8664_v47, %v8308_v49  ;;  %v8821_v25 = vld [vmem:[#allocation2 + $0x220] sm:$0xff]  ;;  %v8827_v29 = vld [vmem:[#allocation2 + $0x298] sm:$0xff] }
 0x5b8   :  { %5819 = vrot.lane.b32.xlu1 %v5818_v15, %s5926_s20  ;;  %5475 = vmatpush3.msra.mxu0 %v8788_v37  ;;  %v9808_v28 = vmax.f32 %v8677_v16, 0.0  ;;  %v3220_v15 = vmax.f32 %v3168_v59, 0.0  ;;  %v3170_v60 = vadd.f32 %v8644_v51, %v3098_v27  ;;  %v3180_v7 = vadd.f32 %v8681_v58, %v3108_v14  ;;  %v8836_v59 = vld [vmem:[#allocation2 + $0x218] sm:$0xff] }
 0x5b9   :  { %5476 = vmatprep.subr.mxu0 %v8797_v36  ;;  %v5833_v50 = vpack.i.bf16 %v3242_v31, %v3207_v35  ;;  %v3221_v49 = vmax.f32 %v3169_v44, 0.0  ;;  %v3181_v16 = vadd.f32 %v8681_v58, %v3109_v61  ;;  %v3110_v21 = vmul.f32 %v8664_v47, %v8321_v18 }
 0x5ba   :  { %5750 = vmatmul.mubr.msk.f32.vlgmr.msra.gmra.mxu1 %vm2091_vm1, %v9808_v28  ;;  %5477 = vmatpush3.msra.mxu0 %v8803_v13  ;;  %v3121_v35 = vmul.f32 %v8698_v22, %v8278_v24  ;;  %v3122_v27 = vmul.f32 %v8698_v22, %v8329_v5  ;;  %v8850_v5 = vld [vmem:[#allocation2 + $0x210] sm:$0xff]  ;;  %v3123_v61 = vmul.f32 %v8698_v22, %v8339_v3  ;;  %v9809_v28 = vld [vmem:[#allocation17_spill] sm:$0xff] }
 0x5bb   :  { %5752 = vmatprep.mubr.msk.f32.mxu1 %vm2091_vm1, %v3229_v55  ;;  %5824 = vrot.lane.b32.xlu0 %v5823_v9, %s5926_s20  ;;  %v3232_v55 = vmax.f32 %v3180_v7, 0.0  ;;  %v3233_v18 = vmax.f32 %v3181_v16, 0.0  ;;  %v3182_v14 = vadd.f32 %v8681_v58, %v3110_v21  ;;  %v3111_v9 = vmul.f32 %v8664_v47, %v8283_v38  ;;  %v8857_v16 = vld [vmem:[#allocation2 + $0x288] sm:$0xff] }
 0x5bc   :  { %5478 = vmatprep.subr.mxu0 %v8812_v54  ;;  %5834 = vrot.lane.b32.xlu1 %v5833_v50, %s5926_s20  ;;  %v3193_v24 = vadd.f32 %v8716_v12, %v3121_v35  ;;  %v5828_v44 = vpack.i.bf16 %v3221_v49, %v3220_v15  ;;  %v3077_v50 = vmul.f32 %v8584_v45, %v9809_v28  ;;  %v3222_v7 = vmax.f32 %v3170_v60, 0.0  ;;  %v9810_v15 = vld [vmem:[#allocation21_spill] sm:$0xff] }
 0x5bd   :  { %5479 = vmatpush3.msra.mxu0 %v8821_v25  ;;  %v3194_v38 = vadd.f32 %v8716_v12, %v3122_v27  ;;  %v3195_v3 = vadd.f32 %v8716_v12, %v3123_v61  ;;  %v3091_v60 = vmul.f32 %v8626_v41, %v9810_v15  ;;  %v5838_v49 = vpack.i.bf16 %v3233_v18, %v3232_v55  ;;  %v8877_v61 = vld [vmem:[#allocation2 + $0x200] sm:$0xff]  ;;  %v9813_v15 = vld [vmem:[#allocation19_spill] sm:$0xff] }
 0x5be   :  { %5753 = vmatmul.mubr.msk.f32.gmra.mxu1 %vm2091_vm1, %v3242_v31  ;;  %5480 = vmatprep.subr.mxu0 %v8827_v29  ;;  %v3245_v21 = vmax.f32 %v3193_v24, 0.0  ;;  %v8863_v31 = vld [vmem:[#allocation2 + $0x208] sm:$0xff]  ;;  %v3149_v45 = vadd.f32 %v8598_v0, %v3077_v50  ;;  %v3234_v35 = vmax.f32 %v3182_v14, 0.0  ;;  %v3183_v27 = vadd.f32 %v8681_v58, %v3111_v9 }
 0x5bf   :  { %5481 = vmatpush3.msra.mxu0 %v8836_v59  ;;  %5829 = vrot.lane.b32.xlu0 %v5828_v44, %s5926_s20  ;;  %v9811_v24 = vld [vmem:[#allocation18_spill] sm:$0xff]  ;;  %v3163_v0 = vadd.f32 %v8644_v51, %v3091_v60  ;;  %v3124_v28 = vmul.f32 %v8698_v22, %v8314_v32  ;;  %v3246_v14 = vmax.f32 %v3194_v38, 0.0  ;;  %v3247_v9 = vmax.f32 %v3195_v3, 0.0  ;;  %v9814_v60 = vld [vmem:[#allocation23_spill] sm:$0xff] }
 0x5c0   :  { %5482 = vmatprep.subr.mxu0 %v8842_v2  ;;  %3749 = vrot.lane.b32.xlu1 %v3222_v7, %s5926_s20  ;;  %v3090_v44 = vmul.f32 %v8626_v41, %v9811_v24  ;;  %v9812_v50 = vld [vmem:[#allocation22_spill] sm:$0xff]  ;;  %v5843_v18 = vpack.i.bf16 %v3245_v21, %v3234_v35  ;;  %v3201_v41 = vmax.f32 %v3149_v45, 0.0  ;;  %v3103_v32 = vmul.f32 %v8664_v47, %v9813_v15  ;;  %v9815_v35 = vld [vmem:[#allocation20_spill] sm:$0xff] }
 0x5c1   :  { %5483 = vmatpush3.msra.mxu0 %v8850_v5  ;;  %v3104_v55 = vmul.f32 %v8664_v47, %v9812_v50  ;;  %5551 = vmatpush3.msra.mxu1 %v8357_v62  ;;  %v3215_v62 = vmax.f32 %v3163_v0, 0.0  ;;  %v3117_v38 = vmul.f32 %v8698_v22, %v9814_v60  ;;  %v3235_v3 = vmax.f32 %v3183_v27, 0.0  ;;  %v9817_v0 = vld [vmem:[#allocation31_spill] sm:$0xff]  ;;  %v9819_v50 = vld [vmem:[#allocation36_spill] sm:$0xff]  ;;  %v9827_v15 = vld [vmem:[#allocation46_spill] sm:$0xff] }
 0x5c2   :  { %5484 = vmatprep.subr.mxu0 %v8857_v16  ;;  %v3162_v7 = vadd.f32 %v8644_v51, %v3090_v44  ;;  %v5848_v51 = vpack.i.bf16 %v3247_v9, %v3246_v14  ;;  %v3175_v45 = vadd.f32 %v8681_v58, %v3103_v32  ;;  %v3116_v24 = vmul.f32 %v8698_v22, %v9815_v35  ;;  %v9823_v9 = vld [vmem:[#allocation42_spill] sm:$0xff]  ;;  %v9828_v32 = vld [vmem:[#allocation48_spill] sm:$0xff]  ;;  %v9831_v60 = vld [vmem:[#allocation35_spill] sm:$0xff] }
 0x5c3   :  { %5485 = vmatpush3.msra.mxu0 %v8863_v31  ;;  %5839 = vrot.lane.b32.xlu0 %v5838_v49, %s5926_s20  ;;  %v3176_v21 = vadd.f32 %v8681_v58, %v3104_v55  ;;  %v3196_v49 = vadd.f32 %v8716_v12, %v3124_v28  ;;  %v3189_v44 = vadd.f32 %v8716_v12, %v3117_v38  ;;  %v9820_v55 = vld [vmem:[#allocation28_spill] sm:$0xff]  ;;  %v9838_v35 = vld [vmem:[#allocation58_spill] sm:$0xff] }
 0x5c4   :  { %5486 = vmatprep.subr.mxu0 %v8871_v33  ;;  %5844 = vrot.lane.b32.xlu1 %v5843_v18, %s5926_s20  ;;  %v3214_v47 = vmax.f32 %v3162_v7, 0.0  ;;  %v3227_v58 = vmax.f32 %v3175_v45, 0.0  ;;  %v3188_v22 = vadd.f32 %v8716_v12, %v3116_v24  ;;  %v9822_v18 = vld [vmem:[#allocation40_spill] sm:$0xff]  ;;  %v9837_v45 = vld [vmem:[#allocation41_spill] sm:$0xff]  ;;  %v9839_v24 = vld [vmem:[#allocation43_spill] sm:$0xff] }
 0x5c5   :  { %5487 = vmatpush3.msra.mxu0 %v8877_v61  ;;  %v3228_v27 = vmax.f32 %v3176_v21, 0.0  ;;  %v3241_v28 = vmax.f32 %v3189_v44, 0.0  ;;  %5552 = vmatprep.subr.mxu1 %v9820_v55  ;;  %v9825_v7 = vld [vmem:[#allocation44_spill] sm:$0xff]  ;;  %v9830_v21 = vld [vmem:[#allocation50_spill] sm:$0xff]  ;;  %v9841_v44 = vld [vmem:[#allocation45_spill] sm:$0xff] }
 0x5c6   :  { %3594 = vmatmul.mubr.f32.vlgmr.msra.gmra.mxu0 %v3201_v41  ;;  %5506 = vmatprep.subr.mxu0 %v8347_v8  ;;  %v3248_v8 = vmax.f32 %v3196_v49, 0.0  ;;  %v3240_v14 = vmax.f32 %v3188_v22, 0.0  ;;  %v9824_v41 = vld [vmem:[#allocation30_spill] sm:$0xff]  ;;  %v9826_v12 = vld [vmem:[#allocation32_spill] sm:$0xff]  ;;  %v9850_v55 = vld [vmem:[#allocation55_spill] sm:$0xff] }
 0x5c7   :  { %3598 = vmatprep.mubr.f32.mxu0 %v3215_v62  ;;  %5507 = vmatpush3.msra.mxu0 %v8349_v57  ;;  %v9816_v57 = vld [vmem:[#allocation29_spill] sm:$0xff]  ;;  %v9829_v62 = vld [vmem:[#allocation34_spill] sm:$0xff]  ;;  %v9832_v38 = vld [vmem:[#allocation52_spill] sm:$0xff] }
 0x5c8   :  { %3763 = vrot.lane.b32.xlu0 %v3235_v3, %s5926_s20  ;;  %5508 = vmatprep.subr.mxu0 %v8355_v20  ;;  %v9818_v20 = vld [vmem:[#allocation33_spill] sm:$0xff]  ;;  %v9834_v49 = vld [vmem:[#allocation54_spill] sm:$0xff] }
 0x5c9   :  { %5849 = vrot.lane.b32.xlu1 %v5848_v51, %s5926_s20  ;;  %5509 = vmatpush3.msra.mxu0 %v8359_v1  ;;  %v9821_v1 = vld [vmem:[#allocation38_spill] sm:$0xff]  ;;  %v9833_v3 = vld [vmem:[#allocation37_spill] sm:$0xff]  ;;  %v9835_v51 = vld [vmem:[#allocation39_spill] sm:$0xff] }
 0x5ca   :  { %3599 = vmatmul.mubr.f32.gmra.mxu0 %v3214_v47  ;;  %5510 = vmatprep.subr.mxu0 %v9816_v57  ;;  %v9836_v47 = vld [vmem:[#allocation56_spill] sm:$0xff]  ;;  %v9843_v57 = vld [vmem:[#allocation47_spill] sm:$0xff]  ;;  %v9846_v22 = vld [vmem:[#allocation66_spill] sm:$0xff] }
 0x5cb   :  { %3603 = vmatprep.mubr.f32.mxu0 %v3228_v27  ;;  %5511 = vmatpush3.msra.mxu0 %v9817_v0  ;;  %v9840_v27 = vld [vmem:[#allocation60_spill] sm:$0xff] }
 0x5cc   :  { %3777 = vrot.lane.b32.xlu0 %v3248_v8, %s5926_s20  ;;  %5512 = vmatprep.subr.mxu0 %v9818_v20  ;;  %v9842_v8 = vld [vmem:[#allocation62_spill] sm:$0xff]  ;;  %v9844_v0 = vld [vmem:[#allocation64_spill] sm:$0xff]  ;;  %v9847_v20 = vld [vmem:[#allocation51_spill] sm:$0xff] }
 0x5cd   :  { %5513 = vmatpush3.msra.mxu0 %v9819_v50  ;;  %5553 = vmatpush3.msra.mxu1 %v9824_v41  ;;  %v9849_v50 = vld [vmem:[#allocation53_spill] sm:$0xff]  ;;  %v9855_v41 = vld [vmem:[#allocation74_spill] sm:$0xff] }
 0x5ce   :  { %3604 = vmatmul.mubr.f32.gmra.mxu0 %v3227_v58  ;;  %5514 = vmatprep.subr.mxu0 %v9821_v1  ;;  %v9845_v58 = vld [vmem:[#allocation49_spill] sm:$0xff]  ;;  %v9851_v1 = vld [vmem:[#allocation70_spill] sm:$0xff] }
 0x5cf   :  { %3608 = vmatprep.mubr.f32.mxu0 %v3241_v28  ;;  %5515 = vmatpush3.msra.mxu0 %v9822_v18  ;;  %v9848_v28 = vld [vmem:[#allocation68_spill] sm:$0xff]  ;;  %v9852_v18 = vld [vmem:[#allocation57_spill] sm:$0xff] }
 0x5d0   :  { %5516 = vmatprep.subr.mxu0 %v9823_v9  ;;  %5554 = vmatprep.subr.mxu1 %v9826_v12  ;;  %v9854_v9 = vld [vmem:[#allocation59_spill] sm:$0xff]  ;;  %v9857_v12 = vld [vmem:[#allocation76_spill] sm:$0xff] }
 0x5d1   :  { %5517 = vmatpush3.msra.mxu0 %v9825_v7  ;;  %5555 = vmatpush3.msra.mxu1 %v9829_v62  ;;  %v9856_v7 = vld [vmem:[#allocation61_spill] sm:$0xff]  ;;  %v9861_v62 = vld [vmem:[#allocation67_spill] sm:$0xff] }
 0x5d2   :  { %3609 = vmatmul.mubr.f32.gmra.mxu0 %v3240_v14  ;;  %5518 = vmatprep.subr.mxu0 %v9827_v15  ;;  %v9853_v14 = vld [vmem:[#allocation72_spill] sm:$0xff]  ;;  %v9858_v15 = vld [vmem:[#allocation63_spill] sm:$0xff] }
 0x5d3   :  { %5519 = vmatpush3.msra.mxu0 %v9828_v32  ;;  %5556 = vmatprep.subr.mxu1 %v9831_v60  ;;  %v9860_v32 = vld [vmem:[#allocation79_spill] sm:$0xff]  ;;  %v9863_v60 = vld [vmem:[#allocation69_spill] sm:$0xff] }
 0x5d4   :  { %5520 = vmatprep.subr.mxu0 %v9830_v21  ;;  %5557 = vmatpush3.msra.mxu1 %v9833_v3  ;;  %v9862_v21 = vld [vmem:[#allocation81_spill] sm:$0xff]  ;;  %v9865_v3 = vld [vmem:[#allocation71_spill] sm:$0xff] }
 0x5d5   :  { %5521 = vmatpush3.msra.mxu0 %v9832_v38  ;;  %5558 = vmatprep.subr.mxu1 %v9835_v51  ;;  %v9864_v38 = vld [vmem:[#allocation84_spill] sm:$0xff]  ;;  %v9867_v51 = vld [vmem:[#allocation75_spill] sm:$0xff] }
 0x5d6   :  { %5522 = vmatprep.subr.mxu0 %v9834_v49  ;;  %5559 = vmatpush3.msra.mxu1 %v9837_v45  ;;  %v9866_v49 = vld [vmem:[#allocation73_spill] sm:$0xff]  ;;  %v9870_v45 = vld [vmem:[#allocation80_spill] sm:$0xff] }
 0x5d7   :  { %5523 = vmatpush3.msra.mxu0 %v9836_v47  ;;  %5560 = vmatprep.subr.mxu1 %v9839_v24  ;;  %v9868_v47 = vld [vmem:[#allocation77_spill] sm:$0xff]  ;;  %v9872_v24 = vld [vmem:[#allocation83_spill] sm:$0xff] }
 0x5d8   :  { %5524 = vmatprep.subr.mxu0 %v9838_v35  ;;  %5561 = vmatpush3.msra.mxu1 %v9841_v44  ;;  %v9871_v35 = vld [vmem:[#allocation82_spill] sm:$0xff] }
 0x5d9   :  { %5525 = vmatpush3.msra.mxu0 %v9840_v27  ;;  %5562 = vmatprep.subr.mxu1 %v9843_v57 }
 0x5da   :  { %5526 = vmatprep.subr.mxu0 %v9842_v8  ;;  %5563 = vmatpush3.msra.mxu1 %v9845_v58 }
 0x5db   :  { %5527 = vmatpush3.msra.mxu0 %v9844_v0  ;;  %5564 = vmatprep.subr.mxu1 %v9847_v20 }
 0x5dc   :  { %5528 = vmatprep.subr.mxu0 %v9846_v22  ;;  %5565 = vmatpush3.msra.mxu1 %v9849_v50 }
 0x5dd   :  { %5529 = vmatpush3.msra.mxu0 %v9848_v28  ;;  %5566 = vmatprep.subr.mxu1 %v9850_v55 }
 0x5de   :  { %5530 = vmatprep.subr.mxu0 %v8503_v23  ;;  %5567 = vmatpush3.msra.mxu1 %v9852_v18  ;;  %v9859_v23 = vld [vmem:[#allocation65_spill] sm:$0xff] }
 0x5df   :  { %5531 = vmatpush3.msra.mxu0 %v9851_v1  ;;  %5568 = vmatprep.subr.mxu1 %v9854_v9 }
 0x5e0   :  { %5532 = vmatprep.subr.mxu0 %v9853_v14  ;;  %5569 = vmatpush3.msra.mxu1 %v9856_v7 }
 0x5e1   :  { %5533 = vmatpush3.msra.mxu0 %v9855_v41  ;;  %5570 = vmatprep.subr.mxu1 %v9858_v15  ;;  %v9873_v41 = vld [vmem:[#allocation85_spill] sm:$0xff] }
 0x5e2   :  { %5534 = vmatprep.subr.mxu0 %v9857_v12  ;;  %5571 = vmatpush3.msra.mxu1 %v9859_v23 }
 0x5e3   :  { %5535 = vmatpush3.msra.mxu0 %v8534_v17  ;;  %5572 = vmatprep.subr.mxu1 %v9861_v62  ;;  %v9869_v17 = vld [vmem:[#allocation78_spill] sm:$0xff] }
 0x5e4   :  { %5536 = vmatprep.subr.mxu0 %v9860_v32  ;;  %5573 = vmatpush3.msra.mxu1 %v9863_v60 }
 0x5e5   :  { %5537 = vmatpush3.msra.mxu0 %v9862_v21  ;;  %5574 = vmatprep.subr.mxu1 %v9865_v3 }
 0x5e6   :  { %5594 = vmatprep.subr.mxu0 %v9864_v38  ;;  %5575 = vmatpush3.msra.mxu1 %v9866_v49 }
 0x5e7   :  { %5576 = vmatprep.subr.mxu1 %v9867_v51 }
 0x5e8   :  { %5577 = vmatpush3.msra.mxu1 %v9868_v47 }
 0x5e9   :  { %5578 = vmatprep.subr.mxu1 %v9869_v17 }
 0x5ea   :  { %5579 = vmatpush3.msra.mxu1 %v9870_v45 }
 0x5eb   :  { %5580 = vmatprep.subr.mxu1 %v9871_v35 }
 0x5ec   :  { %5581 = vmatpush3.msra.mxu1 %v9872_v24 }
 0x5ed   :  { %5755 = vmatprep.subr.mxu1 %v8581_v56 }
 0x615   :  { %v5795_v27 = vpop.permute.xlu1 %5794 }
 0x616   :  { %v5797_v44 = vunpack.i.h.bf16 %v5795_v27  ;;  %v5796_v8 = vunpack.i.l.bf16 %v5795_v27 }
 0x618   :  { %v3781_v57 = vsel %vm3779_vm0, %v5796_v8, %v5797_v44 }
 0x619   :  { %3900 = vmatprep.mubr.f32.mxu0 %v3781_v57 }
 0x61b   :  { %v5800_v0 = vpop.permute.xlu0 %5799 }
 0x61c   :  { %v5802_v58 = vunpack.i.h.bf16 %v5800_v0  ;;  %v5801_v22 = vunpack.i.l.bf16 %v5800_v0 }
 0x61e   :  { %v8970_v20 = vpop.permute.xlu1 %5804  ;;  %v3780_v55 = vsel %vm3779_vm0, %v5801_v22, %v5796_v8 }
 0x61f   :  { %v5807_v28 = vunpack.i.h.bf16 %v8970_v20  ;;  %v5806_v50 = vunpack.i.l.bf16 %v8970_v20  ;;  %3901 = vmatmul.mubr.f32.vlgmr.msra.gmra.mxu0 %v3780_v55 }
 0x620   :  { %5595 = vmatpush3.msra.mxu0 %v8628_v46  ;;  %v9874_v46 = vld [vmem:[#allocation86_spill] sm:$0xff] }
 0x621   :  { %v3787_v1 = vsel %vm3779_vm0, %v5802_v58, %v5806_v50  ;;  %5596 = vmatprep.subr.mxu0 %v8636_v30  ;;  %v3786_v14 = vsel %vm3779_vm0, %v5807_v28, %v5802_v58 }
 0x622   :  { %3905 = vmatprep.mubr.f32.mxu0 %v3787_v1  ;;  %v8980_v18 = vpop.permute.xlu0 %5809  ;;  %5597 = vmatpush3.msra.mxu0 %v8646_v39  ;;  %v8984_v9 = vpop.permute.xlu1 %3735 }
 0x623   :  { %5598 = vmatprep.subr.mxu0 %v8653_v63  ;;  %3906 = vmatmul.mubr.f32.gmra.mxu0 %v3786_v14 }
 0x624   :  { %5599 = vmatpush3.msra.mxu0 %v9873_v41 }
 0x625   :  { %5600 = vmatprep.subr.mxu0 %v9874_v46 }
 0x626   :  { %5601 = vmatpush3.msra.mxu0 %v8688_v48 }
 0x627   :  { %5602 = vmatprep.subr.mxu0 %v8700_v43  ;;  %v5811_v43 = vunpack.i.l.bf16 %v8980_v18 }
 0x628   :  { %5603 = vmatpush3.msra.mxu0 %v8707_v52 }
 0x629   :  { %v5815_v30 = vpop.permute.xlu0 %5814  ;;  %5604 = vmatprep.subr.mxu0 %v8722_v26 }
 0x62a   :  { %v5820_v7 = vpop.permute.xlu1 %5819  ;;  %v5817_v39 = vunpack.i.h.bf16 %v5815_v30  ;;  %v5816_v12 = vunpack.i.l.bf16 %v5815_v30  ;;  %5605 = vmatpush3.msra.mxu0 %v8729_v40 }
 0x62b   :  { %v5821_v15 = vunpack.i.l.bf16 %v5820_v7  ;;  %5606 = vmatprep.subr.mxu0 %v8736_v4  ;;  %v5822_v52 = vunpack.i.h.bf16 %v5820_v7 }
 0x62c   :  { %v3793_v63 = vsel %vm3779_vm0, %v5816_v12, %v5817_v39  ;;  %5607 = vmatpush3.msra.mxu0 %v8744_v34 }
 0x62d   :  { %v8996_v23 = vpop.permute.xlu0 %5824  ;;  %3910 = vmatprep.mubr.f32.mxu0 %v3793_v63  ;;  %v3792_v48 = vsel %vm3779_vm0, %v5821_v15, %v5816_v12  ;;  %5608 = vmatprep.subr.mxu0 %v8755_v11  ;;  %v5812_v11 = vunpack.i.h.bf16 %v8980_v18 }
 0x62e   :  { %v9001_v32 = vpop.permute.xlu1 %5834  ;;  %v5827_v26 = vunpack.i.h.bf16 %v8996_v23  ;;  %v5826_v40 = vunpack.i.l.bf16 %v8996_v23  ;;  %3911 = vmatmul.mubr.f32.gmra.mxu0 %v3792_v48 }
 0x62f   :  { %v5837_v4 = vunpack.i.h.bf16 %v9001_v32  ;;  %v5836_v62 = vunpack.i.l.bf16 %v9001_v32  ;;  %5609 = vmatpush3.msra.mxu0 %v8763_v6  ;;  %v3785_v6 = vsel %vm3779_vm0, %v5811_v43, %v8984_v9  ;;  %v3788_v35 = vsel %vm3779_vm0, %v5806_v50, %v5812_v11 }
 0x630   :  { %v3799_v34 = vsel %vm3779_vm0, %v5822_v52, %v5826_v40  ;;  %v3782_v21 = vsel %vm3779_vm0, %v5797_v44, %v5827_v26  ;;  %5610 = vmatprep.subr.mxu0 %v8768_v19 }
 0x631   :  { %v5830_v60 = vpop.permute.xlu0 %5829  ;;  %3915 = vmatprep.mubr.f32.mxu0 %v3799_v34  ;;  %v3783_v38 = vsel %vm3779_vm0, %v5827_v26, %v5836_v62  ;;  %v3798_v3 = vsel %vm3779_vm0, %v5837_v4, %v5822_v52  ;;  %5611 = vmatpush3.msra.mxu0 %v8775_v42 }
 0x632   :  { %v3750_v49 = vpop.permute.xlu1 %3749  ;;  %v5831_v51 = vunpack.i.l.bf16 %v5830_v60  ;;  %3985 = vmatprep.mubr.f32.mxu1 %v3783_v38  ;;  %3916 = vmatmul.mubr.f32.gmra.mxu0 %v3798_v3 }
 0x633   :  { %3986 = vmatmul.mubr.f32.vlgmr.msra.gmra.mxu1 %v3782_v21  ;;  %4070 = vmatprep.mubr.f32.mxu0 %v3785_v6 }
 0x634   :  { %v3789_v19 = vsel %vm3779_vm0, %v5812_v11, %v5831_v51  ;;  %5612 = vmatprep.subr.mxu0 %v8782_v10  ;;  %5756 = vmatpush3.msra.mxu1 %v8581_v56 }
 0x635   :  { %v5840_v42 = vpop.permute.xlu0 %5839  ;;  %3990 = vmatprep.mubr.f32.mxu1 %v3789_v19  ;;  %5613 = vmatpush3.msra.mxu0 %v8788_v37  ;;  %v9875_v19 = vld [vmem:[#allocation15_spill] sm:$0xff] }
 0x636   :  { %v5845_v47 = vpop.permute.xlu1 %5844  ;;  %v5842_v17 = vunpack.i.h.bf16 %v5840_v42  ;;  %v5841_v45 = vunpack.i.l.bf16 %v5840_v42  ;;  %5614 = vmatprep.subr.mxu0 %v8797_v36  ;;  %5757 = vmatprep.subr.mxu1 %v8660_v53 }
 0x637   :  { %3991 = vmatmul.mubr.f32.gmra.mxu1 %v3788_v35  ;;  %5615 = vmatpush3.msra.mxu0 %v8803_v13  ;;  %v5847_v37 = vunpack.i.h.bf16 %v5845_v47 }
 0x638   :  { %v3795_v56 = vsel %vm3779_vm0, %v5841_v45, %v5842_v17  ;;  %v3794_v10 = vsel %vm3779_vm0, %v5817_v39, %v5841_v45  ;;  %5616 = vmatprep.subr.mxu0 %v8812_v54  ;;  %5758 = vmatpush3.msra.mxu1 %v8660_v53  ;;  %v5832_v54 = vunpack.i.h.bf16 %v5830_v60 }
 0x639   :  { %3995 = vmatprep.mubr.f32.mxu1 %v3795_v56  ;;  %5617 = vmatpush3.msra.mxu0 %v8821_v25  ;;  %v3800_v53 = vsel %vm3779_vm0, %v5826_v40, %v5847_v37 }
 0x63a   :  { %5618 = vmatprep.subr.mxu0 %v8827_v29  ;;  %v3764_v25 = vpop.permute.xlu0 %3763  ;;  %v3784_v29 = vsel %vm3779_vm0, %v5836_v62, %v5811_v43 }
 0x63b   :  { %v5850_v24 = vpop.permute.xlu1 %5849  ;;  %3996 = vmatmul.mubr.f32.gmra.mxu1 %v3794_v10  ;;  %5619 = vmatpush3.msra.mxu0 %v8836_v59  ;;  %v3791_v59 = vsel %vm3779_vm0, %v5832_v54, %v3750_v49 }
 0x63c   :  { %v5851_v36 = vunpack.i.l.bf16 %v5850_v24  ;;  %5620 = vmatprep.subr.mxu0 %v8842_v2  ;;  %v5846_v2 = vunpack.i.l.bf16 %v5845_v47 }
 0x63d   :  { %5621 = vmatpush3.msra.mxu0 %v8850_v5  ;;  %v3790_v5 = vsel %vm3779_vm0, %v5831_v51, %v5832_v54 }
 0x63e   :  { %v3801_v13 = vsel %vm3779_vm0, %v5847_v37, %v5851_v36  ;;  %5622 = vmatprep.subr.mxu0 %v8857_v16  ;;  %v3778_v16 = vpop.permute.xlu0 %3777 }
 0x63f   :  { %4000 = vmatprep.mubr.f32.mxu1 %v3801_v13  ;;  %5623 = vmatpush3.msra.mxu0 %v8863_v31  ;;  %v3797_v31 = vsel %vm3779_vm0, %v5846_v2, %v3764_v25  ;;  %v9876_v13 = vld [vmem:[#allocation14_spill] sm:$0xff] }
 0x640   :  { %4001 = vmatmul.mubr.f32.gmra.mxu1 %v3800_v53  ;;  %5624 = vmatprep.subr.mxu0 %v8871_v33  ;;  %v5852_v33 = vunpack.i.h.bf16 %v5850_v24 }
 0x641   :  { %5759 = vmatprep.mubr.msk.f32.mxu1 %vm2091_vm1, %v8984_v9  ;;  %5625 = vmatpush3.msra.mxu0 %v8877_v61  ;;  %v3796_v61 = vsel %vm3779_vm0, %v5842_v17, %v5846_v2  ;;  %v9878_v2 = vld [vmem:[#allocation12_spill] sm:$0xff] }
 0x642   :  { %4071 = vmatmul.mubr.f32.vlgmr.msra.gmra.mxu0 %v3784_v29  ;;  %v3803_v27 = vsel %vm3779_vm0, %v5852_v33, %v3778_v16  ;;  %v3802_v44 = vsel %vm3779_vm0, %v5851_v36, %v5852_v33 }
 0x643   :  { %4075 = vmatprep.mubr.f32.mxu0 %v3791_v59 }
 0x644   :  { %5760 = vmatmul.mubr.msk.f32.vlgmr.msra.gmra.mxu1 %vm2091_vm1, %v3750_v49 }
 0x645   :  { %5762 = vmatprep.mubr.msk.f32.mxu1 %vm2091_vm1, %v3764_v25  ;;  %v9877_v25 = vld [vmem:[#allocation13_spill] sm:$0xff] }
 0x646   :  { %4076 = vmatmul.mubr.f32.gmra.mxu0 %v3790_v5 }
 0x647   :  { %4080 = vmatprep.mubr.f32.mxu0 %v3797_v31  ;;  %v9879_v31 = vld [vmem:[#allocation11_spill] sm:$0xff] }
 0x648   :  { %5763 = vmatmul.mubr.msk.f32.gmra.mxu1 %vm2091_vm1, %v3778_v16 }
 0x64a   :  { %4081 = vmatmul.mubr.f32.gmra.mxu0 %v3796_v61 }
 0x64b   :  { %4085 = vmatprep.mubr.f32.mxu0 %v3803_v27  ;;  %v9880_v27 = vld [vmem:[#allocation10_spill] sm:$0xff] }
 0x64e   :  { %4086 = vmatmul.mubr.f32.gmra.mxu0 %v3802_v44 }
 0x661   :  { %v5400_v8 = vpop.f32.mrf.mxu0  ;;  %v5444_v57 = vpop.f32.mrf.mxu1 }
 0x663   :  { %v5401_v0 = vpop.f32.mrf.mxu0  ;;  %v5445_v58 = vpop.f32.mrf.mxu1 }
 0x664   :  { %v5402_v48 = vadd.f32 %v5401_v0, %v5400_v8  ;;  %v5446_v43 = vadd.f32 %v5445_v58, %v5444_v57  ;;  %v9881_v57 = vld [vmem:[#allocation8_spill] sm:$0xff] }
 0x666   :  { %v3511_v40 = vadd.f32 %v5446_v43, %v5402_v48 }
 0x668   :  { %v5403_v22 = vpop.f32.mrf.mxu0  ;;  %v5447_v20 = vpop.f32.mrf.mxu1 }
 0x66a   :  { %v5404_v28 = vpop.f32.mrf.mxu0  ;;  %v5448_v50 = vpop.f32.mrf.mxu1 }
 0x66b   :  { %v5405_v55 = vadd.f32 %v5404_v28, %v5403_v22  ;;  %v5449_v1 = vadd.f32 %v5448_v50, %v5447_v20  ;;  %v9882_v50 = vld [vmem:[#allocation9_spill] sm:$0xff] }
 0x66d   :  { %v3516_v18 = vadd.f32 %v5449_v1, %v5405_v55  ;;  %v5406_v14 = vpop.f32.mrf.mxu0 }
 0x66e   :  { %v5450_v9 = vpop.f32.mrf.mxu1 }
 0x66f   :  { %v5407_v41 = vpop.f32.mrf.mxu0 }
 0x670   :  { %v5451_v46 = vpop.f32.mrf.mxu1  ;;  %v5408_v38 = vadd.f32 %v5407_v41, %v5406_v14 }
 0x671   :  { %v5452_v3 = vadd.f32 %v5451_v46, %v5450_v9 }
 0x673   :  { %v5409_v30 = vpop.f32.mrf.mxu0  ;;  %v5453_v7 = vpop.f32.mrf.mxu1  ;;  %v3521_v45 = vadd.f32 %v5452_v3, %v5408_v38 }
 0x675   :  { %v5410_v39 = vpop.f32.mrf.mxu0  ;;  %v5454_v15 = vpop.f32.mrf.mxu1 }
 0x676   :  { %v5411_v12 = vadd.f32 %v5410_v39, %v5409_v30  ;;  %v5455_v63 = vadd.f32 %v5454_v15, %v5453_v7 }
 0x678   :  { %v9059_v23 = vadd.f32 %v5455_v63, %v5411_v12 }
 0x67a   :  { %v5751_v32 = vpop.f32.mrf.mxu1 }
 0x67c   :  { %v3680_v21 = vpop.f32.mrf.mxu1 }
 0x67e   :  { %v5754_v47 = vpop.f32.mrf.mxu1 }
 0x680   :  { %v3690_v37 = vpop.f32.mrf.mxu1 }
 0x686   :  { %v5488_v52 = vpop.f32.mrf.mxu0 }
 0x688   :  { %v5489_v26 = vpop.f32.mrf.mxu0 }
 0x689   :  { %v5490_v4 = vadd.f32 %v5489_v26, %v5488_v52 }
 0x68a   :  { %v5491_v62 = vpop.f32.mrf.mxu0 }
 0x68b   :  { %v3596_v34 = vadd.f32 %v5490_v4, %v3511_v40 }
 0x68c   :  { %v5492_v60 = vpop.f32.mrf.mxu0 }
 0x68d   :  { %v3681_v11 = vadd.f32 %v3680_v21, %v3596_v34  ;;  %v5493_v49 = vadd.f32 %v5492_v60, %v5491_v62 }
 0x68e   :  { %v5494_v51 = vpop.f32.mrf.mxu0 }
 0x68f   :  { %v3601_v6 = vadd.f32 %v5493_v49, %v3516_v18  ;;  %v4256_v42 = vrot.slane %v3681_v11, %v9875_v19  ;;  %v4245_v54 = vrot.slane %v3681_v11, %v9876_v13  ;;  %v4234_v29 = vrot.slane %v3681_v11, %v9877_v25 }
 0x690   :  { %v5495_v17 = vpop.f32.mrf.mxu0  ;;  %v4223_v5 = vrot.slane %v3681_v11, %v9878_v2  ;;  %v4212_v33 = vrot.slane %v3681_v11, %v9879_v31  ;;  %v4201_v44 = vrot.slane %v3681_v11, %v9880_v27  ;;  %v4190_v0 = vrot.slane %v3681_v11, %v9881_v57 }
 0x691   :  { %v9062_v35 = vadd.f32 %v5751_v32, %v3601_v6  ;;  %v5496_v56 = vadd.f32 %v5495_v17, %v5494_v51  ;;  %4262 = vbcast.lane.b32.xlu1 %v4256_v42, 264  ;;  %v4179_v55 = vrot.slane %v3681_v11, %v9882_v50 }
 0x692   :  { %v5497_v58 = vpop.f32.mrf.mxu0 }
 0x693   :  { %v3606_v10 = vadd.f32 %v5496_v56, %v3521_v45  ;;  %v4344_v9 = vrot.slane %v9062_v35, %v9875_v19  ;;  %v4333_v46 = vrot.slane %v9062_v35, %v9876_v13  ;;  %v4322_v7 = vrot.slane %v9062_v35, %v9877_v25 }
 0x694   :  { %v5498_v22 = vpop.f32.mrf.mxu0  ;;  %v4300_v32 = vrot.slane %v9062_v35, %v9879_v31  ;;  %v4289_v38 = vrot.slane %v9062_v35, %v9880_v27 }
 0x695   :  { %v3691_v24 = vadd.f32 %v3690_v37, %v3606_v10  ;;  %4258 = vbcast.lane.b32.xlu1 %v4256_v42, 256  ;;  %v5499_v20 = vadd.f32 %v5498_v22, %v5497_v58  ;;  %v4278_v42 = vrot.slane %v9062_v35, %v9881_v57 }
 0x697   :  { %v4432_v36 = vrot.slane %v3691_v24, %v9875_v19  ;;  %v4421_v53 = vrot.slane %v3691_v24, %v9876_v13  ;;  %v4410_v59 = vrot.slane %v3691_v24, %v9877_v25  ;;  %v4399_v16 = vrot.slane %v3691_v24, %v9878_v2 }
 0x698   :  { %v4388_v61 = vrot.slane %v3691_v24, %v9879_v31  ;;  %v4377_v8 = vrot.slane %v3691_v24, %v9880_v27  ;;  %v4366_v28 = vrot.slane %v3691_v24, %v9881_v57  ;;  %v3611_v1 = vadd.f32 %v5499_v20, %v9059_v23 }
 0x699   :  { %4438 = vbcast.lane.b32.xlu0 %v4432_v36, 264  ;;  %4251 = vbcast.lane.b32.xlu1 %v4245_v54, 264  ;;  %v9082_v14 = vrot.slane %v3691_v24, %v9882_v50  ;;  %v4311_v23 = vrot.slane %v9062_v35, %v9878_v2 }
 0x69a   :  { %v9079_v18 = vadd.f32 %v5754_v47, %v3611_v1 }
 0x69c   :  { %v4520_v41 = vrot.slane %v9079_v18, %v9875_v19  ;;  %v4509_v30 = vrot.slane %v9079_v18, %v9876_v13  ;;  %v4498_v12 = vrot.slane %v9079_v18, %v9877_v25  ;;  %v4487_v43 = vrot.slane %v9079_v18, %v9878_v2 }
 0x69d   :  { %4434 = vbcast.lane.b32.xlu0 %v4432_v36, 256  ;;  %4247 = vbcast.lane.b32.xlu1 %v4245_v54, 256  ;;  %v4476_v4 = vrot.slane %v9079_v18, %v9879_v31  ;;  %v4465_v49 = vrot.slane %v9079_v18, %v9880_v27  ;;  %v4454_v24 = vrot.slane %v9079_v18, %v9881_v57 }
 0x6a1   :  { %4427 = vbcast.lane.b32.xlu0 %v4421_v53, 264  ;;  %4240 = vbcast.lane.b32.xlu1 %v4234_v29, 264 }
 0x6a5   :  { %4423 = vbcast.lane.b32.xlu0 %v4421_v53, 256  ;;  %4236 = vbcast.lane.b32.xlu1 %v4234_v29, 256 }
 0x6a9   :  { %4416 = vbcast.lane.b32.xlu0 %v4410_v59, 264  ;;  %4229 = vbcast.lane.b32.xlu1 %v4223_v5, 264 }
 0x6ad   :  { %4412 = vbcast.lane.b32.xlu0 %v4410_v59, 256  ;;  %4225 = vbcast.lane.b32.xlu1 %v4223_v5, 256 }
 0x6b1   :  { %4405 = vbcast.lane.b32.xlu0 %v4399_v16, 264  ;;  %4218 = vbcast.lane.b32.xlu1 %v4212_v33, 264 }
 0x6b5   :  { %4401 = vbcast.lane.b32.xlu0 %v4399_v16, 256  ;;  %4214 = vbcast.lane.b32.xlu1 %v4212_v33, 256 }
 0x6b9   :  { %4394 = vbcast.lane.b32.xlu0 %v4388_v61, 264  ;;  %4207 = vbcast.lane.b32.xlu1 %v4201_v44, 264 }
 0x6bd   :  { %4390 = vbcast.lane.b32.xlu0 %v4388_v61, 256  ;;  %4203 = vbcast.lane.b32.xlu1 %v4201_v44, 256  ;;  %v4267_v44 = vrot.slane %v9062_v35, %v9882_v50 }
 0x6c1   :  { %4383 = vbcast.lane.b32.xlu0 %v4377_v8, 264  ;;  %4196 = vbcast.lane.b32.xlu1 %v4190_v0, 264 }
 0x6c5   :  { %4379 = vbcast.lane.b32.xlu0 %v4377_v8, 256  ;;  %4192 = vbcast.lane.b32.xlu1 %v4190_v0, 256 }
 0x6c9   :  { %4372 = vbcast.lane.b32.xlu0 %v4366_v28, 264  ;;  %4185 = vbcast.lane.b32.xlu1 %v4179_v55, 264 }
 0x6cd   :  { %4368 = vbcast.lane.b32.xlu0 %v4366_v28, 256  ;;  %4181 = vbcast.lane.b32.xlu1 %v4179_v55, 256 }
 0x6d1   :  { %4361 = vbcast.lane.b32.xlu0 %v9082_v14, 264  ;;  %4350 = vbcast.lane.b32.xlu1 %v4344_v9, 264 }
 0x6d5   :  { %4346 = vbcast.lane.b32.xlu1 %v4344_v9, 256  ;;  %4526 = vbcast.lane.b32.xlu0 %v4520_v41, 264 }
 0x6d9   :  { %4339 = vbcast.lane.b32.xlu1 %v4333_v46, 264  ;;  %4522 = vbcast.lane.b32.xlu0 %v4520_v41, 256 }
 0x6dd   :  { %4335 = vbcast.lane.b32.xlu1 %v4333_v46, 256  ;;  %4515 = vbcast.lane.b32.xlu0 %v4509_v30, 264  ;;  %v4443_v46 = vrot.slane %v9079_v18, %v9882_v50 }
 0x6df   :  { %v5538_v39 = vpop.f32.mrf.mxu0 }
 0x6e1   :  { %4328 = vbcast.lane.b32.xlu1 %v4322_v7, 264  ;;  %4511 = vbcast.lane.b32.xlu0 %v4509_v30, 256  ;;  %v5539_v15 = vpop.f32.mrf.mxu0 }
 0x6e2   :  { %v5540_v36 = vadd.f32 %v5539_v15, %v5538_v39 }
 0x6e3   :  { %v5541_v63 = vpop.f32.mrf.mxu0 }
 0x6e5   :  { %4324 = vbcast.lane.b32.xlu1 %v4322_v7, 256  ;;  %4504 = vbcast.lane.b32.xlu0 %v4498_v12, 264  ;;  %v5542_v48 = vpop.f32.mrf.mxu0 }
 0x6e6   :  { %v5543_v8 = vadd.f32 %v5542_v48, %v5541_v63 }
 0x6e9   :  { %4317 = vbcast.lane.b32.xlu1 %v4311_v23, 264  ;;  %4500 = vbcast.lane.b32.xlu0 %v4498_v12, 256 }
 0x6ed   :  { %4313 = vbcast.lane.b32.xlu1 %v4311_v23, 256  ;;  %4493 = vbcast.lane.b32.xlu0 %v4487_v43, 264 }
 0x6ee   :  { %v5544_v52 = vpop.f32.mrf.mxu0 }
 0x6f0   :  { %v5545_v26 = vpop.f32.mrf.mxu0 }
 0x6f1   :  { %4306 = vbcast.lane.b32.xlu1 %v4300_v32, 264  ;;  %4489 = vbcast.lane.b32.xlu0 %v4487_v43, 256  ;;  %v5546_v7 = vadd.f32 %v5545_v26, %v5544_v52 }
 0x6f2   :  { %v5547_v40 = vpop.f32.mrf.mxu0 }
 0x6f3   :  { %v5582_v62 = vpop.f32.mrf.mxu1 }
 0x6f4   :  { %v5548_v34 = vpop.f32.mrf.mxu0 }
 0x6f5   :  { %4302 = vbcast.lane.b32.xlu1 %v4300_v32, 256  ;;  %4482 = vbcast.lane.b32.xlu0 %v4476_v4, 264  ;;  %v5549_v21 = vadd.f32 %v5548_v34, %v5547_v40  ;;  %v5583_v60 = vpop.f32.mrf.mxu1 }
 0x6f6   :  { %v5584_v17 = vadd.f32 %v5583_v60, %v5582_v62 }
 0x6f7   :  { %v5585_v3 = vpop.f32.mrf.mxu1 }
 0x6f8   :  { %v3988_v29 = vadd.f32 %v5584_v17, %v5540_v36 }
 0x6f9   :  { %4295 = vbcast.lane.b32.xlu1 %v4289_v38, 264  ;;  %4478 = vbcast.lane.b32.xlu0 %v4476_v4, 256  ;;  %v5586_v11 = vpop.f32.mrf.mxu1 }
 0x6fa   :  { %v5587_v59 = vadd.f32 %v5586_v11, %v5585_v3 }
 0x6fb   :  { %v5588_v51 = vpop.f32.mrf.mxu1 }
 0x6fc   :  { %v3993_v22 = vadd.f32 %v5587_v59, %v5543_v8 }
 0x6fd   :  { %4291 = vbcast.lane.b32.xlu1 %v4289_v38, 256  ;;  %4471 = vbcast.lane.b32.xlu0 %v4465_v49, 264  ;;  %v5589_v6 = vpop.f32.mrf.mxu1 }
 0x6fe   :  { %v5590_v55 = vadd.f32 %v5589_v6, %v5588_v51 }
 0x700   :  { %v5591_v47 = vpop.f32.mrf.mxu1  ;;  %v3998_v15 = vadd.f32 %v5590_v55, %v5546_v7 }
 0x701   :  { %4284 = vbcast.lane.b32.xlu1 %v4278_v42, 264  ;;  %4467 = vbcast.lane.b32.xlu0 %v4465_v49, 256 }
 0x702   :  { %v5592_v45 = vpop.f32.mrf.mxu1  ;;  %v5626_v37 = vpop.f32.mrf.mxu0 }
 0x703   :  { %v5593_v56 = vadd.f32 %v5592_v45, %v5591_v47  ;;  %v9111_v10 = vpop.permute.xlu1 %4262 }
 0x704   :  { %v5627_v53 = vpop.f32.mrf.mxu0  ;;  %v5761_v5 = vpop.f32.mrf.mxu1 }
 0x705   :  { %v9115_v54 = vadd.f32 %v5593_v56, %v5549_v21  ;;  %4280 = vbcast.lane.b32.xlu1 %v4278_v42, 256  ;;  %4460 = vbcast.lane.b32.xlu0 %v4454_v24, 264  ;;  %v5628_v16 = vadd.f32 %v5627_v53, %v5626_v37 }
 0x706   :  { %v5629_v61 = vpop.f32.mrf.mxu0  ;;  %v4157_v20 = vpop.f32.mrf.mxu1 }
 0x707   :  { %v9117_v33 = vpop.permute.xlu1 %4258  ;;  %v4073_v0 = vadd.f32 %v5628_v16, %v3988_v29 }
 0x708   :  { %v5630_v58 = vpop.f32.mrf.mxu0  ;;  %v9129_v39 = vpop.f32.mrf.mxu1 }
 0x709   :  { %4273 = vbcast.lane.b32.xlu1 %v4267_v44, 264  ;;  %4456 = vbcast.lane.b32.xlu0 %v4454_v24, 256  ;;  %v5631_v28 = vadd.f32 %v5630_v58, %v5629_v61  ;;  %v9121_v1 = vadd.f32 %v4157_v20, %v4073_v0 }
 0x70a   :  { %v5632_v35 = vpop.f32.mrf.mxu0  ;;  %v4167_v52 = vpop.f32.mrf.mxu1 }
 0x70b   :  { %v9123_v9 = vpop.permute.xlu1 %4251  ;;  %v9125_v41 = vpop.permute.xlu0 %4438  ;;  %v4078_v30 = vadd.f32 %v5631_v28, %v3993_v22  ;;  %v4608_v32 = vrot.slane %v9121_v1, %v9875_v19  ;;  %v4597_v38 = vrot.slane %v9121_v1, %v9876_v13  ;;  %v4586_v42 = vrot.slane %v9121_v1, %v9877_v25 }
 0x70c   :  { %v5633_v12 = vpop.f32.mrf.mxu0  ;;  %v4575_v24 = vrot.slane %v9121_v1, %v9878_v2  ;;  %v4564_v16 = vrot.slane %v9121_v1, %v9879_v31  ;;  %v4553_v22 = vrot.slane %v9121_v1, %v9880_v27 }
 0x70d   :  { %4269 = vbcast.lane.b32.xlu1 %v4267_v44, 256  ;;  %4449 = vbcast.lane.b32.xlu0 %v4443_v46, 264  ;;  %v9131_v63 = vadd.f32 %v5761_v5, %v4078_v30  ;;  %v5634_v23 = vadd.f32 %v5633_v12, %v5632_v35  ;;  %v4542_v35 = vrot.slane %v9121_v1, %v9881_v57 }
 0x70e   :  { %v5635_v7 = vpop.f32.mrf.mxu0 }
 0x70f   :  { %v9133_v48 = vpop.permute.xlu1 %4247  ;;  %v9135_v43 = vpop.permute.xlu0 %4434  ;;  %v4083_v18 = vadd.f32 %v5634_v23, %v3998_v15  ;;  %v9147_v62 = vrot.slane %v9131_v63, %v9875_v19 }
 0x710   :  { %v5636_v23 = vpop.f32.mrf.mxu0 }
 0x711   :  { %4445 = vbcast.lane.b32.xlu1 %v4443_v46, 256  ;;  %4614 = vbcast.lane.b32.xlu0 %v4608_v32, 264  ;;  %v9139_v26 = vadd.f32 %v4167_v52, %v4083_v18 }
 0x713   :  { %v9141_v40 = vpop.permute.xlu1 %4240  ;;  %v9143_v4 = vpop.permute.xlu0 %4427  ;;  %v4784_v60 = vrot.slane %v9139_v26, %v9875_v19  ;;  %v4773_v6 = vrot.slane %v9139_v26, %v9876_v13  ;;  %v4762_v37 = vrot.slane %v9139_v26, %v9877_v25  ;;  %v4751_v5 = vrot.slane %v9139_v26, %v9878_v2 }
 0x714   :  { %v4740_v58 = vrot.slane %v9139_v26, %v9879_v31  ;;  %v4729_v30 = vrot.slane %v9139_v26, %v9880_v27 }
 0x715   :  { %4610 = vbcast.lane.b32.xlu1 %v4608_v32, 256  ;;  %4702 = vbcast.lane.b32.xlu0 %v9147_v62, 264  ;;  %v5637_v32 = vadd.f32 %v5636_v23, %v5635_v7 }
 0x717   :  { %v9150_v34 = vpop.permute.xlu1 %4236  ;;  %v9152_v21 = vpop.permute.xlu0 %4423 }
 0x719   :  { %4790 = vbcast.lane.b32.xlu0 %v4784_v60, 264  ;;  %4603 = vbcast.lane.b32.xlu1 %v4597_v38, 264 }
 0x71b   :  { %v9158_v3 = vpop.permute.xlu1 %4229  ;;  %v9160_v11 = vpop.permute.xlu0 %4416 }
 0x71d   :  { %4786 = vbcast.lane.b32.xlu0 %v4784_v60, 256  ;;  %4599 = vbcast.lane.b32.xlu1 %v4597_v38, 256  ;;  %v4718_v60 = vrot.slane %v9139_v26, %v9881_v57  ;;  %v4531_v38 = vrot.slane %v9121_v1, %v9882_v50  ;;  %v9244_v1 = vrot.slane %v9139_v26, %v9882_v50 }
 0x71f   :  { %v9162_v49 = vpop.permute.xlu1 %4225  ;;  %v9164_v51 = vpop.permute.xlu0 %4412 }
 0x721   :  { %4779 = vbcast.lane.b32.xlu0 %v4773_v6, 264  ;;  %4592 = vbcast.lane.b32.xlu1 %v4586_v42, 264 }
 0x723   :  { %v9170_v47 = vpop.permute.xlu1 %4218  ;;  %v9172_v17 = vpop.permute.xlu0 %4405 }
 0x725   :  { %4775 = vbcast.lane.b32.xlu0 %v4773_v6, 256  ;;  %4588 = vbcast.lane.b32.xlu1 %v4586_v42, 256  ;;  %v4088_v6 = vadd.f32 %v5637_v32, %v9115_v54 }
 0x727   :  { %v9174_v45 = vpop.permute.xlu1 %4214  ;;  %v9176_v56 = vpop.permute.xlu0 %4401 }
 0x729   :  { %4768 = vbcast.lane.b32.xlu0 %v4762_v37, 264  ;;  %4581 = vbcast.lane.b32.xlu1 %v4575_v24, 264 }
 0x72b   :  { %v9182_v36 = vpop.permute.xlu1 %4207  ;;  %v9184_v53 = vpop.permute.xlu0 %4394 }
 0x72c   :  { %9883 = vst [vmem:[#allocation16_spill] sm:$0xff] %v9182_v36  ;;  %9884 = vst [vmem:[#allocation24_spill] sm:$0xff] %v9184_v53 }
 0x72d   :  { %4764 = vbcast.lane.b32.xlu0 %v4762_v37, 256  ;;  %4577 = vbcast.lane.b32.xlu1 %v4575_v24, 256  ;;  %v9236_v24 = vadd.f32 %v9129_v39, %v4088_v6 }
 0x72f   :  { %v9186_v29 = vpop.permute.xlu1 %4203  ;;  %v9188_v59 = vpop.permute.xlu0 %4390  ;;  %v4872_v39 = vrot.slane %v9236_v24, %v9875_v19  ;;  %v4861_v7 = vrot.slane %v9236_v24, %v9876_v13  ;;  %v4674_v19 = vrot.slane %v9131_v63, %v9877_v25  ;;  %v4850_v6 = vrot.slane %v9236_v24, %v9877_v25 }
 0x730   :  { %9885 = vst [vmem:[#allocation25_spill] sm:$0xff] %v9186_v29  ;;  %9886 = vst [vmem:[#allocation27_spill] sm:$0xff] %v9188_v59  ;;  %v4652_v25 = vrot.slane %v9131_v63, %v9879_v31 }
 0x731   :  { %4757 = vbcast.lane.b32.xlu0 %v4751_v5, 264  ;;  %4570 = vbcast.lane.b32.xlu1 %v4564_v16, 264 }
 0x733   :  { %v9194_v61 = vpop.permute.xlu1 %4196  ;;  %v9196_v44 = vpop.permute.xlu0 %4383 }
 0x734   :  { %9887 = vst [vmem:[#allocation26_spill] sm:$0xff] %v9194_v61  ;;  %9888 = vst [vmem:[#allocation17_spill] sm:$0xff] %v9196_v44 }
 0x735   :  { %4753 = vbcast.lane.b32.xlu0 %v4751_v5, 256  ;;  %4566 = vbcast.lane.b32.xlu1 %v4564_v16, 256 }
 0x737   :  { %v9198_v8 = vpop.permute.xlu1 %4192  ;;  %v9200_v0 = vpop.permute.xlu0 %4379 }
 0x738   :  { %9889 = vst [vmem:[#allocation21_spill] sm:$0xff] %v9198_v8  ;;  %9890 = vst [vmem:[#allocation18_spill] sm:$0xff] %v9200_v0  ;;  %v4817_v0 = vrot.slane %v9236_v24, %v9880_v27 }
 0x739   :  { %4746 = vbcast.lane.b32.xlu0 %v4740_v58, 264  ;;  %4559 = vbcast.lane.b32.xlu1 %v4553_v22, 264 }
 0x73b   :  { %v9206_v20 = vpop.permute.xlu1 %4185  ;;  %v9208_v28 = vpop.permute.xlu0 %4372 }
 0x73c   :  { %9891 = vst [vmem:[#allocation22_spill] sm:$0xff] %v9206_v20  ;;  %9892 = vst [vmem:[#allocation19_spill] sm:$0xff] %v9208_v28  ;;  %v4828_v20 = vrot.slane %v9236_v24, %v9879_v31  ;;  %v4630_v31 = vrot.slane %v9131_v63, %v9881_v57 }
 0x73d   :  { %4742 = vbcast.lane.b32.xlu0 %v4740_v58, 256  ;;  %4555 = vbcast.lane.b32.xlu1 %v4553_v22, 256  ;;  %v4685_v22 = vrot.slane %v9131_v63, %v9876_v13  ;;  %v4663_v13 = vrot.slane %v9131_v63, %v9878_v2 }
 0x73f   :  { %v9210_v55 = vpop.permute.xlu1 %4181  ;;  %v9212_v46 = vpop.permute.xlu0 %4368 }
 0x740   :  { %9893 = vst [vmem:[#allocation23_spill] sm:$0xff] %v9210_v55  ;;  %9894 = vst [vmem:[#allocation20_spill] sm:$0xff] %v9212_v46 }
 0x741   :  { %4735 = vbcast.lane.b32.xlu0 %v4729_v30, 264  ;;  %4548 = vbcast.lane.b32.xlu1 %v4542_v35, 264 }
 0x743   :  { %v9218_v12 = vpop.permute.xlu1 %4350  ;;  %v9220_v15 = vpop.permute.xlu0 %4361 }
 0x744   :  { %9895 = vst [vmem:[#allocation29_spill] sm:$0xff] %v9220_v15  ;;  %v4839_v15 = vrot.slane %v9236_v24, %v9878_v2  ;;  %v4641_v2 = vrot.slane %v9131_v63, %v9880_v27  ;;  %v4806_v27 = vrot.slane %v9236_v24, %v9881_v57  ;;  %v4948_v57 = vld [vmem:[%s9614_s5 + $0x18] sm:$0xff] }
 0x745   :  { %4731 = vbcast.lane.b32.xlu0 %v4729_v30, 256  ;;  %4544 = vbcast.lane.b32.xlu1 %v4542_v35, 256 }
 0x746   :  { %5130 = vmatprep.mubr.f32.mxu0 %v4948_v57 }
 0x747   :  { %v9222_v18 = vpop.permute.xlu1 %4346  ;;  %v9224_v52 = vpop.permute.xlu0 %4526 }
 0x749   :  { %4724 = vbcast.lane.b32.xlu0 %v4718_v60, 264  ;;  %4537 = vbcast.lane.b32.xlu1 %v4531_v38, 264 }
 0x74b   :  { %v9231_v42 = vpop.permute.xlu1 %4339  ;;  %v9233_v37 = vpop.permute.xlu0 %4522 }
 0x74d   :  { %4720 = vbcast.lane.b32.xlu0 %v4718_v60, 256  ;;  %4533 = vbcast.lane.b32.xlu1 %v4531_v38, 256 }
 0x74f   :  { %v9238_v5 = vpop.permute.xlu1 %4335  ;;  %v9240_v16 = vpop.permute.xlu0 %4515 }
 0x751   :  { %4713 = vbcast.lane.b32.xlu0 %v9244_v1, 264  ;;  %4698 = vbcast.lane.b32.xlu1 %v9147_v62, 256 }
 0x753   :  { %v9248_v54 = vpop.permute.xlu1 %4328  ;;  %v9250_v58 = vpop.permute.xlu0 %4511 }
 0x755   :  { %4878 = vbcast.lane.b32.xlu0 %v4872_v39, 264  ;;  %4691 = vbcast.lane.b32.xlu1 %v4685_v22, 264 }
 0x757   :  { %v9256_v30 = vpop.permute.xlu1 %4324  ;;  %v9258_v26 = vpop.permute.xlu0 %4504 }
 0x759   :  { %4874 = vbcast.lane.b32.xlu0 %v4872_v39, 256  ;;  %4687 = vbcast.lane.b32.xlu1 %v4685_v22, 256 }
 0x75b   :  { %v9260_v35 = vpop.permute.xlu1 %4317  ;;  %v9262_v62 = vpop.permute.xlu0 %4500 }
 0x75d   :  { %4867 = vbcast.lane.b32.xlu0 %v4861_v7, 264  ;;  %4680 = vbcast.lane.b32.xlu1 %v4674_v19, 264 }
 0x75f   :  { %v9268_v23 = vpop.permute.xlu1 %4313  ;;  %v9270_v32 = vpop.permute.xlu0 %4493 }
 0x761   :  { %4863 = vbcast.lane.b32.xlu0 %v4861_v7, 256  ;;  %4676 = vbcast.lane.b32.xlu1 %v4674_v19, 256 }
 0x763   :  { %v9272_v60 = vpop.permute.xlu1 %4306  ;;  %v9274_v38 = vpop.permute.xlu0 %4489 }
 0x765   :  { %4856 = vbcast.lane.b32.xlu0 %v4850_v6, 264  ;;  %4669 = vbcast.lane.b32.xlu1 %v4663_v13, 264 }
 0x767   :  { %v9280_v39 = vpop.permute.xlu1 %4302  ;;  %v9282_v22 = vpop.permute.xlu0 %4482 }
 0x769   :  { %4852 = vbcast.lane.b32.xlu0 %v4850_v6, 256  ;;  %4665 = vbcast.lane.b32.xlu1 %v4663_v13, 256 }
 0x76b   :  { %v9284_v7 = vpop.permute.xlu1 %4295  ;;  %v9286_v19 = vpop.permute.xlu0 %4478 }
 0x76c   :  { %9896 = vst [vmem:[#allocation31_spill] sm:$0xff] %v9286_v19 }
 0x76d   :  { %4845 = vbcast.lane.b32.xlu0 %v4839_v15, 264  ;;  %4658 = vbcast.lane.b32.xlu1 %v4652_v25, 264 }
 0x76f   :  { %v9292_v55 = vpop.permute.xlu1 %4291  ;;  %v9294_v46 = vpop.permute.xlu0 %4471 }
 0x770   :  { %9897 = vst [vmem:[#allocation33_spill] sm:$0xff] %v9292_v55  ;;  %9898 = vst [vmem:[#allocation36_spill] sm:$0xff] %v9294_v46 }
 0x771   :  { %4841 = vbcast.lane.b32.xlu0 %v4839_v15, 256  ;;  %4654 = vbcast.lane.b32.xlu1 %v4652_v25, 256 }
 0x773   :  { %v9296_v6 = vpop.permute.xlu1 %4284  ;;  %v9298_v13 = vpop.permute.xlu0 %4467 }
 0x774   :  { %9899 = vst [vmem:[#allocation28_spill] sm:$0xff] %v9296_v6  ;;  %9900 = vst [vmem:[#allocation38_spill] sm:$0xff] %v9298_v13 }
 0x775   :  { %4834 = vbcast.lane.b32.xlu0 %v4828_v20, 264  ;;  %4647 = vbcast.lane.b32.xlu1 %v4641_v2, 264 }
 0x777   :  { %v9304_v28 = vpop.permute.xlu1 %4280  ;;  %v9306_v8 = vpop.permute.xlu0 %4460 }
 0x778   :  { %9901 = vst [vmem:[#allocation40_spill] sm:$0xff] %v9304_v28  ;;  %9902 = vst [vmem:[#allocation42_spill] sm:$0xff] %v9306_v8  ;;  %v4619_v8 = vrot.slane %v9131_v63, %v9882_v50 }
 0x779   :  { %4830 = vbcast.lane.b32.xlu0 %v4828_v20, 256  ;;  %4643 = vbcast.lane.b32.xlu1 %v4641_v2, 256  ;;  %v4946_v20 = vld [vmem:[%s9614_s5 + $0x8] sm:$0xff] }
 0x77a   :  { %5045 = vmatprep.mubr.f32.mxu1 %v4946_v20  ;;  %v4795_v20 = vrot.slane %v9236_v24, %v9882_v50  ;;  %v55_v50 = vld [vmem:[%s9616_s7 + $0x58] sm:$0xff] }
 0x77b   :  { %v9308_v15 = vpop.permute.xlu1 %4273  ;;  %v9310_v25 = vpop.permute.xlu0 %4456 }
 0x77c   :  { %9903 = vst [vmem:[#allocation30_spill] sm:$0xff] %v9308_v15  ;;  %9904 = vst [vmem:[#allocation44_spill] sm:$0xff] %v9310_v25 }
 0x77d   :  { %4823 = vbcast.lane.b32.xlu0 %v4817_v0, 264  ;;  %4636 = vbcast.lane.b32.xlu1 %v4630_v31, 264 }
 0x77f   :  { %v9316_v13 = vpop.permute.xlu1 %4269  ;;  %v9318_v61 = vpop.permute.xlu0 %4449 }
 0x780   :  { %9905 = vst [vmem:[#allocation32_spill] sm:$0xff] %v9316_v13  ;;  %9906 = vst [vmem:[#allocation46_spill] sm:$0xff] %v9318_v61 }
 0x781   :  { %4819 = vbcast.lane.b32.xlu0 %v4817_v0, 256  ;;  %4632 = vbcast.lane.b32.xlu1 %v4630_v31, 256 }
 0x783   :  { %v9323_v2 = vpop.permute.xlu1 %4445  ;;  %v4615_v25 = vpop.permute.xlu0 %4614 }
 0x784   :  { %9907 = vst [vmem:[#allocation48_spill] sm:$0xff] %v9323_v2  ;;  %v4896_v0 = vsel %vm4880_vm2, %v9111_v10, %v4615_v25  ;;  %v57_v10 = vld [vmem:[%s9616_s7 + $0x68] sm:$0xff] }
 0x785   :  { %4812 = vbcast.lane.b32.xlu0 %v4806_v27, 264  ;;  %4625 = vbcast.lane.b32.xlu1 %v4619_v8, 264 }
 0x787   :  { %v4611_v61 = vpop.permute.xlu1 %4610  ;;  %v4703_v13 = vpop.permute.xlu0 %4702 }
 0x788   :  { %v4912_v15 = vsel %vm4880_vm2, %v9218_v12, %v4703_v13 }
 0x789   :  { %4808 = vbcast.lane.b32.xlu0 %v4806_v27, 256  ;;  %5644 = vmatprep.subr.mxu1 %v4912_v15  ;;  %v58_v27 = vld [vmem:[%s9616_s7 + $0x70] sm:$0xff] }
 0x78a   :  { %4621 = vbcast.lane.b32.xlu1 %v4619_v8, 256  ;;  %5645 = vmatpush3.msra.mxu1 %v4896_v0  ;;  %v54_v0 = vld [vmem:[%s9616_s7 + $0x50] sm:$0xff] }
 0x78b   :  { %v4791_v63 = vpop.permute.xlu0 %4790  ;;  %v4604_v31 = vpop.permute.xlu1 %4603 }
 0x78d   :  { %4801 = vbcast.lane.b32.xlu0 %v4795_v20, 264 }
 0x78e   :  { %4357 = vbcast.lane.b32.xlu1 %v9082_v14, 256  ;;  %v56_v14 = vld [vmem:[%s9616_s7 + $0x60] sm:$0xff] }
 0x78f   :  { %v4787_v12 = vpop.permute.xlu0 %4786  ;;  %v4600_v13 = vpop.permute.xlu1 %4599 }
 0x791   :  { %4797 = vbcast.lane.b32.xlu0 %v4795_v20, 256  ;;  %v59_v20 = vld [vmem:[%s9616_s7 + $0x78] sm:$0x3] }
 0x792   :  { %4978 = vperm.xlu1 %5792, %v57_v10  }
 0x793   :  { %v9342_v15 = vpop.permute.xlu0 %4779  ;;  %v9344_v8 = vpop.permute.xlu1 %4592 }
 0x795   :  { %4709 = vbcast.lane.b32.xlu0 %v9244_v1, 256 }
 0x796   :  { %4968 = vperm.xlu1 %5792, %v55_v50  }
 0x797   :  { %v9353_v24 = vpop.permute.xlu0 %4775  ;;  %v9355_v25 = vpop.permute.xlu1 %4588 }
 0x799   :  { %4973 = vperm.xlu0 %5791, %v56_v14  }
 0x79a   :  { %5159 = vperm.xlu1 %5792, %v58_v27  }
 0x79b   :  { %v9363_v1 = vpop.permute.xlu0 %4768  ;;  %v9365_v57 = vpop.permute.xlu1 %4581 }
 0x79d   :  { %4963 = vperm.xlu0 %5791, %v54_v0  }
 0x79f   :  { %v9370_v10 = vpop.permute.xlu0 %4764  ;;  %v9372_v50 = vpop.permute.xlu1 %4577 }
 0x7a1   :  { %5164 = vperm.xlu0 %5791, %v59_v20  }
 0x7a3   :  { %v9374_v14 = vpop.permute.xlu0 %4757  ;;  %v9376_v27 = vpop.permute.xlu1 %4570 }
 0x7a7   :  { %v9378_v2 = vpop.permute.xlu0 %4753  ;;  %v9380_v28 = vpop.permute.xlu1 %4566 }
 0x7ab   :  { %v9382_v44 = vpop.permute.xlu0 %4746  ;;  %v9384_v0 = vpop.permute.xlu1 %4559 }
 0x7ac   :  { %9908 = vst [vmem:[#allocation34_spill] sm:$0xff] %v9382_v44  ;;  %9909 = vst [vmem:[#allocation50_spill] sm:$0xff] %v9384_v0 }
 0x7af   :  { %v9386_v46 = vpop.permute.xlu0 %4742  ;;  %v9388_v6 = vpop.permute.xlu1 %4555 }
 0x7b0   :  { %9910 = vst [vmem:[#allocation35_spill] sm:$0xff] %v9386_v46 }
 0x7b3   :  { %v9390_v29 = vpop.permute.xlu0 %4735  ;;  %v9392_v59 = vpop.permute.xlu1 %4548 }
 0x7b4   :  { %9911 = vst [vmem:[#allocation52_spill] sm:$0xff] %v9390_v29  ;;  %9912 = vst [vmem:[#allocation37_spill] sm:$0xff] %v9392_v59  ;;  %v4895_v59 = vsel %vm4880_vm2, %v9117_v33, %v4611_v61 }
 0x7b7   :  { %v9394_v20 = vpop.permute.xlu0 %4731  ;;  %v9396_v19 = vpop.permute.xlu1 %4544 }
 0x7b8   :  { %9913 = vst [vmem:[#allocation54_spill] sm:$0xff] %v9394_v20  ;;  %9914 = vst [vmem:[#allocation39_spill] sm:$0xff] %v9396_v19 }
 0x7bb   :  { %v9398_v55 = vpop.permute.xlu0 %4724  ;;  %v9400_v36 = vpop.permute.xlu1 %4537 }
 0x7bc   :  { %9915 = vst [vmem:[#allocation56_spill] sm:$0xff] %v9400_v36 }
 0x7bf   :  { %v9402_v53 = vpop.permute.xlu0 %4720  ;;  %v9404_v44 = vpop.permute.xlu1 %4533 }
 0x7c0   :  { %9916 = vst [vmem:[#allocation41_spill] sm:$0xff] %v9402_v53  ;;  %9917 = vst [vmem:[#allocation58_spill] sm:$0xff] %v9404_v44  ;;  %v4894_v44 = vsel %vm4880_vm2, %v9123_v9, %v4604_v31 }
 0x7c3   :  { %v9406_v0 = vpop.permute.xlu0 %4713  ;;  %v4699_v46 = vpop.permute.xlu1 %4698 }
 0x7c4   :  { %9918 = vst [vmem:[#allocation43_spill] sm:$0xff] %v9406_v0  ;;  %v4911_v29 = vsel %vm4880_vm2, %v9222_v18, %v4699_v46  ;;  %v4928_v0 = vsel %vm4880_vm2, %v9125_v41, %v4791_v63  ;;  %v4927_v46 = vsel %vm4880_vm2, %v9135_v43, %v4787_v12  ;;  %v4893_v41 = vsel %vm4880_vm2, %v9133_v48, %v4600_v13 }
 0x7c5   :  { %5646 = vmatprep.subr.mxu1 %v4911_v29  ;;  %v4926_v18 = vsel %vm4880_vm2, %v9143_v4, %v9342_v15  ;;  %v4892_v48 = vsel %vm4880_vm2, %v9141_v40, %v9344_v8  ;;  %v4925_v4 = vsel %vm4880_vm2, %v9152_v21, %v9353_v24  ;;  %v4891_v40 = vsel %vm4880_vm2, %v9150_v34, %v9355_v25  ;;  %v9919_v24 = vld [vmem:[#allocation34_spill] sm:$0xff]  ;;  %v9920_v25 = vld [vmem:[#allocation24_spill] sm:$0xff] }
 0x7c6   :  { %5647 = vmatpush3.msra.mxu1 %v4895_v59  ;;  %v4924_v21 = vsel %vm4880_vm2, %v9160_v11, %v9363_v1  ;;  %v4890_v34 = vsel %vm4880_vm2, %v9158_v3, %v9365_v57  ;;  %v4923_v11 = vsel %vm4880_vm2, %v9164_v51, %v9370_v10  ;;  %v4889_v3 = vsel %vm4880_vm2, %v9162_v49, %v9372_v50  ;;  %v9922_v1 = vld [vmem:[#allocation16_spill] sm:$0xff]  ;;  %v9923_v10 = vld [vmem:[#allocation33_spill] sm:$0xff]  ;;  %v9924_v50 = vld [vmem:[#allocation31_spill] sm:$0xff] }
 0x7c7   :  { %v4879_v19 = vpop.permute.xlu0 %4878  ;;  %v4692_v20 = vpop.permute.xlu1 %4691  ;;  %v4922_v51 = vsel %vm4880_vm2, %v9172_v17, %v9374_v14  ;;  %v4888_v49 = vsel %vm4880_vm2, %v9170_v47, %v9376_v27  ;;  %v4921_v17 = vsel %vm4880_vm2, %v9176_v56, %v9378_v2  ;;  %v4887_v47 = vsel %vm4880_vm2, %v9174_v45, %v9380_v28  ;;  %v9921_v2 = vld [vmem:[#allocation50_spill] sm:$0xff]  ;;  %v9925_v14 = vld [vmem:[#allocation35_spill] sm:$0xff] }
 0x7c8   :  { %v4910_v36 = vsel %vm4880_vm2, %v9231_v42, %v4692_v20  ;;  %v4944_v53 = vsel %vm4880_vm2, %v9224_v52, %v4879_v19  ;;  %v4920_v56 = vsel %vm4880_vm2, %v9920_v25, %v9919_v24  ;;  %v4886_v45 = vsel %vm4880_vm2, %v9922_v1, %v9921_v2  ;;  %v9926_v27 = vld [vmem:[#allocation27_spill] sm:$0xff]  ;;  %v9927_v20 = vld [vmem:[#allocation25_spill] sm:$0xff]  ;;  %v9951_v2 = vld [vmem:[#allocation46_spill] sm:$0xff] }
 0x7c9   :  { %5648 = vmatprep.subr.mxu1 %v4910_v36  ;;  %5688 = vmatprep.subr.mxu0 %v4944_v53  ;;  %v4950_v25 = vld [vmem:[%s9614_s5 + $0x28] sm:$0xff] }
 0x7ca   :  { %5649 = vmatpush3.msra.mxu1 %v4894_v44  ;;  %5689 = vmatpush3.msra.mxu0 %v4928_v0  ;;  %v4919_v0 = vsel %vm4880_vm2, %v9926_v27, %v9925_v14  ;;  %v4953_v27 = vld [vmem:[%s9614_s5 + $0x40] sm:$0xff] }
 0x7cb   :  { %v4875_v33 = vpop.permute.xlu0 %4874  ;;  %v4688_v29 = vpop.permute.xlu1 %4687 }
 0x7cc   :  { %v4909_v59 = vsel %vm4880_vm2, %v9238_v5, %v4688_v29  ;;  %v4943_v61 = vsel %vm4880_vm2, %v9233_v37, %v4875_v33  ;;  %v4885_v33 = vsel %vm4880_vm2, %v9927_v20, %v9388_v6 }
 0x7cd   :  { %5650 = vmatprep.subr.mxu1 %v4909_v59  ;;  %5690 = vmatprep.subr.mxu0 %v4943_v61  ;;  %v9928_v61 = vld [vmem:[#allocation28_spill] sm:$0xff] }
 0x7ce   :  { %5651 = vmatpush3.msra.mxu1 %v4893_v41  ;;  %5691 = vmatpush3.msra.mxu0 %v4927_v46  ;;  %v9929_v41 = vld [vmem:[#allocation36_spill] sm:$0xff] }
 0x7cf   :  { %v4868_v9 = vpop.permute.xlu0 %4867  ;;  %v4681_v36 = vpop.permute.xlu1 %4680 }
 0x7d0   :  { %v4908_v53 = vsel %vm4880_vm2, %v9248_v54, %v4681_v36  ;;  %v4942_v44 = vsel %vm4880_vm2, %v9240_v16, %v4868_v9  ;;  %v9930_v36 = vld [vmem:[#allocation52_spill] sm:$0xff] }
 0x7d1   :  { %5652 = vmatprep.subr.mxu1 %v4908_v53  ;;  %5692 = vmatprep.subr.mxu0 %v4942_v44  ;;  %v9931_v53 = vld [vmem:[#allocation17_spill] sm:$0xff] }
 0x7d2   :  { %5653 = vmatpush3.msra.mxu1 %v4892_v48  ;;  %5693 = vmatpush3.msra.mxu0 %v4926_v18  ;;  %v4918_v44 = vsel %vm4880_vm2, %v9931_v53, %v9930_v36  ;;  %v9932_v18 = vld [vmem:[#allocation37_spill] sm:$0xff]  ;;  %v9933_v48 = vld [vmem:[#allocation26_spill] sm:$0xff]  ;;  %v4955_v36 = vld [vmem:[%s9614_s5 + $0x50] sm:$0xff] }
 0x7d3   :  { %v4864_v43 = vpop.permute.xlu0 %4863  ;;  %v4677_v52 = vpop.permute.xlu1 %4676  ;;  %v4884_v6 = vsel %vm4880_vm2, %v9933_v48, %v9932_v18  ;;  %v4960_v53 = vld [vmem:[%s9614_s5 + $0x78] sm:$0xff]  ;;  %v5155_v18 = vld [vmem:[%s9615_s6] sm:$0xff] }
 0x7d4   :  { %v4907_v42 = vsel %vm4880_vm2, %v9256_v30, %v4677_v52  ;;  %v4941_v37 = vsel %vm4880_vm2, %v9250_v58, %v4864_v43 }
 0x7d5   :  { %5654 = vmatprep.subr.mxu1 %v4907_v42  ;;  %5694 = vmatprep.subr.mxu0 %v4941_v37  ;;  %v9934_v42 = vld [vmem:[#allocation40_spill] sm:$0xff] }
 0x7d6   :  { %5655 = vmatpush3.msra.mxu1 %v4891_v40  ;;  %5695 = vmatpush3.msra.mxu0 %v4925_v4  ;;  %v9935_v4 = vld [vmem:[#allocation38_spill] sm:$0xff] }
 0x7d7   :  { %v4857_v5 = vpop.permute.xlu0 %4856  ;;  %v4670_v16 = vpop.permute.xlu1 %4669 }
 0x7d8   :  { %v4906_v54 = vsel %vm4880_vm2, %v9260_v35, %v4670_v16  ;;  %v4940_v58 = vsel %vm4880_vm2, %v9258_v26, %v4857_v5  ;;  %v9936_v5 = vld [vmem:[#allocation54_spill] sm:$0xff] }
 0x7d9   :  { %5656 = vmatprep.subr.mxu1 %v4906_v54  ;;  %5696 = vmatprep.subr.mxu0 %v4940_v58  ;;  %v9937_v16 = vld [vmem:[#allocation18_spill] sm:$0xff]  ;;  %v9938_v58 = vld [vmem:[#allocation39_spill] sm:$0xff] }
 0x7da   :  { %5657 = vmatpush3.msra.mxu1 %v4890_v34  ;;  %5697 = vmatpush3.msra.mxu0 %v4924_v21  ;;  %v4917_v54 = vsel %vm4880_vm2, %v9937_v16, %v9936_v5  ;;  %v9939_v21 = vld [vmem:[#allocation21_spill] sm:$0xff] }
 0x7db   :  { %v4853_v30 = vpop.permute.xlu0 %4852  ;;  %v4666_v19 = vpop.permute.xlu1 %4665  ;;  %v4883_v34 = vsel %vm4880_vm2, %v9939_v21, %v9938_v58 }
 0x7dc   :  { %v4905_v35 = vsel %vm4880_vm2, %v9268_v23, %v4666_v19  ;;  %v4939_v26 = vsel %vm4880_vm2, %v9262_v62, %v4853_v30 }
 0x7dd   :  { %5658 = vmatprep.subr.mxu1 %v4905_v35  ;;  %5698 = vmatprep.subr.mxu0 %v4939_v26  ;;  %v9940_v35 = vld [vmem:[#allocation30_spill] sm:$0xff] }
 0x7de   :  { %5659 = vmatpush3.msra.mxu1 %v4889_v3  ;;  %5699 = vmatpush3.msra.mxu0 %v4923_v11  ;;  %v9941_v11 = vld [vmem:[#allocation42_spill] sm:$0xff] }
 0x7df   :  { %v4846_v63 = vpop.permute.xlu0 %4845  ;;  %v4659_v31 = vpop.permute.xlu1 %4658 }
 0x7e0   :  { %v4904_v23 = vsel %vm4880_vm2, %v9272_v60, %v4659_v31  ;;  %v4938_v62 = vsel %vm4880_vm2, %v9270_v32, %v4846_v63  ;;  %v9942_v63 = vld [vmem:[#allocation19_spill] sm:$0xff] }
 0x7e1   :  { %5660 = vmatprep.subr.mxu1 %v4904_v23  ;;  %5700 = vmatprep.subr.mxu0 %v4938_v62  ;;  %v4916_v31 = vsel %vm4880_vm2, %v9942_v63, %v9398_v55  ;;  %v9943_v23 = vld [vmem:[#allocation56_spill] sm:$0xff]  ;;  %v9944_v62 = vld [vmem:[#allocation22_spill] sm:$0xff] }
 0x7e2   :  { %5661 = vmatpush3.msra.mxu1 %v4888_v49  ;;  %5701 = vmatpush3.msra.mxu0 %v4922_v51  ;;  %v4882_v51 = vsel %vm4880_vm2, %v9944_v62, %v9943_v23 }
 0x7e3   :  { %v4842_v12 = vpop.permute.xlu0 %4841  ;;  %v4655_v13 = vpop.permute.xlu1 %4654 }
 0x7e4   :  { %v4903_v60 = vsel %vm4880_vm2, %v9280_v39, %v4655_v13  ;;  %v4937_v32 = vsel %vm4880_vm2, %v9274_v38, %v4842_v12  ;;  %v9945_v13 = vld [vmem:[#allocation44_spill] sm:$0xff] }
 0x7e5   :  { %5662 = vmatprep.subr.mxu1 %v4903_v60  ;;  %5702 = vmatprep.subr.mxu0 %v4937_v32  ;;  %v9946_v32 = vld [vmem:[#allocation41_spill] sm:$0xff] }
 0x7e6   :  { %5663 = vmatpush3.msra.mxu1 %v4887_v47  ;;  %5703 = vmatpush3.msra.mxu0 %v4921_v17  ;;  %v9947_v17 = vld [vmem:[#allocation20_spill] sm:$0xff] }
 0x7e7   :  { %v4835_v15 = vpop.permute.xlu0 %4834  ;;  %v4648_v8 = vpop.permute.xlu1 %4647  ;;  %v4915_v47 = vsel %vm4880_vm2, %v9947_v17, %v9946_v32 }
 0x7e8   :  { %v4902_v39 = vsel %vm4880_vm2, %v9284_v7, %v4648_v8  ;;  %v4936_v38 = vsel %vm4880_vm2, %v9282_v22, %v4835_v15  ;;  %v9948_v15 = vld [vmem:[#allocation32_spill] sm:$0xff]  ;;  %v4945_v8 = vld [vmem:[%s9614_s5] sm:$0xff] }
 0x7e9   :  { %5664 = vmatprep.subr.mxu1 %v4902_v39  ;;  %5704 = vmatprep.subr.mxu0 %v4936_v38  ;;  %v9949_v39 = vld [vmem:[#allocation58_spill] sm:$0xff]  ;;  %v9950_v38 = vld [vmem:[#allocation23_spill] sm:$0xff] }
 0x7ea   :  { %5665 = vmatpush3.msra.mxu1 %v4886_v45  ;;  %5705 = vmatpush3.msra.mxu0 %v4920_v56  ;;  %v4881_v24 = vsel %vm4880_vm2, %v9950_v38, %v9949_v39  ;;  %v9952_v45 = vld [vmem:[#allocation43_spill] sm:$0xff] }
 0x7eb   :  { %v4831_v28 = vpop.permute.xlu0 %4830  ;;  %v4644_v57 = vpop.permute.xlu1 %4643 }
 0x7ec   :  { %v4901_v7 = vsel %vm4880_vm2, %v9923_v10, %v4644_v57  ;;  %v4935_v22 = vsel %vm4880_vm2, %v9924_v50, %v4831_v28  ;;  %v9953_v28 = vld [vmem:[#allocation29_spill] sm:$0xff] }
 0x7ed   :  { %5666 = vmatprep.subr.mxu1 %v4901_v7  ;;  %5706 = vmatprep.subr.mxu0 %v4935_v22  ;;  %v4914_v57 = vsel %vm4880_vm2, %v9953_v28, %v9952_v45  ;;  %v4949_v10 = vld [vmem:[%s9614_s5 + $0x20] sm:$0xff]  ;;  %v4954_v7 = vld [vmem:[%s9614_s5 + $0x48] sm:$0xff]  ;;  %v9954_v22 = vld [vmem:[#allocation48_spill] sm:$0xff] }
 0x7ee   :  { %5667 = vmatpush3.msra.mxu1 %v4885_v33  ;;  %5707 = vmatpush3.msra.mxu0 %v4919_v0  ;;  %v4958_v0 = vld [vmem:[%s9614_s5 + $0x68] sm:$0xff] }
 0x7ef   :  { %v4824_v29 = vpop.permute.xlu0 %4823  ;;  %v4637_v59 = vpop.permute.xlu1 %4636 }
 0x7f0   :  { %v4900_v46 = vsel %vm4880_vm2, %v9928_v61, %v4637_v59  ;;  %v4934_v9 = vsel %vm4880_vm2, %v9929_v41, %v4824_v29  ;;  %v4947_v29 = vld [vmem:[%s9614_s5 + $0x10] sm:$0xff]  ;;  %v4952_v61 = vld [vmem:[%s9614_s5 + $0x38] sm:$0xff] }
 0x7f1   :  { %5668 = vmatprep.subr.mxu1 %v4900_v46  ;;  %5708 = vmatprep.subr.mxu0 %v4934_v9  ;;  %v4957_v46 = vld [vmem:[%s9614_s5 + $0x60] sm:$0xff]  ;;  %v4951_v41 = vld [vmem:[%s9614_s5 + $0x30] sm:$0xff]  ;;  %v4956_v9 = vld [vmem:[%s9614_s5 + $0x58] sm:$0xff] }
 0x7f2   :  { %5669 = vmatpush3.msra.mxu1 %v4884_v6  ;;  %5709 = vmatpush3.msra.mxu0 %v4918_v44  ;;  %v4959_v44 = vld [vmem:[%s9614_s5 + $0x70] sm:$0xff] }
 0x7f3   :  { %v4820_v43 = vpop.permute.xlu0 %4819  ;;  %v4633_v52 = vpop.permute.xlu1 %4632 }
 0x7f4   :  { %v4899_v37 = vsel %vm4880_vm2, %v9934_v42, %v4633_v52  ;;  %v4933_v40 = vsel %vm4880_vm2, %v9935_v4, %v4820_v43 }
 0x7f5   :  { %5670 = vmatprep.subr.mxu1 %v4899_v37  ;;  %5710 = vmatprep.subr.mxu0 %v4933_v40 }
 0x7f6   :  { %5671 = vmatpush3.msra.mxu1 %v4883_v34  ;;  %5711 = vmatpush3.msra.mxu0 %v4917_v54 }
 0x7f7   :  { %v4813_v30 = vpop.permute.xlu0 %4812  ;;  %v4626_v19 = vpop.permute.xlu1 %4625 }
 0x7f8   :  { %v4898_v26 = vsel %vm4880_vm2, %v9940_v35, %v4626_v19  ;;  %v4932_v3 = vsel %vm4880_vm2, %v9941_v11, %v4813_v30 }
 0x7f9   :  { %5672 = vmatprep.subr.mxu1 %v4898_v26  ;;  %5712 = vmatprep.subr.mxu0 %v4932_v3 }
 0x7fa   :  { %5673 = vmatpush3.msra.mxu1 %v4882_v51  ;;  %5713 = vmatpush3.msra.mxu0 %v4916_v31 }
 0x7fb   :  { %v4809_v49 = vpop.permute.xlu0 %4808 }
 0x7fc   :  { %v4622_v12 = vpop.permute.xlu1 %4621  ;;  %v4931_v60 = vsel %vm4880_vm2, %v9945_v13, %v4809_v49 }
 0x7fd   :  { %v4897_v55 = vsel %vm4880_vm2, %v9948_v15, %v4622_v12  ;;  %5714 = vmatprep.subr.mxu0 %v4931_v60 }
 0x7fe   :  { %5674 = vmatprep.subr.mxu1 %v4897_v55  ;;  %5715 = vmatpush3.msra.mxu0 %v4915_v47 }
 0x7ff   :  { %5675 = vmatpush3.msra.mxu1 %v4881_v24  ;;  %v4802_v56 = vpop.permute.xlu0 %4801 }
 0x800   :  { %5046 = vmatmul.mubr.f32.vlgmr.msra.gmra.mxu1 %v4945_v8  ;;  %v4930_v1 = vsel %vm4880_vm2, %v9951_v2, %v4802_v56  ;;  %v4358_v20 = vpop.permute.xlu1 %4357  ;;  %v5156_v2 = vld [vmem:[%s9615_s6 + $0x8] sm:$0x3] }
 0x801   :  { %5716 = vmatprep.subr.mxu0 %v4930_v1  ;;  %5050 = vmatprep.mubr.f32.mxu1 %v4950_v25 }
 0x802   :  { %5717 = vmatpush3.msra.mxu0 %v4914_v57 }
 0x803   :  { %v4798_v50 = vpop.permute.xlu0 %4797 }
 0x804   :  { %5051 = vmatmul.mubr.f32.gmra.mxu1 %v4949_v10  ;;  %v4929_v14 = vsel %vm4880_vm2, %v9954_v22, %v4798_v50 }
 0x805   :  { %5718 = vmatprep.subr.mxu0 %v4929_v14  ;;  %5055 = vmatprep.mubr.f32.mxu1 %v4954_v7 }
 0x807   :  { %v4710_v33 = vpop.permute.xlu0 %4709 }
 0x808   :  { %v4913_v59 = vsel %vm4880_vm2, %v4358_v20, %v4710_v33  ;;  %5056 = vmatmul.mubr.f32.gmra.mxu1 %v4953_v27 }
 0x809   :  { %5719 = vmatpush3.msra.mxu0 %v4913_v59  ;;  %5060 = vmatprep.mubr.f32.mxu1 %v4958_v0 }
 0x80a   :  { %5131 = vmatmul.mubr.f32.vlgmr.msra.gmra.mxu0 %v4947_v29 }
 0x80b   :  { %5135 = vmatprep.mubr.f32.mxu0 %v4952_v61 }
 0x80c   :  { %5061 = vmatmul.mubr.f32.gmra.mxu1 %v4957_v46 }
 0x80d   :  { %5773 = vmatprep.mubr.msk.f32.mxu1 %vm1238_vm6, %v5155_v18  ;;  %v4979_v34 = vpop.permute.xlu1 %4978 }
 0x80e   :  { %5136 = vmatmul.mubr.f32.gmra.mxu0 %v4951_v41 }
 0x80f   :  { %5140 = vmatprep.mubr.f32.mxu0 %v4956_v9 }
 0x811   :  { %v4969_v13 = vpop.permute.xlu1 %4968 }
 0x812   :  { %5141 = vmatmul.mubr.f32.gmra.mxu0 %v4955_v36 }
 0x813   :  { %5145 = vmatprep.mubr.f32.mxu0 %v4960_v53 }
 0x814   :  { %v4974_v26 = vpop.permute.xlu0 %4973 }
 0x815   :  { %v5160_v45 = vpop.permute.xlu1 %5159 }
 0x816   :  { %5146 = vmatmul.mubr.f32.gmra.mxu0 %v4959_v44 }
 0x818   :  { %v4964_v15 = vpop.permute.xlu0 %4963 }
 0x81c   :  { %v5165_v10 = vpop.permute.xlu0 %5164 }
 0x8c0   :  { %v5676_v48 = vpop.f32.mrf.mxu1 }
 0x8c2   :  { %v5677_v6 = vpop.f32.mrf.mxu1 }
 0x8c3   :  { %v5678_v31 = vadd.f32 %v5677_v6, %v5676_v48 }
 0x8c4   :  { %v5679_v43 = vpop.f32.mrf.mxu1 }
 0x8c5   :  { %v5048_v55 = vadd.f32 %v5678_v31, %v4964_v15 }
 0x8c6   :  { %v5680_v52 = vpop.f32.mrf.mxu1 }
 0x8c7   :  { %v5681_v3 = vadd.f32 %v5680_v52, %v5679_v43 }
 0x8c8   :  { %v5682_v42 = vpop.f32.mrf.mxu1 }
 0x8c9   :  { %v5053_v60 = vadd.f32 %v5681_v3, %v4969_v13 }
 0x8ca   :  { %v5683_v37 = vpop.f32.mrf.mxu1  ;;  %v5720_v4 = vpop.f32.mrf.mxu0 }
 0x8cb   :  { %v5684_v19 = vadd.f32 %v5683_v37, %v5682_v42 }
 0x8cc   :  { %v5721_v40 = vpop.f32.mrf.mxu0  ;;  %v5685_v5 = vpop.f32.mrf.mxu1 }
 0x8cd   :  { %v5058_v62 = vadd.f32 %v5684_v19, %v4974_v26  ;;  %v5722_v32 = vadd.f32 %v5721_v40, %v5720_v4 }
 0x8ce   :  { %v5723_v16 = vpop.f32.mrf.mxu0  ;;  %v5686_v58 = vpop.f32.mrf.mxu1 }
 0x8cf   :  { %v5687_v35 = vadd.f32 %v5686_v58, %v5685_v5  ;;  %v5133_v38 = vadd.f32 %v5722_v32, %v5048_v55 }
 0x8d0   :  { %v5724_v54 = vpop.f32.mrf.mxu0 }
 0x8d1   :  { %v5063_v51 = vadd.f32 %v5687_v35, %v4979_v34  ;;  %v5725_v49 = vadd.f32 %v5724_v54, %v5723_v16  ;;  %v5151_v56 = vmax.f32 %v5133_v38, 0.0 }
 0x8d2   :  { %v5726_v21 = vpop.f32.mrf.mxu0 }
 0x8d3   :  { %v5138_v8 = vadd.f32 %v5725_v49, %v5053_v60 }
 0x8d4   :  { %v5727_v30 = vpop.f32.mrf.mxu0 }
 0x8d5   :  { %v5728_v63 = vadd.f32 %v5727_v30, %v5726_v21  ;;  %v5152_v25 = vmax.f32 %v5138_v8, 0.0 }
 0x8d6   :  { %v5729_v11 = vpop.f32.mrf.mxu0 }
 0x8d7   :  { %v5143_v17 = vadd.f32 %v5728_v63, %v5058_v62 }
 0x8d8   :  { %v5730_v23 = vpop.f32.mrf.mxu0 }
 0x8d9   :  { %v5731_v12 = vadd.f32 %v5730_v23, %v5729_v11  ;;  %v5153_v24 = vmax.f32 %v5143_v17, 0.0 }
 0x8db   :  { %v5148_v47 = vadd.f32 %v5731_v12, %v5063_v51 }
 0x8dd   :  { %v5154_v39 = vmax.f32 %v5148_v47, 0.0 }
 0x8df   :  { %5765 = vmatprep.subr.mxu1 %v5154_v39 }
 0x8e0   :  { %5766 = vmatpush3.msra.mxu1 %v5154_v39 }
 0x8e1   :  { %5767 = vmatprep.subr.mxu1 %v5153_v24 }
 0x8e2   :  { %5768 = vmatpush3.msra.mxu1 %v5153_v24 }
 0x8e3   :  { %5769 = vmatprep.subr.mxu1 %v5152_v25 }
 0x8e4   :  { %5770 = vmatpush3.msra.mxu1 %v5152_v25 }
 0x8e5   :  { %5771 = vmatprep.subr.mxu1 %v5151_v56 }
 0x8e6   :  { %5772 = vmatpush3.msra.mxu1 %v5151_v56 }
 0x8e7   :  { %5774 = vmatmul.mubr.msk.f32.vlgmr.msra.gmra.mxu1 %vm1238_vm6, %v5156_v2 }
 0x9a7   :  { %v5775_v1 = vpop.f32.mrf.mxu1 }
 0x9a8   :  { %v5245_v7 = vadd.f32 %v5775_v1, %v5165_v10 }
 0x9a9   :  { %v5239_v28 = vpop.f32.mrf.mxu1 }
 0x9aa   :  { %v5240_v57 = vadd.f32 %v5239_v28, %v5160_v45 }
 0x9ac   :  { %5248 = vxpose.xlu1.b32.start [1/2] (short) (narrow) %v5240_v57, 8 }
 0x9b0   :  { %5249 = vxpose.xlu1.b32.end [2/2] (short) (narrow) %v5245_v7, 8 }
 0xa28   :  { %v5264_v50 = vpop.trf.xlu1 }
 0xa29   :  { %5281 = vst.msk [vmem:[#allocation5] sm:$0x3] %vm5280_vm3, %v5264_v50 }
 0xa2a   :  { %5900 = shalt.err (!%p5897_p9)
}
 0xa2b   :  { %5291 = dma.vmem_to_hbm [thread:$0]  %s5289_s3, 32, %s9617_s8, [#allocation4]  }
 0xa2c   :  { %5911 = dma.done.wait [#allocation4], 32  }
 0xa2d   :  { %5912 = vsyncadd [#allocation4], 4294967264 }
 0xa2e   :  { %5295 = vsyncpa [#allocation3], 1 }
 0xa2f   :  { %5296 = vsyncpa [#allocation4], 1 }

</bundles_post_ra>
